<compile_context>
chip_gen: v6e
topology: v6e:2x2x1
jax: 0.10.0
libtpu: 0.0.40
codegen_flags: <defaults>
</compile_context>

<pallas_src>
import functools

import jax
import jax.numpy as jnp
from jax import lax
from jax.experimental import pallas as pl
from jax.experimental.pallas import tpu as pltpu


def _round_up(x, m):
    return ((x + m - 1) // m) * m


def _full_spec(a):
    nd = a.ndim
    return pl.BlockSpec(a.shape, lambda *_: (0,) * nd)


# ----------------------------------------------------------------------------
# Kernel A: fused ConvTokenEmbedder (fused char conv + maxpool + highway + projection)
# ----------------------------------------------------------------------------
def _token_embedder_kernel(e_dim, f_dim, num_highways,
                           x_ref, wconv_ref, bconv_ref, pmask_ref, *rest):
    hw_refs = rest[: 2 * num_highways]
    wp_ref = rest[2 * num_highways]
    bp_ref = rest[2 * num_highways + 1]
    out_ref = rest[2 * num_highways + 2]

    n = x_ref.shape[0]
    npos = pmask_ref.shape[0]
    k_span_e = wconv_ref.shape[0]                 # k_max * E
    xb = x_ref[...].astype(jnp.bfloat16)          # (n, T_pad*E) lane-dense

    # Conv windows: npos lane slices of the lane-dense input -> ONE fused matmul for all filters.
    win = jnp.concatenate(
        [xb[:, p * e_dim: p * e_dim + k_span_e] for p in range(npos)], axis=0)  # (npos*n, k_max*E)
    y = jnp.dot(win, wconv_ref[...], preferred_element_type=jnp.float32)        # (npos*n, F)
    # Mask positions that are invalid for each filter (torch 'valid' conv), then max over positions.
    y = y.reshape(npos, n, f_dim) + pmask_ref[...]
    h = jnp.max(y, axis=0)                                                       # (n, F)
    # Conv bias is position-constant: adding after the max == before (then relu, as in torch).
    h = jax.nn.relu(h + bconv_ref[...])

    for l in range(num_highways):
        w_hg = hw_refs[2 * l][...]                 # (F, 2F) bf16 = [hidden | gate] fused
        b_hg = hw_refs[2 * l + 1][...]             # (1, 2F) f32
        proj = jnp.dot(h.astype(jnp.bfloat16), w_hg, preferred_element_type=jnp.float32) + b_hg
        hidden = jax.nn.relu(proj[:, :f_dim])
        gate = jax.nn.sigmoid(proj[:, f_dim:])
        # Carry gate applied to the INPUT, transform gets (1-gate): matches the reference Highway.
        h = gate * h + (1.0 - gate) * hidden

    out = jnp.dot(h.astype(jnp.bfloat16), wp_ref[...], preferred_element_type=jnp.float32) + bp_ref[...]
    out_ref[...] = out.astype(out_ref.dtype)


def conv_token_embedder(x2d, prep, configs):
    # x2d: (N, T_pad*E) f32 lane-dense, already zero-padded along the token axis.
    filters = configs["char_conv_filters"]
    e_dim = configs["char_embedding_dim"]
    f_dim = sum(oc for _, oc in filters)
    p_dim = configs["projection_dim"]
    num_hw = configs["num_highways"]
    n = x2d.shape[0]

    w_args = [prep["conv_w"], prep["conv_b"], prep["conv_pos_mask"]]
    for (w_hg, b_hg) in prep["highway"]:
        w_args += [w_hg, b_hg]
    w_args += [prep["proj_w"], prep["proj_b"]]

    # Multiple of 8 and >= 2 grid steps (keeps both v7x TensorCores busy at small N).
    row_tile = min(256, max(8, _round_up(pl.cdiv(n, 2), 8)))
    grid = (pl.cdiv(n, row_tile),)

    in_specs = [pl.BlockSpec((row_tile, x2d.shape[1]), lambda i: (i, 0))]
    for a in w_args:
        in_specs.append(pl.BlockSpec(a.shape, lambda i, nd=a.ndim: (0,) * nd))

    kernel = functools.partial(_token_embedder_kernel, e_dim, f_dim, num_hw)
    return pl.pallas_call(
        kernel,
        out_shape=jax.ShapeDtypeStruct((n, p_dim), jnp.float32),
        grid=grid,
        in_specs=in_specs,
        out_specs=pl.BlockSpec((row_tile, p_dim), lambda i: (i, 0)),
        compiler_params=pltpu.CompilerParams(dimension_semantics=("parallel",)),
    )(x2d, *w_args)


# ----------------------------------------------------------------------------
# Kernel B: one LSTM layer, BOTH directions interleaved in a single body
# ----------------------------------------------------------------------------
def _lstm_bidir_kernel(seq_len, bsz, h_dim,
                       x_ref, mask_ref, wih_ref, whh_ref, b_ref, wp_ref, bp_ref,
                       out_ref, xpre_f, xpre_b, h_f, h_b):
    gh = 4 * h_dim

    # Hoisted input matmuls for both directions: (S*B, Din) x (Din, 4H), bf16 / f32 acc.
    xf = x_ref[0].astype(jnp.bfloat16)
    xb = x_ref[1].astype(jnp.bfloat16)
    pre_f = jnp.dot(xf, wih_ref[0], preferred_element_type=jnp.float32) + b_ref[0]
    pre_b = jnp.dot(xb, wih_ref[1], preferred_element_type=jnp.float32) + b_ref[1]
    # xpre scratch stored bf16 (only re-read additively per step) to bound VMEM on v7x.
    xpre_f[...] = pre_f.reshape(seq_len, bsz, gh).astype(jnp.bfloat16)
    xpre_b[...] = pre_b.reshape(seq_len, bsz, gh).astype(jnp.bfloat16)

    # Recurrent weights stay f32: rounding error on the h->h path compounds over timesteps.
    whh_f = whh_ref[0]
    whh_b = whh_ref[1]

    def step(t, carry):
        hf, cf, hb, cb = carry
        # Two independent recurrences per step -> their matmuls/EUP ops can be co-scheduled.
        g_f = xpre_f[t].astype(jnp.float32) + jnp.dot(hf, whh_f, preferred_element_type=jnp.float32)
        g_b = xpre_b[t].astype(jnp.float32) + jnp.dot(hb, whh_b, preferred_element_type=jnp.float32)
        # Full-width (128-lane) transcendentals first, then lane-slice the results.
        s_f = jax.nn.sigmoid(g_f)
        u_f = jnp.tanh(g_f)
        s_b = jax.nn.sigmoid(g_b)
        u_b = jnp.tanh(g_b)
        # PyTorch gate order: i, f, g, o.
        cf_n = s_f[:, h_dim:2 * h_dim] * cf + s_f[:, :h_dim] * u_f[:, 2 * h_dim:3 * h_dim]
        hf_n = s_f[:, 3 * h_dim:] * jnp.tanh(cf_n)
        cb_n = s_b[:, h_dim:2 * h_dim] * cb + s_b[:, :h_dim] * u_b[:, 2 * h_dim:3 * h_dim]
        hb_n = s_b[:, 3 * h_dim:] * jnp.tanh(cb_n)
        h_f[t] = hf_n
        h_b[t] = hb_n
        return hf_n, cf_n, hb_n, cb_n

    z = jnp.zeros((bsz, h_dim), jnp.float32)
    lax.fori_loop(0, seq_len, step, (z, z, z, z), unroll=True)

    # Hoisted projections: zero pad timesteps first (pad_packed_sequence emits zeros there),
    # so padded rows come out as the projection bias — exactly like Linear on the padded output.
    m = mask_ref[...]                                               # (S*B, 1)
    hf_all = (h_f[...].reshape(seq_len * bsz, h_dim) * m).astype(jnp.bfloat16)
    hb_all = (h_b[...].reshape(seq_len * bsz, h_dim) * m).astype(jnp.bfloat16)
    out_ref[0] = (jnp.dot(hf_all, wp_ref[0], preferred_element_type=jnp.float32)
                  + bp_ref[0]).astype(out_ref.dtype)
    out_ref[1] = (jnp.dot(hb_all, wp_ref[1], preferred_element_type=jnp.float32)
                  + bp_ref[1]).astype(out_ref.dtype)


def lstm_bidir(x_stacked, mask2d, lp, seq_len, bsz):
    # x_stacked: (2, S*B, Din) time-major-flattened in the wrapper (free layout plumbing);
    # mask2d: (S*B, 1); lp: per-layer params prepared at init (stacked / transposed / bf16).
    _, sb, d_in = x_stacked.shape
    h_dim = lp["w_hh"].shape[1]
    gh = 4 * h_dim
    p_dim = lp["w_proj"].shape[2]

    kernel = functools.partial(_lstm_bidir_kernel, seq_len, bsz, h_dim)
    return pl.pallas_call(
        kernel,
        out_shape=jax.ShapeDtypeStruct((2, sb, p_dim), jnp.float32),
        grid=(1,),
        in_specs=[_full_spec(x_stacked), _full_spec(mask2d),
                  _full_spec(lp["w_ih"]), _full_spec(lp["w_hh"]), _full_spec(lp["b"]),
                  _full_spec(lp["w_proj"]), _full_spec(lp["b_proj"])],
        out_specs=pl.BlockSpec((2, sb, p_dim), lambda i: (0, 0, 0)),
        scratch_shapes=[
            pltpu.VMEM((seq_len, bsz, gh), jnp.bfloat16),    # xpre fwd
            pltpu.VMEM((seq_len, bsz, gh), jnp.bfloat16),    # xpre bwd
            pltpu.VMEM((seq_len, bsz, h_dim), jnp.float32),  # h fwd
            pltpu.VMEM((seq_len, bsz, h_dim), jnp.float32),  # h bwd
        ],
        compiler_params=pltpu.CompilerParams(
            dimension_semantics=("arbitrary",),
            vmem_limit_bytes=32 * 1024 * 1024),
    )(x_stacked, mask2d, lp["w_ih"], lp["w_hh"], lp["b"], lp["w_proj"], lp["b_proj"])


# ----------------------------------------------------------------------------
# Kernel C: classifier — vocab-outermost tiled matmul (weight streamed from HBM once)
# ----------------------------------------------------------------------------
def _classifier_kernel(x_ref, w_ref, b_ref, out_ref):
    out_ref[...] = (
        jnp.dot(x_ref[...].astype(jnp.bfloat16), w_ref[...],
                preferred_element_type=jnp.float32) + b_ref[...]
    ).astype(out_ref.dtype)


def classifier(x, w_t, b2):
    # x: (N, P) f32; w_t: (P, V) bf16 (pre-transposed/cast at init); b2: (1, V) f32
    n, p_dim = x.shape
    v = w_t.shape[1]
    tm = min(256, max(8, _round_up(pl.cdiv(n, 2), 8)))      # >=2 row tiles for v7x megacore
    tv = v if v <= 128 else min(512, (v // 128) * 128)       # 128-multiple (lane-dense stores)
    # Vocab tile outermost, row tile innermost: the (P, tv) weight block index is constant
    # across consecutive inner steps, so Pallas DMAs each weight tile exactly once.
    grid = (pl.cdiv(v, tv), pl.cdiv(n, tm))
    return pl.pallas_call(
        _classifier_kernel,
        out_shape=jax.ShapeDtypeStruct((n, v), jnp.float32),
        grid=grid,
        in_specs=[
            pl.BlockSpec((tm, p_dim), lambda vi, ri: (ri, 0)),
            pl.BlockSpec((p_dim, tv), lambda vi, ri: (0, vi)),
            pl.BlockSpec((1, tv), lambda vi, ri: (0, vi)),
        ],
        out_specs=pl.BlockSpec((tm, tv), lambda vi, ri: (ri, vi)),
        compiler_params=pltpu.CompilerParams(dimension_semantics=("parallel", "parallel")),
    )(x, w_t, b2)


# ----------------------------------------------------------------------------
# Parameters: torch-layout init + one-time conversion to kernel-ready layout
# ----------------------------------------------------------------------------
def init_params(key, configs, vocab_c_size, vocab_w_size):
    e_dim = configs["char_embedding_dim"]
    filters = configs["char_conv_filters"]
    f_dim = sum(oc for _, oc in filters)
    p_dim = configs["projection_dim"]
    h_dim = configs["hidden_dim"]
    n_layers = configs["num_layers"]
    n_hw = configs["num_highways"]

    keys = iter(jax.random.split(key, 128))

    def nrm(shape, scale=0.1):
        return scale * jax.random.normal(next(keys), shape, dtype=jnp.float32)

    params = {}
    params["char_emb"] = jax.random.uniform(
        next(keys), (vocab_c_size, e_dim), jnp.float32, -0.25, 0.25)
    params["convs"] = [(nrm((oc, e_dim, k)), nrm((oc,))) for k, oc in filters]
    params["highway"] = []
    for _ in range(n_hw):
        w = nrm((2 * f_dim, f_dim))
        b = jnp.concatenate([jnp.zeros((f_dim,), jnp.float32),
                             jnp.ones((f_dim,), jnp.float32)])        # gate bias init = 1
        params["highway"].append((w, b))
    params["proj"] = (nrm((p_dim, f_dim)), nrm((p_dim,)))

    def lstm_p(d_in):
        return dict(
            w_ih=nrm((4 * h_dim, d_in)),
            w_hh=nrm((4 * h_dim, h_dim)),
            # combined bias = b_ih + b_hh (when porting real torch weights, sum the two biases)
            b=nrm((4 * h_dim,)),
            w_proj=nrm((p_dim, h_dim)),
            b_proj=nrm((p_dim,)),
        )

    params["fwd_lstm"] = [lstm_p(p_dim) for _ in range(n_layers)]
    params["bwd_lstm"] = [lstm_p(p_dim) for _ in range(n_layers)]
    params["classifier"] = (nrm((vocab_w_size, p_dim)), nrm((vocab_w_size,)))
    return params


def prepare_params(params, configs, token_len):
    """One-time conversion to kernel-ready layout (transposes, fusions, bf16 casts)."""
    filters = configs["char_conv_filters"]
    e = configs["char_embedding_dim"]
    f_dim = sum(oc for _, oc in filters)
    k_max = max(k for k, _ in filters)
    k_min = min(k for k, _ in filters)
    npos = token_len - k_min + 1

    prep = {"char_emb": params["char_emb"]}

    # Fused conv weight (k_max*E, F): rows ordered (tap j, chan e); taps >= k_f zero-padded.
    blocks, biases, mask_cols = [], [], []
    for (k, oc), (w, b) in zip(filters, params["convs"]):
        wk = jnp.transpose(w, (2, 1, 0)).reshape(k * e, oc)           # torch (oc,E,k) -> (k*E, oc)
        blocks.append(jnp.pad(wk, ((0, (k_max - k) * e), (0, 0))))
        biases.append(b)
        valid = jnp.arange(npos) <= (token_len - k)                   # torch 'valid' conv positions
        mask_cols.append(jnp.broadcast_to(
            jnp.where(valid, 0.0, -1e30).astype(jnp.float32)[:, None], (npos, oc)))
    prep["conv_w"] = jnp.concatenate(blocks, axis=1).astype(jnp.bfloat16)       # (k_max*E, F)
    prep["conv_b"] = jnp.concatenate(biases).reshape(1, f_dim)
    prep["conv_pos_mask"] = jnp.concatenate(mask_cols, axis=1).reshape(npos, 1, f_dim)

    # Highway: fuse hidden & gate into one (F, 2F) operand.
    prep["highway"] = [(jnp.transpose(w).astype(jnp.bfloat16), b.reshape(1, 2 * f_dim))
                       for (w, b) in params["highway"]]
    pw, pb = params["proj"]
    prep["proj_w"] = jnp.transpose(pw).astype(jnp.bfloat16)                      # (F, P)
    prep["proj_b"] = pb.reshape(1, -1)

    def stack(a, b):
        return jnp.stack([a, b], axis=0)

    lstm = []
    for fp, bp in zip(params["fwd_lstm"], params["bwd_lstm"]):
        lstm.append(dict(
            w_ih=stack(jnp.transpose(fp["w_ih"]), jnp.transpose(bp["w_ih"])).astype(jnp.bfloat16),
            w_hh=stack(jnp.transpose(fp["w_hh"]), jnp.transpose(bp["w_hh"])),     # f32 recurrent
            b=stack(fp["b"].reshape(1, -1), bp["b"].reshape(1, -1)),
            w_proj=stack(jnp.transpose(fp["w_proj"]), jnp.transpose(bp["w_proj"])).astype(jnp.bfloat16),
            b_proj=stack(fp["b_proj"].reshape(1, -1), bp["b_proj"].reshape(1, -1)),
        ))
    prep["lstm"] = lstm

    cw, cb = params["classifier"]
    prep["cls_w"] = jnp.transpose(cw).astype(jnp.bfloat16)                        # (P, V)
    prep["cls_b"] = cb.reshape(1, -1)
    return prep


# ----------------------------------------------------------------------------
# BiLM forward
# ----------------------------------------------------------------------------
def bilm_forward(prep, inputs, lengths, configs):
    bsz, seq_len, tok_len = inputs.shape
    e_dim = configs["char_embedding_dim"]
    p_dim = configs["projection_dim"]
    filters = configs["char_conv_filters"]
    k_max = max(k for k, _ in filters)
    k_min = min(k for k, _ in filters)
    npos = tok_len - k_min + 1
    t_pad = npos + k_max - 1

    # --- ConvTokenEmbedder (char gather + zero-pad + lane-dense reshape are plain-JAX glue) ---
    ce = jnp.take(prep["char_emb"], inputs.reshape(-1), axis=0)
    ce = ce.reshape(bsz * seq_len, tok_len, e_dim)
    ce = jnp.pad(ce, ((0, 0), (0, t_pad - tok_len), (0, 0)))
    ce = ce.reshape(bsz * seq_len, t_pad * e_dim)                     # (N, T_pad*E) lane-dense
    token = conv_token_embedder(ce, prep, configs)                    # (N, P)
    token_embeds = token.reshape(bsz, seq_len, p_dim)

    # F.dropout with dropout_prob=0.0 -> identity.
    # TODO(synk): stochastic dropout (p>0, training) not reproduced; module is configured with p=0.

    # --- ELMoLstmEncoder (time-major, flattened at the kernel boundary) ---
    lengths = lengths.astype(jnp.int32)
    pos = jnp.arange(seq_len, dtype=jnp.int32)
    rev_idx = jnp.where(pos[None, :] < lengths[:, None],
                        lengths[:, None] - 1 - pos[None, :],
                        pos[None, :])                                 # (B, S)
    rev_idx_tm = jnp.transpose(rev_idx)[:, :, None]                   # (S, B, 1)

    tok_tm = jnp.transpose(token_embeds, (1, 0, 2))                   # (S, B, P)
    rev_tok_tm = jnp.take_along_axis(tok_tm, rev_idx_tm, axis=0)
    mask2d = (pos[:, None] < lengths[None, :]).astype(jnp.float32).reshape(seq_len * bsz, 1)

    x_stacked = jnp.stack([tok_tm, rev_tok_tm], axis=0).reshape(2, seq_len * bsz, p_dim)
    for lp in prep["lstm"]:
        x_stacked = lstm_bidir(x_stacked, mask2d, lp, seq_len, bsz)   # (2, S*B, P)

    # Only the last layer feeds the classifier; un-reverse only the final backward stream.
    x3 = x_stacked.reshape(2, seq_len, bsz, p_dim)
    fwd_last = jnp.transpose(x3[0], (1, 0, 2))                                        # (B, S, P)
    bwd_last = jnp.transpose(jnp.take_along_axis(x3[1], rev_idx_tm, axis=0), (1, 0, 2))

    # --- classifier (fwd + bwd rows in one call) ---
    rows = jnp.concatenate([fwd_last.reshape(bsz * seq_len, p_dim),
                            bwd_last.reshape(bsz * seq_len, p_dim)], axis=0)
    logits = classifier(rows, prep["cls_w"], prep["cls_b"])
    v = prep["cls_w"].shape[1]
    fwd_logits = logits[: bsz * seq_len].reshape(bsz, seq_len, v)
    bwd_logits = logits[bsz * seq_len:].reshape(bsz, seq_len, v)
    return fwd_logits, bwd_logits


# ----------------------------------------------------------------------------
# main
# ----------------------------------------------------------------------------
if __name__ == "__main__":
    configs = dict(
        char_embedding_dim=16,
        char_conv_filters=[(1, 16), (2, 16), (3, 32)],
        num_highways=2,
        projection_dim=32,
        hidden_dim=32,
        num_layers=2,
        dropout_prob=0.0,
    )
    vocab_c_size = 32   # char vocab
    vocab_w_size = 64   # word vocab (num_classes)
    batch, seq_len, token_len = 2, 8, 8

    key = jax.random.PRNGKey(0)
    k_params, k_inputs = jax.random.split(key)
    params = init_params(k_params, configs, vocab_c_size, vocab_w_size)
    prep = prepare_params(params, configs, token_len)   # one-time kernel-ready layout

    inputs = jax.random.randint(k_inputs, (batch, seq_len, token_len), 0, vocab_c_size,
                                dtype=jnp.int32)
    lengths = jnp.array([8, 5], dtype=jnp.int32)

    fwd_fn = jax.jit(functools.partial(bilm_forward, configs=configs))
    fwd_logits, bwd_logits = fwd_fn(prep, inputs, lengths)
    jax.block_until_ready((fwd_logits, bwd_logits))

    assert fwd_logits.shape == (batch, seq_len, vocab_w_size)
    assert bwd_logits.shape == (batch, seq_len, vocab_w_size)
    assert bool(jnp.all(jnp.isfinite(fwd_logits))) and bool(jnp.all(jnp.isfinite(bwd_logits)))
    print("KERNEL_OK")
</pallas_src>

<mosaic_0001>
module attributes {stable_mosaic.version = 11 : i64} {
  func.func @_token_embedder_kernel(%arg0: i32, %arg1: memref<8x160xf32, #tpu.memory_space<vmem>>, %arg2: memref<48x64xbf16, #tpu.memory_space<vmem>>, %arg3: memref<1x64xf32, #tpu.memory_space<vmem>>, %arg4: memref<8x1x64xf32, #tpu.memory_space<vmem>>, %arg5: memref<64x128xbf16, #tpu.memory_space<vmem>>, %arg6: memref<1x128xf32, #tpu.memory_space<vmem>>, %arg7: memref<64x128xbf16, #tpu.memory_space<vmem>>, %arg8: memref<1x128xf32, #tpu.memory_space<vmem>>, %arg9: memref<64x32xbf16, #tpu.memory_space<vmem>>, %arg10: memref<1x32xf32, #tpu.memory_space<vmem>>, %arg11: memref<8x32xf32, #tpu.memory_space<vmem>>) attributes {dimension_semantics = [#tpu.dimension_semantics<parallel>], iteration_bounds = array<i64: 2>, scalar_prefetch = 0 : i64, scratch_operands = 0 : i64, tpu.core_type = #tpu.core_type<tc>, window_params = [{transform_indices = @transform_0, window_bounds = array<i64: 8, 160>}, {pipeline_mode = #tpu.pipeline_mode<synchronous>, transform_indices = @transform_1, window_bounds = array<i64: 48, 64>}, {pipeline_mode = #tpu.pipeline_mode<synchronous>, transform_indices = @transform_2, window_bounds = array<i64: 1, 64>}, {pipeline_mode = #tpu.pipeline_mode<synchronous>, transform_indices = @transform_3, window_bounds = array<i64: 8, 1, 64>}, {pipeline_mode = #tpu.pipeline_mode<synchronous>, transform_indices = @transform_4, window_bounds = array<i64: 64, 128>}, {pipeline_mode = #tpu.pipeline_mode<synchronous>, transform_indices = @transform_5, window_bounds = array<i64: 1, 128>}, {pipeline_mode = #tpu.pipeline_mode<synchronous>, transform_indices = @transform_6, window_bounds = array<i64: 64, 128>}, {pipeline_mode = #tpu.pipeline_mode<synchronous>, transform_indices = @transform_7, window_bounds = array<i64: 1, 128>}, {pipeline_mode = #tpu.pipeline_mode<synchronous>, transform_indices = @transform_8, window_bounds = array<i64: 64, 32>}, {pipeline_mode = #tpu.pipeline_mode<synchronous>, transform_indices = @transform_9, window_bounds = array<i64: 1, 32>}, {transform_indices = @transform_10, window_bounds = array<i64: 8, 32>}]} {
    %c0 = arith.constant 0 : index
    %c0_0 = arith.constant 0 : index
    %0 = vector.load %arg1[%c0, %c0_0] : memref<8x160xf32, #tpu.memory_space<vmem>>, vector<8x160xf32>
    %1 = arith.truncf %0 : vector<8x160xf32> to vector<8x160xbf16>
    %2 = vector.extract_strided_slice %1 {offsets = [0, 0], sizes = [8, 48], strides = [1, 1]} : vector<8x160xbf16> to vector<8x48xbf16>
    %3 = vector.extract_strided_slice %1 {offsets = [0, 16], sizes = [8, 48], strides = [1, 1]} : vector<8x160xbf16> to vector<8x48xbf16>
    %4 = vector.extract_strided_slice %1 {offsets = [0, 32], sizes = [8, 48], strides = [1, 1]} : vector<8x160xbf16> to vector<8x48xbf16>
    %5 = vector.extract_strided_slice %1 {offsets = [0, 48], sizes = [8, 48], strides = [1, 1]} : vector<8x160xbf16> to vector<8x48xbf16>
    %6 = vector.extract_strided_slice %1 {offsets = [0, 64], sizes = [8, 48], strides = [1, 1]} : vector<8x160xbf16> to vector<8x48xbf16>
    %7 = vector.extract_strided_slice %1 {offsets = [0, 80], sizes = [8, 48], strides = [1, 1]} : vector<8x160xbf16> to vector<8x48xbf16>
    %8 = vector.extract_strided_slice %1 {offsets = [0, 96], sizes = [8, 48], strides = [1, 1]} : vector<8x160xbf16> to vector<8x48xbf16>
    %9 = vector.extract_strided_slice %1 {offsets = [0, 112], sizes = [8, 48], strides = [1, 1]} : vector<8x160xbf16> to vector<8x48xbf16>
    %10 = tpu.concatenate %2, %3, %4, %5, %6, %7, %8, %9 in 0 : vector<8x48xbf16>, vector<8x48xbf16>, vector<8x48xbf16>, vector<8x48xbf16>, vector<8x48xbf16>, vector<8x48xbf16>, vector<8x48xbf16>, vector<8x48xbf16> -> vector<64x48xbf16>
    %c0_1 = arith.constant 0 : index
    %c0_2 = arith.constant 0 : index
    %11 = vector.load %arg2[%c0_1, %c0_2] : memref<48x64xbf16, #tpu.memory_space<vmem>>, vector<48x64xbf16>
    %cst = arith.constant dense<0.000000e+00> : vector<64x64xf32>
    %12 = tpu.matmul %10, %11, %cst {dimension_numbers = #tpu.dot_dimension_numbers<[1], [0], [0], [1], [0, 0, 1, 1], [], []>} : vector<64x48xbf16>, vector<48x64xbf16>, vector<64x64xf32> -> vector<64x64xf32>
    %13 = vector.shape_cast %12 : vector<64x64xf32> to vector<8x8x64xf32>
    %c0_3 = arith.constant 0 : index
    %c0_4 = arith.constant 0 : index
    %c0_5 = arith.constant 0 : index
    %14 = vector.load %arg4[%c0_3, %c0_4, %c0_5] : memref<8x1x64xf32, #tpu.memory_space<vmem>>, vector<8x1x64xf32>
    %15 = vector.broadcast %14 : vector<8x1x64xf32> to vector<8x8x64xf32>
    %16 = arith.addf %13, %15 : vector<8x8x64xf32>
    %cst_6 = arith.constant dense<0xFF800000> : vector<8x64xf32>
    %17 = vector.multi_reduction <maximumf>, %16, %cst_6 [0] : vector<8x8x64xf32> to vector<8x64xf32>
    %c0_7 = arith.constant 0 : index
    %c0_8 = arith.constant 0 : index
    %18 = vector.load %arg3[%c0_7, %c0_8] : memref<1x64xf32, #tpu.memory_space<vmem>>, vector<1x64xf32>
    %19 = vector.broadcast %18 : vector<1x64xf32> to vector<8x64xf32>
    %20 = arith.addf %17, %19 : vector<8x64xf32>
    %cst_9 = arith.constant 0.000000e+00 : f32
    %21 = vector.broadcast %cst_9 : f32 to vector<8x64xf32>
    %22 = arith.maximumf %20, %21 : vector<8x64xf32>
    %c0_10 = arith.constant 0 : index
    %c0_11 = arith.constant 0 : index
    %23 = vector.load %arg5[%c0_10, %c0_11] : memref<64x128xbf16, #tpu.memory_space<vmem>>, vector<64x128xbf16>
    %c0_12 = arith.constant 0 : index
    %c0_13 = arith.constant 0 : index
    %24 = vector.load %arg6[%c0_12, %c0_13] : memref<1x128xf32, #tpu.memory_space<vmem>>, vector<1x128xf32>
    %25 = arith.truncf %22 : vector<8x64xf32> to vector<8x64xbf16>
    %cst_14 = arith.constant dense<0.000000e+00> : vector<8x128xf32>
    %26 = tpu.matmul %25, %23, %cst_14 {dimension_numbers = #tpu.dot_dimension_numbers<[1], [0], [0], [1], [0, 0, 1, 1], [], []>} : vector<8x64xbf16>, vector<64x128xbf16>, vector<8x128xf32> -> vector<8x128xf32>
    %27 = vector.broadcast %24 : vector<1x128xf32> to vector<8x128xf32>
    %28 = arith.addf %26, %27 : vector<8x128xf32>
    %29 = vector.extract_strided_slice %28 {offsets = [0, 0], sizes = [8, 64], strides = [1, 1]} : vector<8x128xf32> to vector<8x64xf32>
    %cst_15 = arith.constant 0.000000e+00 : f32
    %30 = vector.broadcast %cst_15 : f32 to vector<8x64xf32>
    %31 = arith.maximumf %29, %30 : vector<8x64xf32>
    %32 = vector.extract_strided_slice %28 {offsets = [0, 64], sizes = [8, 64], strides = [1, 1]} : vector<8x128xf32> to vector<8x64xf32>
    %33 = arith.negf %32 : vector<8x64xf32>
    %34 = math.exp %33 : vector<8x64xf32>
    %cst_16 = arith.constant 1.000000e+00 : f32
    %35 = vector.broadcast %cst_16 : f32 to vector<8x64xf32>
    %36 = arith.addf %35, %34 : vector<8x64xf32>
    %37 = arith.divf %35, %36 : vector<8x64xf32>
    %38 = arith.mulf %37, %22 : vector<8x64xf32>
    %cst_17 = arith.constant 1.000000e+00 : f32
    %39 = vector.broadcast %cst_17 : f32 to vector<8x64xf32>
    %40 = arith.subf %39, %37 : vector<8x64xf32>
    %41 = arith.mulf %40, %31 : vector<8x64xf32>
    %42 = arith.addf %38, %41 : vector<8x64xf32>
    %c0_18 = arith.constant 0 : index
    %c0_19 = arith.constant 0 : index
    %43 = vector.load %arg7[%c0_18, %c0_19] : memref<64x128xbf16, #tpu.memory_space<vmem>>, vector<64x128xbf16>
    %c0_20 = arith.constant 0 : index
    %c0_21 = arith.constant 0 : index
    %44 = vector.load %arg8[%c0_20, %c0_21] : memref<1x128xf32, #tpu.memory_space<vmem>>, vector<1x128xf32>
    %45 = arith.truncf %42 : vector<8x64xf32> to vector<8x64xbf16>
    %cst_22 = arith.constant dense<0.000000e+00> : vector<8x128xf32>
    %46 = tpu.matmul %45, %43, %cst_22 {dimension_numbers = #tpu.dot_dimension_numbers<[1], [0], [0], [1], [0, 0, 1, 1], [], []>} : vector<8x64xbf16>, vector<64x128xbf16>, vector<8x128xf32> -> vector<8x128xf32>
    %47 = vector.broadcast %44 : vector<1x128xf32> to vector<8x128xf32>
    %48 = arith.addf %46, %47 : vector<8x128xf32>
    %49 = vector.extract_strided_slice %48 {offsets = [0, 0], sizes = [8, 64], strides = [1, 1]} : vector<8x128xf32> to vector<8x64xf32>
    %cst_23 = arith.constant 0.000000e+00 : f32
    %50 = vector.broadcast %cst_23 : f32 to vector<8x64xf32>
    %51 = arith.maximumf %49, %50 : vector<8x64xf32>
    %52 = vector.extract_strided_slice %48 {offsets = [0, 64], sizes = [8, 64], strides = [1, 1]} : vector<8x128xf32> to vector<8x64xf32>
    %53 = arith.negf %52 : vector<8x64xf32>
    %54 = math.exp %53 : vector<8x64xf32>
    %cst_24 = arith.constant 1.000000e+00 : f32
    %55 = vector.broadcast %cst_24 : f32 to vector<8x64xf32>
    %56 = arith.addf %55, %54 : vector<8x64xf32>
    %57 = arith.divf %55, %56 : vector<8x64xf32>
    %58 = arith.mulf %57, %42 : vector<8x64xf32>
    %cst_25 = arith.constant 1.000000e+00 : f32
    %59 = vector.broadcast %cst_25 : f32 to vector<8x64xf32>
    %60 = arith.subf %59, %57 : vector<8x64xf32>
    %61 = arith.mulf %60, %51 : vector<8x64xf32>
    %62 = arith.addf %58, %61 : vector<8x64xf32>
    %63 = arith.truncf %62 : vector<8x64xf32> to vector<8x64xbf16>
    %c0_26 = arith.constant 0 : index
    %c0_27 = arith.constant 0 : index
    %64 = vector.load %arg9[%c0_26, %c0_27] : memref<64x32xbf16, #tpu.memory_space<vmem>>, vector<64x32xbf16>
    %cst_28 = arith.constant dense<0.000000e+00> : vector<8x32xf32>
    %65 = tpu.matmul %63, %64, %cst_28 {dimension_numbers = #tpu.dot_dimension_numbers<[1], [0], [0], [1], [0, 0, 1, 1], [], []>} : vector<8x64xbf16>, vector<64x32xbf16>, vector<8x32xf32> -> vector<8x32xf32>
    %c0_29 = arith.constant 0 : index
    %c0_30 = arith.constant 0 : index
    %66 = vector.load %arg10[%c0_29, %c0_30] : memref<1x32xf32, #tpu.memory_space<vmem>>, vector<1x32xf32>
    %67 = vector.broadcast %66 : vector<1x32xf32> to vector<8x32xf32>
    %68 = arith.addf %65, %67 : vector<8x32xf32>
    %c0_31 = arith.constant 0 : index
    %c0_32 = arith.constant 0 : index
    %69 = vector.load %arg11[%c0_31, %c0_32] : memref<8x32xf32, #tpu.memory_space<vmem>>, vector<8x32xf32>
    tpu.vector_store %arg11[%c0_31, %c0_32], %68 {strides = array<i32>} : memref<8x32xf32, #tpu.memory_space<vmem>>, vector<8x32xf32>,
    return
  }
  func.func @transform_0(%arg0: i32) -> (i32, i32) {
    %c0_i32 = arith.constant 0 : i32
    %c0_i32_0 = arith.constant 0 : i32
    return %arg0, %c0_i32 : i32, i32
  }
  func.func @transform_1(%arg0: i32) -> (i32, i32) {
    %c0_i32 = arith.constant 0 : i32
    %c0_i32_0 = arith.constant 0 : i32
    %c0_i32_1 = arith.constant 0 : i32
    return %c0_i32, %c0_i32_0 : i32, i32
  }
  func.func @transform_2(%arg0: i32) -> (i32, i32) {
    %c0_i32 = arith.constant 0 : i32
    %c0_i32_0 = arith.constant 0 : i32
    %c0_i32_1 = arith.constant 0 : i32
    return %c0_i32, %c0_i32_0 : i32, i32
  }
  func.func @transform_3(%arg0: i32) -> (i32, i32, i32) {
    %c0_i32 = arith.constant 0 : i32
    %c0_i32_0 = arith.constant 0 : i32
    %c0_i32_1 = arith.constant 0 : i32
    %c0_i32_2 = arith.constant 0 : i32
    return %c0_i32, %c0_i32_0, %c0_i32_1 : i32, i32, i32
  }
  func.func @transform_4(%arg0: i32) -> (i32, i32) {
    %c0_i32 = arith.constant 0 : i32
    %c0_i32_0 = arith.constant 0 : i32
    %c0_i32_1 = arith.constant 0 : i32
    return %c0_i32, %c0_i32_0 : i32, i32
  }
  func.func @transform_5(%arg0: i32) -> (i32, i32) {
    %c0_i32 = arith.constant 0 : i32
    %c0_i32_0 = arith.constant 0 : i32
    %c0_i32_1 = arith.constant 0 : i32
    return %c0_i32, %c0_i32_0 : i32, i32
  }
  func.func @transform_6(%arg0: i32) -> (i32, i32) {
    %c0_i32 = arith.constant 0 : i32
    %c0_i32_0 = arith.constant 0 : i32
    %c0_i32_1 = arith.constant 0 : i32
    return %c0_i32, %c0_i32_0 : i32, i32
  }
  func.func @transform_7(%arg0: i32) -> (i32, i32) {
    %c0_i32 = arith.constant 0 : i32
    %c0_i32_0 = arith.constant 0 : i32
    %c0_i32_1 = arith.constant 0 : i32
    return %c0_i32, %c0_i32_0 : i32, i32
  }
  func.func @transform_8(%arg0: i32) -> (i32, i32) {
    %c0_i32 = arith.constant 0 : i32
    %c0_i32_0 = arith.constant 0 : i32
    %c0_i32_1 = arith.constant 0 : i32
    return %c0_i32, %c0_i32_0 : i32, i32
  }
  func.func @transform_9(%arg0: i32) -> (i32, i32) {
    %c0_i32 = arith.constant 0 : i32
    %c0_i32_0 = arith.constant 0 : i32
    %c0_i32_1 = arith.constant 0 : i32
    return %c0_i32, %c0_i32_0 : i32, i32
  }
  func.func @transform_10(%arg0: i32) -> (i32, i32) {
    %c0_i32 = arith.constant 0 : i32
    %c0_i32_0 = arith.constant 0 : i32
    return %arg0, %c0_i32 : i32, i32
  }
}

module attributes {stable_mosaic.version = 11 : i64} {
  func.func @_classifier_kernel(%arg0: i32, %arg1: i32, %arg2: memref<16x32xf32, #tpu.memory_space<vmem>>, %arg3: memref<32x64xbf16, #tpu.memory_space<vmem>>, %arg4: memref<1x64xf32, #tpu.memory_space<vmem>>, %arg5: memref<16x64xf32, #tpu.memory_space<vmem>>) attributes {dimension_semantics = [#tpu.dimension_semantics<parallel>, #tpu.dimension_semantics<parallel>], iteration_bounds = array<i64: 1, 2>, scalar_prefetch = 0 : i64, scratch_operands = 0 : i64, tpu.core_type = #tpu.core_type<tc>, window_params = [{transform_indices = @transform_0, window_bounds = array<i64: 16, 32>}, {transform_indices = @transform_1, window_bounds = array<i64: 32, 64>}, {transform_indices = @transform_2, window_bounds = array<i64: 1, 64>}, {transform_indices = @transform_3, window_bounds = array<i64: 16, 64>}]} {
    %c0 = arith.constant 0 : index
    %c0_0 = arith.constant 0 : index
    %0 = vector.load %arg2[%c0, %c0_0] : memref<16x32xf32, #tpu.memory_space<vmem>>, vector<16x32xf32>
    %1 = arith.truncf %0 : vector<16x32xf32> to vector<16x32xbf16>
    %c0_1 = arith.constant 0 : index
    %c0_2 = arith.constant 0 : index
    %2 = vector.load %arg3[%c0_1, %c0_2] : memref<32x64xbf16, #tpu.memory_space<vmem>>, vector<32x64xbf16>
    %cst = arith.constant dense<0.000000e+00> : vector<16x64xf32>
    %3 = tpu.matmul %1, %2, %cst {dimension_numbers = #tpu.dot_dimension_numbers<[1], [0], [0], [1], [0, 0, 1, 1], [], []>} : vector<16x32xbf16>, vector<32x64xbf16>, vector<16x64xf32> -> vector<16x64xf32>
    %c0_3 = arith.constant 0 : index
    %c0_4 = arith.constant 0 : index
    %4 = vector.load %arg4[%c0_3, %c0_4] : memref<1x64xf32, #tpu.memory_space<vmem>>, vector<1x64xf32>
    %5 = vector.broadcast %4 : vector<1x64xf32> to vector<16x64xf32>
    %6 = arith.addf %3, %5 : vector<16x64xf32>
    %c0_5 = arith.constant 0 : index
    %c0_6 = arith.constant 0 : index
    %7 = vector.load %arg5[%c0_5, %c0_6] : memref<16x64xf32, #tpu.memory_space<vmem>>, vector<16x64xf32>
    tpu.vector_store %arg5[%c0_5, %c0_6], %6 {strides = array<i32>} : memref<16x64xf32, #tpu.memory_space<vmem>>, vector<16x64xf32>,
    return
  }
  func.func @transform_0(%arg0: i32, %arg1: i32) -> (i32, i32) {
    %c0_i32 = arith.constant 0 : i32
    %c0_i32_0 = arith.constant 0 : i32
    return %arg1, %c0_i32 : i32, i32
  }
  func.func @transform_1(%arg0: i32, %arg1: i32) -> (i32, i32) {
    %c0_i32 = arith.constant 0 : i32
    %c0_i32_0 = arith.constant 0 : i32
    return %c0_i32, %arg0 : i32, i32
  }
  func.func @transform_2(%arg0: i32, %arg1: i32) -> (i32, i32) {
    %c0_i32 = arith.constant 0 : i32
    %c0_i32_0 = arith.constant 0 : i32
    return %c0_i32, %arg0 : i32, i32
  }
  func.func @transform_3(%arg0: i32, %arg1: i32) -> (i32, i32) {
    %c0_i32 = arith.constant 0 : i32
    return %arg1, %arg0 : i32, i32
  }
}

module attributes {stable_mosaic.version = 11 : i64} {
  func.func @_lstm_bidir_kernel(%arg0: i32, %arg1: memref<2x16x32xf32, #tpu.memory_space<vmem>>, %arg2: memref<16x1xf32, #tpu.memory_space<vmem>>, %arg3: memref<2x32x128xbf16, #tpu.memory_space<vmem>>, %arg4: memref<2x32x128xf32, #tpu.memory_space<vmem>>, %arg5: memref<2x1x128xf32, #tpu.memory_space<vmem>>, %arg6: memref<2x32x32xbf16, #tpu.memory_space<vmem>>, %arg7: memref<2x1x32xf32, #tpu.memory_space<vmem>>, %arg8: memref<2x16x32xf32, #tpu.memory_space<vmem>>, %arg9: memref<8x2x128xbf16, #tpu.memory_space<vmem>>, %arg10: memref<8x2x128xbf16, #tpu.memory_space<vmem>>, %arg11: memref<8x2x32xf32, #tpu.memory_space<vmem>>, %arg12: memref<8x2x32xf32, #tpu.memory_space<vmem>>) attributes {dimension_semantics = [#tpu.dimension_semantics<arbitrary>], iteration_bounds = array<i64: 1>, scalar_prefetch = 0 : i64, scratch_operands = 4 : i64, tpu.core_type = #tpu.core_type<tc>, window_params = [{pipeline_mode = #tpu.pipeline_mode<synchronous>, transform_indices = @transform_0, window_bounds = array<i64: 2, 16, 32>}, {pipeline_mode = #tpu.pipeline_mode<synchronous>, transform_indices = @transform_1, window_bounds = array<i64: 16, 1>}, {pipeline_mode = #tpu.pipeline_mode<synchronous>, transform_indices = @transform_2, window_bounds = array<i64: 2, 32, 128>}, {pipeline_mode = #tpu.pipeline_mode<synchronous>, transform_indices = @transform_3, window_bounds = array<i64: 2, 32, 128>}, {pipeline_mode = #tpu.pipeline_mode<synchronous>, transform_indices = @transform_4, window_bounds = array<i64: 2, 1, 128>}, {pipeline_mode = #tpu.pipeline_mode<synchronous>, transform_indices = @transform_5, window_bounds = array<i64: 2, 32, 32>}, {pipeline_mode = #tpu.pipeline_mode<synchronous>, transform_indices = @transform_6, window_bounds = array<i64: 2, 1, 32>}, {pipeline_mode = #tpu.pipeline_mode<synchronous>, transform_indices = @transform_7, window_bounds = array<i64: 2, 16, 32>}]} {
    %c0 = arith.constant 0 : index
    %c0_0 = arith.constant 0 : index
    %c0_1 = arith.constant 0 : index
    %0 = vector.load %arg1[%c0, %c0_0, %c0_1] : memref<2x16x32xf32, #tpu.memory_space<vmem>>, vector<1x16x32xf32>
    %1 = vector.shape_cast %0 : vector<1x16x32xf32> to vector<16x32xf32>
    %2 = arith.truncf %1 : vector<16x32xf32> to vector<16x32xbf16>
    %c1 = arith.constant 1 : index
    %c0_2 = arith.constant 0 : index
    %c0_3 = arith.constant 0 : index
    %3 = vector.load %arg1[%c1, %c0_2, %c0_3] : memref<2x16x32xf32, #tpu.memory_space<vmem>>, vector<1x16x32xf32>
    %4 = vector.shape_cast %3 : vector<1x16x32xf32> to vector<16x32xf32>
    %5 = arith.truncf %4 : vector<16x32xf32> to vector<16x32xbf16>
    %c0_4 = arith.constant 0 : index
    %c0_5 = arith.constant 0 : index
    %c0_6 = arith.constant 0 : index
    %6 = vector.load %arg3[%c0_4, %c0_5, %c0_6] : memref<2x32x128xbf16, #tpu.memory_space<vmem>>, vector<1x32x128xbf16>
    %7 = vector.shape_cast %6 : vector<1x32x128xbf16> to vector<32x128xbf16>
    %cst = arith.constant dense<0.000000e+00> : vector<16x128xf32>
    %8 = tpu.matmul %2, %7, %cst {dimension_numbers = #tpu.dot_dimension_numbers<[1], [0], [0], [1], [0, 0, 1, 1], [], []>} : vector<16x32xbf16>, vector<32x128xbf16>, vector<16x128xf32> -> vector<16x128xf32>
    %c0_7 = arith.constant 0 : index
    %c0_8 = arith.constant 0 : index
    %c0_9 = arith.constant 0 : index
    %9 = vector.load %arg5[%c0_7, %c0_8, %c0_9] : memref<2x1x128xf32, #tpu.memory_space<vmem>>, vector<1x1x128xf32>
    %10 = vector.shape_cast %9 : vector<1x1x128xf32> to vector<1x128xf32>
    %11 = vector.broadcast %10 : vector<1x128xf32> to vector<16x128xf32>
    %12 = arith.addf %8, %11 : vector<16x128xf32>
    %c1_10 = arith.constant 1 : index
    %c0_11 = arith.constant 0 : index
    %c0_12 = arith.constant 0 : index
    %13 = vector.load %arg3[%c1_10, %c0_11, %c0_12] : memref<2x32x128xbf16, #tpu.memory_space<vmem>>, vector<1x32x128xbf16>
    %14 = vector.shape_cast %13 : vector<1x32x128xbf16> to vector<32x128xbf16>
    %cst_13 = arith.constant dense<0.000000e+00> : vector<16x128xf32>
    %15 = tpu.matmul %5, %14, %cst_13 {dimension_numbers = #tpu.dot_dimension_numbers<[1], [0], [0], [1], [0, 0, 1, 1], [], []>} : vector<16x32xbf16>, vector<32x128xbf16>, vector<16x128xf32> -> vector<16x128xf32>
    %c1_14 = arith.constant 1 : index
    %c0_15 = arith.constant 0 : index
    %c0_16 = arith.constant 0 : index
    %16 = vector.load %arg5[%c1_14, %c0_15, %c0_16] : memref<2x1x128xf32, #tpu.memory_space<vmem>>, vector<1x1x128xf32>
    %17 = vector.shape_cast %16 : vector<1x1x128xf32> to vector<1x128xf32>
    %18 = vector.broadcast %17 : vector<1x128xf32> to vector<16x128xf32>
    %19 = arith.addf %15, %18 : vector<16x128xf32>
    %20 = vector.shape_cast %12 : vector<16x128xf32> to vector<8x2x128xf32>
    %21 = arith.truncf %20 : vector<8x2x128xf32> to vector<8x2x128xbf16>
    %c0_17 = arith.constant 0 : index
    %c0_18 = arith.constant 0 : index
    %c0_19 = arith.constant 0 : index
    %22 = vector.load %arg9[%c0_17, %c0_18, %c0_19] : memref<8x2x128xbf16, #tpu.memory_space<vmem>>, vector<8x2x128xbf16>
    tpu.vector_store %arg9[%c0_17, %c0_18, %c0_19], %21 {strides = array<i32>} : memref<8x2x128xbf16, #tpu.memory_space<vmem>>, vector<8x2x128xbf16>,
    %23 = vector.shape_cast %19 : vector<16x128xf32> to vector<8x2x128xf32>
    %24 = arith.truncf %23 : vector<8x2x128xf32> to vector<8x2x128xbf16>
    %c0_20 = arith.constant 0 : index
    %c0_21 = arith.constant 0 : index
    %c0_22 = arith.constant 0 : index
    %25 = vector.load %arg10[%c0_20, %c0_21, %c0_22] : memref<8x2x128xbf16, #tpu.memory_space<vmem>>, vector<8x2x128xbf16>
    tpu.vector_store %arg10[%c0_20, %c0_21, %c0_22], %24 {strides = array<i32>} : memref<8x2x128xbf16, #tpu.memory_space<vmem>>, vector<8x2x128xbf16>,
    %c0_23 = arith.constant 0 : index
    %c0_24 = arith.constant 0 : index
    %c0_25 = arith.constant 0 : index
    %26 = vector.load %arg4[%c0_23, %c0_24, %c0_25] : memref<2x32x128xf32, #tpu.memory_space<vmem>>, vector<1x32x128xf32>
    %27 = vector.shape_cast %26 : vector<1x32x128xf32> to vector<32x128xf32>
    %c1_26 = arith.constant 1 : index
    %c0_27 = arith.constant 0 : index
    %c0_28 = arith.constant 0 : index
    %28 = vector.load %arg4[%c1_26, %c0_27, %c0_28] : memref<2x32x128xf32, #tpu.memory_space<vmem>>, vector<1x32x128xf32>
    %29 = vector.shape_cast %28 : vector<1x32x128xf32> to vector<32x128xf32>
    %cst_29 = arith.constant 0.000000e+00 : f32
    %30 = vector.broadcast %cst_29 : f32 to vector<2x32xf32>
    %c0_i32 = arith.constant 0 : i32
    %31 = arith.index_cast %c0_i32 : i32 to index
    %c0_30 = arith.constant 0 : index
    %c0_31 = arith.constant 0 : index
    %32 = vector.load %arg9[%31, %c0_30, %c0_31] : memref<8x2x128xbf16, #tpu.memory_space<vmem>>, vector<1x2x128xbf16>
    %33 = vector.shape_cast %32 : vector<1x2x128xbf16> to vector<2x128xbf16>
    %34 = arith.extf %33 : vector<2x128xbf16> to vector<2x128xf32>
    %cst_32 = arith.constant dense<0.000000e+00> : vector<2x128xf32>
    %35 = tpu.matmul %30, %27, %cst_32 {dimension_numbers = #tpu.dot_dimension_numbers<[1], [0], [0], [1], [0, 0, 1, 1], [], []>} : vector<2x32xf32>, vector<32x128xf32>, vector<2x128xf32> -> vector<2x128xf32>
    %36 = arith.addf %34, %35 : vector<2x128xf32>
    %37 = arith.index_cast %c0_i32 : i32 to index
    %c0_33 = arith.constant 0 : index
    %c0_34 = arith.constant 0 : index
    %38 = vector.load %arg10[%37, %c0_33, %c0_34] : memref<8x2x128xbf16, #tpu.memory_space<vmem>>, vector<1x2x128xbf16>
    %39 = vector.shape_cast %38 : vector<1x2x128xbf16> to vector<2x128xbf16>
    %40 = arith.extf %39 : vector<2x128xbf16> to vector<2x128xf32>
    %cst_35 = arith.constant dense<0.000000e+00> : vector<2x128xf32>
    %41 = tpu.matmul %30, %29, %cst_35 {dimension_numbers = #tpu.dot_dimension_numbers<[1], [0], [0], [1], [0, 0, 1, 1], [], []>} : vector<2x32xf32>, vector<32x128xf32>, vector<2x128xf32> -> vector<2x128xf32>
    %42 = arith.addf %40, %41 : vector<2x128xf32>
    %43 = arith.negf %36 : vector<2x128xf32>
    %44 = math.exp %43 : vector<2x128xf32>
    %cst_36 = arith.constant 1.000000e+00 : f32
    %45 = vector.broadcast %cst_36 : f32 to vector<2x128xf32>
    %46 = arith.addf %45, %44 : vector<2x128xf32>
    %47 = arith.divf %45, %46 : vector<2x128xf32>
    %48 = math.tanh %36 : vector<2x128xf32>
    %49 = arith.negf %42 : vector<2x128xf32>
    %50 = math.exp %49 : vector<2x128xf32>
    %cst_37 = arith.constant 1.000000e+00 : f32
    %51 = vector.broadcast %cst_37 : f32 to vector<2x128xf32>
    %52 = arith.addf %51, %50 : vector<2x128xf32>
    %53 = arith.divf %51, %52 : vector<2x128xf32>
    %54 = math.tanh %42 : vector<2x128xf32>
    %55 = vector.extract_strided_slice %47 {offsets = [0, 32], sizes = [2, 32], strides = [1, 1]} : vector<2x128xf32> to vector<2x32xf32>
    %56 = arith.mulf %55, %30 : vector<2x32xf32>
    %57 = vector.extract_strided_slice %47 {offsets = [0, 0], sizes = [2, 32], strides = [1, 1]} : vector<2x128xf32> to vector<2x32xf32>
    %58 = vector.extract_strided_slice %48 {offsets = [0, 64], sizes = [2, 32], strides = [1, 1]} : vector<2x128xf32> to vector<2x32xf32>
    %59 = arith.mulf %57, %58 : vector<2x32xf32>
    %60 = arith.addf %56, %59 : vector<2x32xf32>
    %61 = vector.extract_strided_slice %47 {offsets = [0, 96], sizes = [2, 32], strides = [1, 1]} : vector<2x128xf32> to vector<2x32xf32>
    %62 = math.tanh %60 : vector<2x32xf32>
    %63 = arith.mulf %61, %62 : vector<2x32xf32>
    %64 = vector.extract_strided_slice %53 {offsets = [0, 32], sizes = [2, 32], strides = [1, 1]} : vector<2x128xf32> to vector<2x32xf32>
    %65 = arith.mulf %64, %30 : vector<2x32xf32>
    %66 = vector.extract_strided_slice %53 {offsets = [0, 0], sizes = [2, 32], strides = [1, 1]} : vector<2x128xf32> to vector<2x32xf32>
    %67 = vector.extract_strided_slice %54 {offsets = [0, 64], sizes = [2, 32], strides = [1, 1]} : vector<2x128xf32> to vector<2x32xf32>
    %68 = arith.mulf %66, %67 : vector<2x32xf32>
    %69 = arith.addf %65, %68 : vector<2x32xf32>
    %70 = vector.extract_strided_slice %53 {offsets = [0, 96], sizes = [2, 32], strides = [1, 1]} : vector<2x128xf32> to vector<2x32xf32>
    %71 = math.tanh %69 : vector<2x32xf32>
    %72 = arith.mulf %70, %71 : vector<2x32xf32>
    %73 = arith.index_cast %c0_i32 : i32 to index
    %c0_38 = arith.constant 0 : index
    %c0_39 = arith.constant 0 : index
    %74 = vector.load %arg11[%73, %c0_38, %c0_39] : memref<8x2x32xf32, #tpu.memory_space<vmem>>, vector<1x2x32xf32>
    %75 = vector.shape_cast %74 : vector<1x2x32xf32> to vector<2x32xf32>
    %76 = vector.shape_cast %63 : vector<2x32xf32> to vector<1x2x32xf32>
    tpu.vector_store %arg11[%73, %c0_38, %c0_39], %76 {strides = array<i32>} : memref<8x2x32xf32, #tpu.memory_space<vmem>>, vector<1x2x32xf32>,
    %77 = arith.index_cast %c0_i32 : i32 to index
    %c0_40 = arith.constant 0 : index
    %c0_41 = arith.constant 0 : index
    %78 = vector.load %arg12[%77, %c0_40, %c0_41] : memref<8x2x32xf32, #tpu.memory_space<vmem>>, vector<1x2x32xf32>
    %79 = vector.shape_cast %78 : vector<1x2x32xf32> to vector<2x32xf32>
    %80 = vector.shape_cast %72 : vector<2x32xf32> to vector<1x2x32xf32>
    tpu.vector_store %arg12[%77, %c0_40, %c0_41], %80 {strides = array<i32>} : memref<8x2x32xf32, #tpu.memory_space<vmem>>, vector<1x2x32xf32>,
    %c1_i32 = arith.constant 1 : i32
    %81 = arith.index_cast %c1_i32 : i32 to index
    %c0_42 = arith.constant 0 : index
    %c0_43 = arith.constant 0 : index
    %82 = vector.load %arg9[%81, %c0_42, %c0_43] : memref<8x2x128xbf16, #tpu.memory_space<vmem>>, vector<1x2x128xbf16>
    %83 = vector.shape_cast %82 : vector<1x2x128xbf16> to vector<2x128xbf16>
    %84 = arith.extf %83 : vector<2x128xbf16> to vector<2x128xf32>
    %cst_44 = arith.constant dense<0.000000e+00> : vector<2x128xf32>
    %85 = tpu.matmul %63, %27, %cst_44 {dimension_numbers = #tpu.dot_dimension_numbers<[1], [0], [0], [1], [0, 0, 1, 1], [], []>} : vector<2x32xf32>, vector<32x128xf32>, vector<2x128xf32> -> vector<2x128xf32>
    %86 = arith.addf %84, %85 : vector<2x128xf32>
    %87 = arith.index_cast %c1_i32 : i32 to index
    %c0_45 = arith.constant 0 : index
    %c0_46 = arith.constant 0 : index
    %88 = vector.load %arg10[%87, %c0_45, %c0_46] : memref<8x2x128xbf16, #tpu.memory_space<vmem>>, vector<1x2x128xbf16>
    %89 = vector.shape_cast %88 : vector<1x2x128xbf16> to vector<2x128xbf16>
    %90 = arith.extf %89 : vector<2x128xbf16> to vector<2x128xf32>
    %cst_47 = arith.constant dense<0.000000e+00> : vector<2x128xf32>
    %91 = tpu.matmul %72, %29, %cst_47 {dimension_numbers = #tpu.dot_dimension_numbers<[1], [0], [0], [1], [0, 0, 1, 1], [], []>} : vector<2x32xf32>, vector<32x128xf32>, vector<2x128xf32> -> vector<2x128xf32>
    %92 = arith.addf %90, %91 : vector<2x128xf32>
    %93 = arith.negf %86 : vector<2x128xf32>
    %94 = math.exp %93 : vector<2x128xf32>
    %cst_48 = arith.constant 1.000000e+00 : f32
    %95 = vector.broadcast %cst_48 : f32 to vector<2x128xf32>
    %96 = arith.addf %95, %94 : vector<2x128xf32>
    %97 = arith.divf %95, %96 : vector<2x128xf32>
    %98 = math.tanh %86 : vector<2x128xf32>
    %99 = arith.negf %92 : vector<2x128xf32>
    %100 = math.exp %99 : vector<2x128xf32>
    %cst_49 = arith.constant 1.000000e+00 : f32
    %101 = vector.broadcast %cst_49 : f32 to vector<2x128xf32>
    %102 = arith.addf %101, %100 : vector<2x128xf32>
    %103 = arith.divf %101, %102 : vector<2x128xf32>
    %104 = math.tanh %92 : vector<2x128xf32>
    %105 = vector.extract_strided_slice %97 {offsets = [0, 32], sizes = [2, 32], strides = [1, 1]} : vector<2x128xf32> to vector<2x32xf32>
    %106 = arith.mulf %105, %60 : vector<2x32xf32>
    %107 = vector.extract_strided_slice %97 {offsets = [0, 0], sizes = [2, 32], strides = [1, 1]} : vector<2x128xf32> to vector<2x32xf32>
    %108 = vector.extract_strided_slice %98 {offsets = [0, 64], sizes = [2, 32], strides = [1, 1]} : vector<2x128xf32> to vector<2x32xf32>
    %109 = arith.mulf %107, %108 : vector<2x32xf32>
    %110 = arith.addf %106, %109 : vector<2x32xf32>
    %111 = vector.extract_strided_slice %97 {offsets = [0, 96], sizes = [2, 32], strides = [1, 1]} : vector<2x128xf32> to vector<2x32xf32>
    %112 = math.tanh %110 : vector<2x32xf32>
    %113 = arith.mulf %111, %112 : vector<2x32xf32>
    %114 = vector.extract_strided_slice %103 {offsets = [0, 32], sizes = [2, 32], strides = [1, 1]} : vector<2x128xf32> to vector<2x32xf32>
    %115 = arith.mulf %114, %69 : vector<2x32xf32>
    %116 = vector.extract_strided_slice %103 {offsets = [0, 0], sizes = [2, 32], strides = [1, 1]} : vector<2x128xf32> to vector<2x32xf32>
    %117 = vector.extract_strided_slice %104 {offsets = [0, 64], sizes = [2, 32], strides = [1, 1]} : vector<2x128xf32> to vector<2x32xf32>
    %118 = arith.mulf %116, %117 : vector<2x32xf32>
    %119 = arith.addf %115, %118 : vector<2x32xf32>
    %120 = vector.extract_strided_slice %103 {offsets = [0, 96], sizes = [2, 32], strides = [1, 1]} : vector<2x128xf32> to vector<2x32xf32>
    %121 = math.tanh %119 : vector<2x32xf32>
    %122 = arith.mulf %120, %121 : vector<2x32xf32>
    %123 = arith.index_cast %c1_i32 : i32 to index
    %c0_50 = arith.constant 0 : index
    %c0_51 = arith.constant 0 : index
    %124 = vector.load %arg11[%123, %c0_50, %c0_51] : memref<8x2x32xf32, #tpu.memory_space<vmem>>, vector<1x2x32xf32>
    %125 = vector.shape_cast %124 : vector<1x2x32xf32> to vector<2x32xf32>
    %126 = vector.shape_cast %113 : vector<2x32xf32> to vector<1x2x32xf32>
    tpu.vector_store %arg11[%123, %c0_50, %c0_51], %126 {strides = array<i32>} : memref<8x2x32xf32, #tpu.memory_space<vmem>>, vector<1x2x32xf32>,
    %127 = arith.index_cast %c1_i32 : i32 to index
    %c0_52 = arith.constant 0 : index
    %c0_53 = arith.constant 0 : index
    %128 = vector.load %arg12[%127, %c0_52, %c0_53] : memref<8x2x32xf32, #tpu.memory_space<vmem>>, vector<1x2x32xf32>
    %129 = vector.shape_cast %128 : vector<1x2x32xf32> to vector<2x32xf32>
    %130 = vector.shape_cast %122 : vector<2x32xf32> to vector<1x2x32xf32>
    tpu.vector_store %arg12[%127, %c0_52, %c0_53], %130 {strides = array<i32>} : memref<8x2x32xf32, #tpu.memory_space<vmem>>, vector<1x2x32xf32>,
    %c2_i32 = arith.constant 2 : i32
    %131 = arith.index_cast %c2_i32 : i32 to index
    %c0_54 = arith.constant 0 : index
    %c0_55 = arith.constant 0 : index
    %132 = vector.load %arg9[%131, %c0_54, %c0_55] : memref<8x2x128xbf16, #tpu.memory_space<vmem>>, vector<1x2x128xbf16>
    %133 = vector.shape_cast %132 : vector<1x2x128xbf16> to vector<2x128xbf16>
    %134 = arith.extf %133 : vector<2x128xbf16> to vector<2x128xf32>
    %cst_56 = arith.constant dense<0.000000e+00> : vector<2x128xf32>
    %135 = tpu.matmul %113, %27, %cst_56 {dimension_numbers = #tpu.dot_dimension_numbers<[1], [0], [0], [1], [0, 0, 1, 1], [], []>} : vector<2x32xf32>, vector<32x128xf32>, vector<2x128xf32> -> vector<2x128xf32>
    %136 = arith.addf %134, %135 : vector<2x128xf32>
    %137 = arith.index_cast %c2_i32 : i32 to index
    %c0_57 = arith.constant 0 : index
    %c0_58 = arith.constant 0 : index
    %138 = vector.load %arg10[%137, %c0_57, %c0_58] : memref<8x2x128xbf16, #tpu.memory_space<vmem>>, vector<1x2x128xbf16>
    %139 = vector.shape_cast %138 : vector<1x2x128xbf16> to vector<2x128xbf16>
    %140 = arith.extf %139 : vector<2x128xbf16> to vector<2x128xf32>
    %cst_59 = arith.constant dense<0.000000e+00> : vector<2x128xf32>
    %141 = tpu.matmul %122, %29, %cst_59 {dimension_numbers = #tpu.dot_dimension_numbers<[1], [0], [0], [1], [0, 0, 1, 1], [], []>} : vector<2x32xf32>, vector<32x128xf32>, vector<2x128xf32> -> vector<2x128xf32>
    %142 = arith.addf %140, %141 : vector<2x128xf32>
    %143 = arith.negf %136 : vector<2x128xf32>
    %144 = math.exp %143 : vector<2x128xf32>
    %cst_60 = arith.constant 1.000000e+00 : f32
    %145 = vector.broadcast %cst_60 : f32 to vector<2x128xf32>
    %146 = arith.addf %145, %144 : vector<2x128xf32>
    %147 = arith.divf %145, %146 : vector<2x128xf32>
    %148 = math.tanh %136 : vector<2x128xf32>
    %149 = arith.negf %142 : vector<2x128xf32>
    %150 = math.exp %149 : vector<2x128xf32>
    %cst_61 = arith.constant 1.000000e+00 : f32
    %151 = vector.broadcast %cst_61 : f32 to vector<2x128xf32>
    %152 = arith.addf %151, %150 : vector<2x128xf32>
    %153 = arith.divf %151, %152 : vector<2x128xf32>
    %154 = math.tanh %142 : vector<2x128xf32>
    %155 = vector.extract_strided_slice %147 {offsets = [0, 32], sizes = [2, 32], strides = [1, 1]} : vector<2x128xf32> to vector<2x32xf32>
    %156 = arith.mulf %155, %110 : vector<2x32xf32>
    %157 = vector.extract_strided_slice %147 {offsets = [0, 0], sizes = [2, 32], strides = [1, 1]} : vector<2x128xf32> to vector<2x32xf32>
    %158 = vector.extract_strided_slice %148 {offsets = [0, 64], sizes = [2, 32], strides = [1, 1]} : vector<2x128xf32> to vector<2x32xf32>
    %159 = arith.mulf %157, %158 : vector<2x32xf32>
    %160 = arith.addf %156, %159 : vector<2x32xf32>
    %161 = vector.extract_strided_slice %147 {offsets = [0, 96], sizes = [2, 32], strides = [1, 1]} : vector<2x128xf32> to vector<2x32xf32>
    %162 = math.tanh %160 : vector<2x32xf32>
    %163 = arith.mulf %161, %162 : vector<2x32xf32>
    %164 = vector.extract_strided_slice %153 {offsets = [0, 32], sizes = [2, 32], strides = [1, 1]} : vector<2x128xf32> to vector<2x32xf32>
    %165 = arith.mulf %164, %119 : vector<2x32xf32>
    %166 = vector.extract_strided_slice %153 {offsets = [0, 0], sizes = [2, 32], strides = [1, 1]} : vector<2x128xf32> to vector<2x32xf32>
    %167 = vector.extract_strided_slice %154 {offsets = [0, 64], sizes = [2, 32], strides = [1, 1]} : vector<2x128xf32> to vector<2x32xf32>
    %168 = arith.mulf %166, %167 : vector<2x32xf32>
    %169 = arith.addf %165, %168 : vector<2x32xf32>
    %170 = vector.extract_strided_slice %153 {offsets = [0, 96], sizes = [2, 32], strides = [1, 1]} : vector<2x128xf32> to vector<2x32xf32>
    %171 = math.tanh %169 : vector<2x32xf32>
    %172 = arith.mulf %170, %171 : vector<2x32xf32>
    %173 = arith.index_cast %c2_i32 : i32 to index
    %c0_62 = arith.constant 0 : index
    %c0_63 = arith.constant 0 : index
    %174 = vector.load %arg11[%173, %c0_62, %c0_63] : memref<8x2x32xf32, #tpu.memory_space<vmem>>, vector<1x2x32xf32>
    %175 = vector.shape_cast %174 : vector<1x2x32xf32> to vector<2x32xf32>
    %176 = vector.shape_cast %163 : vector<2x32xf32> to vector<1x2x32xf32>
    tpu.vector_store %arg11[%173, %c0_62, %c0_63], %176 {strides = array<i32>} : memref<8x2x32xf32, #tpu.memory_space<vmem>>, vector<1x2x32xf32>,
    %177 = arith.index_cast %c2_i32 : i32 to index
    %c0_64 = arith.constant 0 : index
    %c0_65 = arith.constant 0 : index
    %178 = vector.load %arg12[%177, %c0_64, %c0_65] : memref<8x2x32xf32, #tpu.memory_space<vmem>>, vector<1x2x32xf32>
    %179 = vector.shape_cast %178 : vector<1x2x32xf32> to vector<2x32xf32>
    %180 = vector.shape_cast %172 : vector<2x32xf32> to vector<1x2x32xf32>
    tpu.vector_store %arg12[%177, %c0_64, %c0_65], %180 {strides = array<i32>} : memref<8x2x32xf32, #tpu.memory_space<vmem>>, vector<1x2x32xf32>,
    %c3_i32 = arith.constant 3 : i32
    %181 = arith.index_cast %c3_i32 : i32 to index
    %c0_66 = arith.constant 0 : index
    %c0_67 = arith.constant 0 : index
    %182 = vector.load %arg9[%181, %c0_66, %c0_67] : memref<8x2x128xbf16, #tpu.memory_space<vmem>>, vector<1x2x128xbf16>
    %183 = vector.shape_cast %182 : vector<1x2x128xbf16> to vector<2x128xbf16>
    %184 = arith.extf %183 : vector<2x128xbf16> to vector<2x128xf32>
    %cst_68 = arith.constant dense<0.000000e+00> : vector<2x128xf32>
    %185 = tpu.matmul %163, %27, %cst_68 {dimension_numbers = #tpu.dot_dimension_numbers<[1], [0], [0], [1], [0, 0, 1, 1], [], []>} : vector<2x32xf32>, vector<32x128xf32>, vector<2x128xf32> -> vector<2x128xf32>
    %186 = arith.addf %184, %185 : vector<2x128xf32>
    %187 = arith.index_cast %c3_i32 : i32 to index
    %c0_69 = arith.constant 0 : index
    %c0_70 = arith.constant 0 : index
    %188 = vector.load %arg10[%187, %c0_69, %c0_70] : memref<8x2x128xbf16, #tpu.memory_space<vmem>>, vector<1x2x128xbf16>
    %189 = vector.shape_cast %188 : vector<1x2x128xbf16> to vector<2x128xbf16>
    %190 = arith.extf %189 : vector<2x128xbf16> to vector<2x128xf32>
    %cst_71 = arith.constant dense<0.000000e+00> : vector<2x128xf32>
    %191 = tpu.matmul %172, %29, %cst_71 {dimension_numbers = #tpu.dot_dimension_numbers<[1], [0], [0], [1], [0, 0, 1, 1], [], []>} : vector<2x32xf32>, vector<32x128xf32>, vector<2x128xf32> -> vector<2x128xf32>
    %192 = arith.addf %190, %191 : vector<2x128xf32>
    %193 = arith.negf %186 : vector<2x128xf32>
    %194 = math.exp %193 : vector<2x128xf32>
    %cst_72 = arith.constant 1.000000e+00 : f32
    %195 = vector.broadcast %cst_72 : f32 to vector<2x128xf32>
    %196 = arith.addf %195, %194 : vector<2x128xf32>
    %197 = arith.divf %195, %196 : vector<2x128xf32>
    %198 = math.tanh %186 : vector<2x128xf32>
    %199 = arith.negf %192 : vector<2x128xf32>
    %200 = math.exp %199 : vector<2x128xf32>
    %cst_73 = arith.constant 1.000000e+00 : f32
    %201 = vector.broadcast %cst_73 : f32 to vector<2x128xf32>
    %202 = arith.addf %201, %200 : vector<2x128xf32>
    %203 = arith.divf %201, %202 : vector<2x128xf32>
    %204 = math.tanh %192 : vector<2x128xf32>
    %205 = vector.extract_strided_slice %197 {offsets = [0, 32], sizes = [2, 32], strides = [1, 1]} : vector<2x128xf32> to vector<2x32xf32>
    %206 = arith.mulf %205, %160 : vector<2x32xf32>
    %207 = vector.extract_strided_slice %197 {offsets = [0, 0], sizes = [2, 32], strides = [1, 1]} : vector<2x128xf32> to vector<2x32xf32>
    %208 = vector.extract_strided_slice %198 {offsets = [0, 64], sizes = [2, 32], strides = [1, 1]} : vector<2x128xf32> to vector<2x32xf32>
    %209 = arith.mulf %207, %208 : vector<2x32xf32>
    %210 = arith.addf %206, %209 : vector<2x32xf32>
    %211 = vector.extract_strided_slice %197 {offsets = [0, 96], sizes = [2, 32], strides = [1, 1]} : vector<2x128xf32> to vector<2x32xf32>
    %212 = math.tanh %210 : vector<2x32xf32>
    %213 = arith.mulf %211, %212 : vector<2x32xf32>
    %214 = vector.extract_strided_slice %203 {offsets = [0, 32], sizes = [2, 32], strides = [1, 1]} : vector<2x128xf32> to vector<2x32xf32>
    %215 = arith.mulf %214, %169 : vector<2x32xf32>
    %216 = vector.extract_strided_slice %203 {offsets = [0, 0], sizes = [2, 32], strides = [1, 1]} : vector<2x128xf32> to vector<2x32xf32>
    %217 = vector.extract_strided_slice %204 {offsets = [0, 64], sizes = [2, 32], strides = [1, 1]} : vector<2x128xf32> to vector<2x32xf32>
    %218 = arith.mulf %216, %217 : vector<2x32xf32>
    %219 = arith.addf %215, %218 : vector<2x32xf32>
    %220 = vector.extract_strided_slice %203 {offsets = [0, 96], sizes = [2, 32], strides = [1, 1]} : vector<2x128xf32> to vector<2x32xf32>
    %221 = math.tanh %219 : vector<2x32xf32>
    %222 = arith.mulf %220, %221 : vector<2x32xf32>
    %223 = arith.index_cast %c3_i32 : i32 to index
    %c0_74 = arith.constant 0 : index
    %c0_75 = arith.constant 0 : index
    %224 = vector.load %arg11[%223, %c0_74, %c0_75] : memref<8x2x32xf32, #tpu.memory_space<vmem>>, vector<1x2x32xf32>
    %225 = vector.shape_cast %224 : vector<1x2x32xf32> to vector<2x32xf32>
    %226 = vector.shape_cast %213 : vector<2x32xf32> to vector<1x2x32xf32>
    tpu.vector_store %arg11[%223, %c0_74, %c0_75], %226 {strides = array<i32>} : memref<8x2x32xf32, #tpu.memory_space<vmem>>, vector<1x2x32xf32>,
    %227 = arith.index_cast %c3_i32 : i32 to index
    %c0_76 = arith.constant 0 : index
    %c0_77 = arith.constant 0 : index
    %228 = vector.load %arg12[%227, %c0_76, %c0_77] : memref<8x2x32xf32, #tpu.memory_space<vmem>>, vector<1x2x32xf32>
    %229 = vector.shape_cast %228 : vector<1x2x32xf32> to vector<2x32xf32>
    %230 = vector.shape_cast %222 : vector<2x32xf32> to vector<1x2x32xf32>
    tpu.vector_store %arg12[%227, %c0_76, %c0_77], %230 {strides = array<i32>} : memref<8x2x32xf32, #tpu.memory_space<vmem>>, vector<1x2x32xf32>,
    %c4_i32 = arith.constant 4 : i32
    %231 = arith.index_cast %c4_i32 : i32 to index
    %c0_78 = arith.constant 0 : index
    %c0_79 = arith.constant 0 : index
    %232 = vector.load %arg9[%231, %c0_78, %c0_79] : memref<8x2x128xbf16, #tpu.memory_space<vmem>>, vector<1x2x128xbf16>
    %233 = vector.shape_cast %232 : vector<1x2x128xbf16> to vector<2x128xbf16>
    %234 = arith.extf %233 : vector<2x128xbf16> to vector<2x128xf32>
    %cst_80 = arith.constant dense<0.000000e+00> : vector<2x128xf32>
    %235 = tpu.matmul %213, %27, %cst_80 {dimension_numbers = #tpu.dot_dimension_numbers<[1], [0], [0], [1], [0, 0, 1, 1], [], []>} : vector<2x32xf32>, vector<32x128xf32>, vector<2x128xf32> -> vector<2x128xf32>
    %236 = arith.addf %234, %235 : vector<2x128xf32>
    %237 = arith.index_cast %c4_i32 : i32 to index
    %c0_81 = arith.constant 0 : index
    %c0_82 = arith.constant 0 : index
    %238 = vector.load %arg10[%237, %c0_81, %c0_82] : memref<8x2x128xbf16, #tpu.memory_space<vmem>>, vector<1x2x128xbf16>
    %239 = vector.shape_cast %238 : vector<1x2x128xbf16> to vector<2x128xbf16>
    %240 = arith.extf %239 : vector<2x128xbf16> to vector<2x128xf32>
    %cst_83 = arith.constant dense<0.000000e+00> : vector<2x128xf32>
    %241 = tpu.matmul %222, %29, %cst_83 {dimension_numbers = #tpu.dot_dimension_numbers<[1], [0], [0], [1], [0, 0, 1, 1], [], []>} : vector<2x32xf32>, vector<32x128xf32>, vector<2x128xf32> -> vector<2x128xf32>
    %242 = arith.addf %240, %241 : vector<2x128xf32>
    %243 = arith.negf %236 : vector<2x128xf32>
    %244 = math.exp %243 : vector<2x128xf32>
    %cst_84 = arith.constant 1.000000e+00 : f32
    %245 = vector.broadcast %cst_84 : f32 to vector<2x128xf32>
    %246 = arith.addf %245, %244 : vector<2x128xf32>
    %247 = arith.divf %245, %246 : vector<2x128xf32>
    %248 = math.tanh %236 : vector<2x128xf32>
    %249 = arith.negf %242 : vector<2x128xf32>
    %250 = math.exp %249 : vector<2x128xf32>
    %cst_85 = arith.constant 1.000000e+00 : f32
    %251 = vector.broadcast %cst_85 : f32 to vector<2x128xf32>
    %252 = arith.addf %251, %250 : vector<2x128xf32>
    %253 = arith.divf %251, %252 : vector<2x128xf32>
    %254 = math.tanh %242 : vector<2x128xf32>
    %255 = vector.extract_strided_slice %247 {offsets = [0, 32], sizes = [2, 32], strides = [1, 1]} : vector<2x128xf32> to vector<2x32xf32>
    %256 = arith.mulf %255, %210 : vector<2x32xf32>
    %257 = vector.extract_strided_slice %247 {offsets = [0, 0], sizes = [2, 32], strides = [1, 1]} : vector<2x128xf32> to vector<2x32xf32>
    %258 = vector.extract_strided_slice %248 {offsets = [0, 64], sizes = [2, 32], strides = [1, 1]} : vector<2x128xf32> to vector<2x32xf32>
    %259 = arith.mulf %257, %258 : vector<2x32xf32>
    %260 = arith.addf %256, %259 : vector<2x32xf32>
    %261 = vector.extract_strided_slice %247 {offsets = [0, 96], sizes = [2, 32], strides = [1, 1]} : vector<2x128xf32> to vector<2x32xf32>
    %262 = math.tanh %260 : vector<2x32xf32>
    %263 = arith.mulf %261, %262 : vector<2x32xf32>
    %264 = vector.extract_strided_slice %253 {offsets = [0, 32], sizes = [2, 32], strides = [1, 1]} : vector<2x128xf32> to vector<2x32xf32>
    %265 = arith.mulf %264, %219 : vector<2x32xf32>
    %266 = vector.extract_strided_slice %253 {offsets = [0, 0], sizes = [2, 32], strides = [1, 1]} : vector<2x128xf32> to vector<2x32xf32>
    %267 = vector.extract_strided_slice %254 {offsets = [0, 64], sizes = [2, 32], strides = [1, 1]} : vector<2x128xf32> to vector<2x32xf32>
    %268 = arith.mulf %266, %267 : vector<2x32xf32>
    %269 = arith.addf %265, %268 : vector<2x32xf32>
    %270 = vector.extract_strided_slice %253 {offsets = [0, 96], sizes = [2, 32], strides = [1, 1]} : vector<2x128xf32> to vector<2x32xf32>
    %271 = math.tanh %269 : vector<2x32xf32>
    %272 = arith.mulf %270, %271 : vector<2x32xf32>
    %273 = arith.index_cast %c4_i32 : i32 to index
    %c0_86 = arith.constant 0 : index
    %c0_87 = arith.constant 0 : index
    %274 = vector.load %arg11[%273, %c0_86, %c0_87] : memref<8x2x32xf32, #tpu.memory_space<vmem>>, vector<1x2x32xf32>
    %275 = vector.shape_cast %274 : vector<1x2x32xf32> to vector<2x32xf32>
    %276 = vector.shape_cast %263 : vector<2x32xf32> to vector<1x2x32xf32>
    tpu.vector_store %arg11[%273, %c0_86, %c0_87], %276 {strides = array<i32>} : memref<8x2x32xf32, #tpu.memory_space<vmem>>, vector<1x2x32xf32>,
    %277 = arith.index_cast %c4_i32 : i32 to index
    %c0_88 = arith.constant 0 : index
    %c0_89 = arith.constant 0 : index
    %278 = vector.load %arg12[%277, %c0_88, %c0_89] : memref<8x2x32xf32, #tpu.memory_space<vmem>>, vector<1x2x32xf32>
    %279 = vector.shape_cast %278 : vector<1x2x32xf32> to vector<2x32xf32>
    %280 = vector.shape_cast %272 : vector<2x32xf32> to vector<1x2x32xf32>
    tpu.vector_store %arg12[%277, %c0_88, %c0_89], %280 {strides = array<i32>} : memref<8x2x32xf32, #tpu.memory_space<vmem>>, vector<1x2x32xf32>,
    %c5_i32 = arith.constant 5 : i32
    %281 = arith.index_cast %c5_i32 : i32 to index
    %c0_90 = arith.constant 0 : index
    %c0_91 = arith.constant 0 : index
    %282 = vector.load %arg9[%281, %c0_90, %c0_91] : memref<8x2x128xbf16, #tpu.memory_space<vmem>>, vector<1x2x128xbf16>
    %283 = vector.shape_cast %282 : vector<1x2x128xbf16> to vector<2x128xbf16>
    %284 = arith.extf %283 : vector<2x128xbf16> to vector<2x128xf32>
    %cst_92 = arith.constant dense<0.000000e+00> : vector<2x128xf32>
    %285 = tpu.matmul %263, %27, %cst_92 {dimension_numbers = #tpu.dot_dimension_numbers<[1], [0], [0], [1], [0, 0, 1, 1], [], []>} : vector<2x32xf32>, vector<32x128xf32>, vector<2x128xf32> -> vector<2x128xf32>
    %286 = arith.addf %284, %285 : vector<2x128xf32>
    %287 = arith.index_cast %c5_i32 : i32 to index
    %c0_93 = arith.constant 0 : index
    %c0_94 = arith.constant 0 : index
    %288 = vector.load %arg10[%287, %c0_93, %c0_94] : memref<8x2x128xbf16, #tpu.memory_space<vmem>>, vector<1x2x128xbf16>
    %289 = vector.shape_cast %288 : vector<1x2x128xbf16> to vector<2x128xbf16>
    %290 = arith.extf %289 : vector<2x128xbf16> to vector<2x128xf32>
    %cst_95 = arith.constant dense<0.000000e+00> : vector<2x128xf32>
    %291 = tpu.matmul %272, %29, %cst_95 {dimension_numbers = #tpu.dot_dimension_numbers<[1], [0], [0], [1], [0, 0, 1, 1], [], []>} : vector<2x32xf32>, vector<32x128xf32>, vector<2x128xf32> -> vector<2x128xf32>
    %292 = arith.addf %290, %291 : vector<2x128xf32>
    %293 = arith.negf %286 : vector<2x128xf32>
    %294 = math.exp %293 : vector<2x128xf32>
    %cst_96 = arith.constant 1.000000e+00 : f32
    %295 = vector.broadcast %cst_96 : f32 to vector<2x128xf32>
    %296 = arith.addf %295, %294 : vector<2x128xf32>
    %297 = arith.divf %295, %296 : vector<2x128xf32>
    %298 = math.tanh %286 : vector<2x128xf32>
    %299 = arith.negf %292 : vector<2x128xf32>
    %300 = math.exp %299 : vector<2x128xf32>
    %cst_97 = arith.constant 1.000000e+00 : f32
    %301 = vector.broadcast %cst_97 : f32 to vector<2x128xf32>
    %302 = arith.addf %301, %300 : vector<2x128xf32>
    %303 = arith.divf %301, %302 : vector<2x128xf32>
    %304 = math.tanh %292 : vector<2x128xf32>
    %305 = vector.extract_strided_slice %297 {offsets = [0, 32], sizes = [2, 32], strides = [1, 1]} : vector<2x128xf32> to vector<2x32xf32>
    %306 = arith.mulf %305, %260 : vector<2x32xf32>
    %307 = vector.extract_strided_slice %297 {offsets = [0, 0], sizes = [2, 32], strides = [1, 1]} : vector<2x128xf32> to vector<2x32xf32>
    %308 = vector.extract_strided_slice %298 {offsets = [0, 64], sizes = [2, 32], strides = [1, 1]} : vector<2x128xf32> to vector<2x32xf32>
    %309 = arith.mulf %307, %308 : vector<2x32xf32>
    %310 = arith.addf %306, %309 : vector<2x32xf32>
    %311 = vector.extract_strided_slice %297 {offsets = [0, 96], sizes = [2, 32], strides = [1, 1]} : vector<2x128xf32> to vector<2x32xf32>
    %312 = math.tanh %310 : vector<2x32xf32>
    %313 = arith.mulf %311, %312 : vector<2x32xf32>
    %314 = vector.extract_strided_slice %303 {offsets = [0, 32], sizes = [2, 32], strides = [1, 1]} : vector<2x128xf32> to vector<2x32xf32>
    %315 = arith.mulf %314, %269 : vector<2x32xf32>
    %316 = vector.extract_strided_slice %303 {offsets = [0, 0], sizes = [2, 32], strides = [1, 1]} : vector<2x128xf32> to vector<2x32xf32>
    %317 = vector.extract_strided_slice %304 {offsets = [0, 64], sizes = [2, 32], strides = [1, 1]} : vector<2x128xf32> to vector<2x32xf32>
    %318 = arith.mulf %316, %317 : vector<2x32xf32>
    %319 = arith.addf %315, %318 : vector<2x32xf32>
    %320 = vector.extract_strided_slice %303 {offsets = [0, 96], sizes = [2, 32], strides = [1, 1]} : vector<2x128xf32> to vector<2x32xf32>
    %321 = math.tanh %319 : vector<2x32xf32>
    %322 = arith.mulf %320, %321 : vector<2x32xf32>
    %323 = arith.index_cast %c5_i32 : i32 to index
    %c0_98 = arith.constant 0 : index
    %c0_99 = arith.constant 0 : index
    %324 = vector.load %arg11[%323, %c0_98, %c0_99] : memref<8x2x32xf32, #tpu.memory_space<vmem>>, vector<1x2x32xf32>
    %325 = vector.shape_cast %324 : vector<1x2x32xf32> to vector<2x32xf32>
    %326 = vector.shape_cast %313 : vector<2x32xf32> to vector<1x2x32xf32>
    tpu.vector_store %arg11[%323, %c0_98, %c0_99], %326 {strides = array<i32>} : memref<8x2x32xf32, #tpu.memory_space<vmem>>, vector<1x2x32xf32>,
    %327 = arith.index_cast %c5_i32 : i32 to index
    %c0_100 = arith.constant 0 : index
    %c0_101 = arith.constant 0 : index
    %328 = vector.load %arg12[%327, %c0_100, %c0_101] : memref<8x2x32xf32, #tpu.memory_space<vmem>>, vector<1x2x32xf32>
    %329 = vector.shape_cast %328 : vector<1x2x32xf32> to vector<2x32xf32>
    %330 = vector.shape_cast %322 : vector<2x32xf32> to vector<1x2x32xf32>
    tpu.vector_store %arg12[%327, %c0_100, %c0_101], %330 {strides = array<i32>} : memref<8x2x32xf32, #tpu.memory_space<vmem>>, vector<1x2x32xf32>,
    %c6_i32 = arith.constant 6 : i32
    %331 = arith.index_cast %c6_i32 : i32 to index
    %c0_102 = arith.constant 0 : index
    %c0_103 = arith.constant 0 : index
    %332 = vector.load %arg9[%331, %c0_102, %c0_103] : memref<8x2x128xbf16, #tpu.memory_space<vmem>>, vector<1x2x128xbf16>
    %333 = vector.shape_cast %332 : vector<1x2x128xbf16> to vector<2x128xbf16>
    %334 = arith.extf %333 : vector<2x128xbf16> to vector<2x128xf32>
    %cst_104 = arith.constant dense<0.000000e+00> : vector<2x128xf32>
    %335 = tpu.matmul %313, %27, %cst_104 {dimension_numbers = #tpu.dot_dimension_numbers<[1], [0], [0], [1], [0, 0, 1, 1], [], []>} : vector<2x32xf32>, vector<32x128xf32>, vector<2x128xf32> -> vector<2x128xf32>
    %336 = arith.addf %334, %335 : vector<2x128xf32>
    %337 = arith.index_cast %c6_i32 : i32 to index
    %c0_105 = arith.constant 0 : index
    %c0_106 = arith.constant 0 : index
    %338 = vector.load %arg10[%337, %c0_105, %c0_106] : memref<8x2x128xbf16, #tpu.memory_space<vmem>>, vector<1x2x128xbf16>
    %339 = vector.shape_cast %338 : vector<1x2x128xbf16> to vector<2x128xbf16>
    %340 = arith.extf %339 : vector<2x128xbf16> to vector<2x128xf32>
    %cst_107 = arith.constant dense<0.000000e+00> : vector<2x128xf32>
    %341 = tpu.matmul %322, %29, %cst_107 {dimension_numbers = #tpu.dot_dimension_numbers<[1], [0], [0], [1], [0, 0, 1, 1], [], []>} : vector<2x32xf32>, vector<32x128xf32>, vector<2x128xf32> -> vector<2x128xf32>
    %342 = arith.addf %340, %341 : vector<2x128xf32>
    %343 = arith.negf %336 : vector<2x128xf32>
    %344 = math.exp %343 : vector<2x128xf32>
    %cst_108 = arith.constant 1.000000e+00 : f32
    %345 = vector.broadcast %cst_108 : f32 to vector<2x128xf32>
    %346 = arith.addf %345, %344 : vector<2x128xf32>
    %347 = arith.divf %345, %346 : vector<2x128xf32>
    %348 = math.tanh %336 : vector<2x128xf32>
    %349 = arith.negf %342 : vector<2x128xf32>
    %350 = math.exp %349 : vector<2x128xf32>
    %cst_109 = arith.constant 1.000000e+00 : f32
    %351 = vector.broadcast %cst_109 : f32 to vector<2x128xf32>
    %352 = arith.addf %351, %350 : vector<2x128xf32>
    %353 = arith.divf %351, %352 : vector<2x128xf32>
    %354 = math.tanh %342 : vector<2x128xf32>
    %355 = vector.extract_strided_slice %347 {offsets = [0, 32], sizes = [2, 32], strides = [1, 1]} : vector<2x128xf32> to vector<2x32xf32>
    %356 = arith.mulf %355, %310 : vector<2x32xf32>
    %357 = vector.extract_strided_slice %347 {offsets = [0, 0], sizes = [2, 32], strides = [1, 1]} : vector<2x128xf32> to vector<2x32xf32>
    %358 = vector.extract_strided_slice %348 {offsets = [0, 64], sizes = [2, 32], strides = [1, 1]} : vector<2x128xf32> to vector<2x32xf32>
    %359 = arith.mulf %357, %358 : vector<2x32xf32>
    %360 = arith.addf %356, %359 : vector<2x32xf32>
    %361 = vector.extract_strided_slice %347 {offsets = [0, 96], sizes = [2, 32], strides = [1, 1]} : vector<2x128xf32> to vector<2x32xf32>
    %362 = math.tanh %360 : vector<2x32xf32>
    %363 = arith.mulf %361, %362 : vector<2x32xf32>
    %364 = vector.extract_strided_slice %353 {offsets = [0, 32], sizes = [2, 32], strides = [1, 1]} : vector<2x128xf32> to vector<2x32xf32>
    %365 = arith.mulf %364, %319 : vector<2x32xf32>
    %366 = vector.extract_strided_slice %353 {offsets = [0, 0], sizes = [2, 32], strides = [1, 1]} : vector<2x128xf32> to vector<2x32xf32>
    %367 = vector.extract_strided_slice %354 {offsets = [0, 64], sizes = [2, 32], strides = [1, 1]} : vector<2x128xf32> to vector<2x32xf32>
    %368 = arith.mulf %366, %367 : vector<2x32xf32>
    %369 = arith.addf %365, %368 : vector<2x32xf32>
    %370 = vector.extract_strided_slice %353 {offsets = [0, 96], sizes = [2, 32], strides = [1, 1]} : vector<2x128xf32> to vector<2x32xf32>
    %371 = math.tanh %369 : vector<2x32xf32>
    %372 = arith.mulf %370, %371 : vector<2x32xf32>
    %373 = arith.index_cast %c6_i32 : i32 to index
    %c0_110 = arith.constant 0 : index
    %c0_111 = arith.constant 0 : index
    %374 = vector.load %arg11[%373, %c0_110, %c0_111] : memref<8x2x32xf32, #tpu.memory_space<vmem>>, vector<1x2x32xf32>
    %375 = vector.shape_cast %374 : vector<1x2x32xf32> to vector<2x32xf32>
    %376 = vector.shape_cast %363 : vector<2x32xf32> to vector<1x2x32xf32>
    tpu.vector_store %arg11[%373, %c0_110, %c0_111], %376 {strides = array<i32>} : memref<8x2x32xf32, #tpu.memory_space<vmem>>, vector<1x2x32xf32>,
    %377 = arith.index_cast %c6_i32 : i32 to index
    %c0_112 = arith.constant 0 : index
    %c0_113 = arith.constant 0 : index
    %378 = vector.load %arg12[%377, %c0_112, %c0_113] : memref<8x2x32xf32, #tpu.memory_space<vmem>>, vector<1x2x32xf32>
    %379 = vector.shape_cast %378 : vector<1x2x32xf32> to vector<2x32xf32>
    %380 = vector.shape_cast %372 : vector<2x32xf32> to vector<1x2x32xf32>
    tpu.vector_store %arg12[%377, %c0_112, %c0_113], %380 {strides = array<i32>} : memref<8x2x32xf32, #tpu.memory_space<vmem>>, vector<1x2x32xf32>,
    %c7_i32 = arith.constant 7 : i32
    %381 = arith.index_cast %c7_i32 : i32 to index
    %c0_114 = arith.constant 0 : index
    %c0_115 = arith.constant 0 : index
    %382 = vector.load %arg9[%381, %c0_114, %c0_115] : memref<8x2x128xbf16, #tpu.memory_space<vmem>>, vector<1x2x128xbf16>
    %383 = vector.shape_cast %382 : vector<1x2x128xbf16> to vector<2x128xbf16>
    %384 = arith.extf %383 : vector<2x128xbf16> to vector<2x128xf32>
    %cst_116 = arith.constant dense<0.000000e+00> : vector<2x128xf32>
    %385 = tpu.matmul %363, %27, %cst_116 {dimension_numbers = #tpu.dot_dimension_numbers<[1], [0], [0], [1], [0, 0, 1, 1], [], []>} : vector<2x32xf32>, vector<32x128xf32>, vector<2x128xf32> -> vector<2x128xf32>
    %386 = arith.addf %384, %385 : vector<2x128xf32>
    %387 = arith.index_cast %c7_i32 : i32 to index
    %c0_117 = arith.constant 0 : index
    %c0_118 = arith.constant 0 : index
    %388 = vector.load %arg10[%387, %c0_117, %c0_118] : memref<8x2x128xbf16, #tpu.memory_space<vmem>>, vector<1x2x128xbf16>
    %389 = vector.shape_cast %388 : vector<1x2x128xbf16> to vector<2x128xbf16>
    %390 = arith.extf %389 : vector<2x128xbf16> to vector<2x128xf32>
    %cst_119 = arith.constant dense<0.000000e+00> : vector<2x128xf32>
    %391 = tpu.matmul %372, %29, %cst_119 {dimension_numbers = #tpu.dot_dimension_numbers<[1], [0], [0], [1], [0, 0, 1, 1], [], []>} : vector<2x32xf32>, vector<32x128xf32>, vector<2x128xf32> -> vector<2x128xf32>
    %392 = arith.addf %390, %391 : vector<2x128xf32>
    %393 = arith.negf %386 : vector<2x128xf32>
    %394 = math.exp %393 : vector<2x128xf32>
    %cst_120 = arith.constant 1.000000e+00 : f32
    %395 = vector.broadcast %cst_120 : f32 to vector<2x128xf32>
    %396 = arith.addf %395, %394 : vector<2x128xf32>
    %397 = arith.divf %395, %396 : vector<2x128xf32>
    %398 = math.tanh %386 : vector<2x128xf32>
    %399 = arith.negf %392 : vector<2x128xf32>
    %400 = math.exp %399 : vector<2x128xf32>
    %cst_121 = arith.constant 1.000000e+00 : f32
    %401 = vector.broadcast %cst_121 : f32 to vector<2x128xf32>
    %402 = arith.addf %401, %400 : vector<2x128xf32>
    %403 = arith.divf %401, %402 : vector<2x128xf32>
    %404 = math.tanh %392 : vector<2x128xf32>
    %405 = vector.extract_strided_slice %397 {offsets = [0, 32], sizes = [2, 32], strides = [1, 1]} : vector<2x128xf32> to vector<2x32xf32>
    %406 = arith.mulf %405, %360 : vector<2x32xf32>
    %407 = vector.extract_strided_slice %397 {offsets = [0, 0], sizes = [2, 32], strides = [1, 1]} : vector<2x128xf32> to vector<2x32xf32>
    %408 = vector.extract_strided_slice %398 {offsets = [0, 64], sizes = [2, 32], strides = [1, 1]} : vector<2x128xf32> to vector<2x32xf32>
    %409 = arith.mulf %407, %408 : vector<2x32xf32>
    %410 = arith.addf %406, %409 : vector<2x32xf32>
    %411 = vector.extract_strided_slice %397 {offsets = [0, 96], sizes = [2, 32], strides = [1, 1]} : vector<2x128xf32> to vector<2x32xf32>
    %412 = math.tanh %410 : vector<2x32xf32>
    %413 = arith.mulf %411, %412 : vector<2x32xf32>
    %414 = vector.extract_strided_slice %403 {offsets = [0, 32], sizes = [2, 32], strides = [1, 1]} : vector<2x128xf32> to vector<2x32xf32>
    %415 = arith.mulf %414, %369 : vector<2x32xf32>
    %416 = vector.extract_strided_slice %403 {offsets = [0, 0], sizes = [2, 32], strides = [1, 1]} : vector<2x128xf32> to vector<2x32xf32>
    %417 = vector.extract_strided_slice %404 {offsets = [0, 64], sizes = [2, 32], strides = [1, 1]} : vector<2x128xf32> to vector<2x32xf32>
    %418 = arith.mulf %416, %417 : vector<2x32xf32>
    %419 = arith.addf %415, %418 : vector<2x32xf32>
    %420 = vector.extract_strided_slice %403 {offsets = [0, 96], sizes = [2, 32], strides = [1, 1]} : vector<2x128xf32> to vector<2x32xf32>
    %421 = math.tanh %419 : vector<2x32xf32>
    %422 = arith.mulf %420, %421 : vector<2x32xf32>
    %423 = arith.index_cast %c7_i32 : i32 to index
    %c0_122 = arith.constant 0 : index
    %c0_123 = arith.constant 0 : index
    %424 = vector.load %arg11[%423, %c0_122, %c0_123] : memref<8x2x32xf32, #tpu.memory_space<vmem>>, vector<1x2x32xf32>
    %425 = vector.shape_cast %424 : vector<1x2x32xf32> to vector<2x32xf32>
    %426 = vector.shape_cast %413 : vector<2x32xf32> to vector<1x2x32xf32>
    tpu.vector_store %arg11[%423, %c0_122, %c0_123], %426 {strides = array<i32>} : memref<8x2x32xf32, #tpu.memory_space<vmem>>, vector<1x2x32xf32>,
    %427 = arith.index_cast %c7_i32 : i32 to index
    %c0_124 = arith.constant 0 : index
    %c0_125 = arith.constant 0 : index
    %428 = vector.load %arg12[%427, %c0_124, %c0_125] : memref<8x2x32xf32, #tpu.memory_space<vmem>>, vector<1x2x32xf32>
    %429 = vector.shape_cast %428 : vector<1x2x32xf32> to vector<2x32xf32>
    %430 = vector.shape_cast %422 : vector<2x32xf32> to vector<1x2x32xf32>
    tpu.vector_store %arg12[%427, %c0_124, %c0_125], %430 {strides = array<i32>} : memref<8x2x32xf32, #tpu.memory_space<vmem>>, vector<1x2x32xf32>,
    %c8_i32 = arith.constant 8 : i32
    %c0_126 = arith.constant 0 : index
    %c0_127 = arith.constant 0 : index
    %431 = vector.load %arg2[%c0_126, %c0_127] : memref<16x1xf32, #tpu.memory_space<vmem>>, vector<16x1xf32>
    %c0_128 = arith.constant 0 : index
    %c0_129 = arith.constant 0 : index
    %c0_130 = arith.constant 0 : index
    %432 = vector.load %arg11[%c0_128, %c0_129, %c0_130] : memref<8x2x32xf32, #tpu.memory_space<vmem>>, vector<8x2x32xf32>
    %433 = vector.shape_cast %432 : vector<8x2x32xf32> to vector<16x32xf32>
    %434 = vector.broadcast %431 : vector<16x1xf32> to vector<16x32xf32>
    %435 = arith.mulf %433, %434 : vector<16x32xf32>
    %436 = arith.truncf %435 : vector<16x32xf32> to vector<16x32xbf16>
    %c0_131 = arith.constant 0 : index
    %c0_132 = arith.constant 0 : index
    %c0_133 = arith.constant 0 : index
    %437 = vector.load %arg12[%c0_131, %c0_132, %c0_133] : memref<8x2x32xf32, #tpu.memory_space<vmem>>, vector<8x2x32xf32>
    %438 = vector.shape_cast %437 : vector<8x2x32xf32> to vector<16x32xf32>
    %439 = vector.broadcast %431 : vector<16x1xf32> to vector<16x32xf32>
    %440 = arith.mulf %438, %439 : vector<16x32xf32>
    %441 = arith.truncf %440 : vector<16x32xf32> to vector<16x32xbf16>
    %c0_134 = arith.constant 0 : index
    %c0_135 = arith.constant 0 : index
    %c0_136 = arith.constant 0 : index
    %442 = vector.load %arg6[%c0_134, %c0_135, %c0_136] : memref<2x32x32xbf16, #tpu.memory_space<vmem>>, vector<1x32x32xbf16>
    %443 = vector.shape_cast %442 : vector<1x32x32xbf16> to vector<32x32xbf16>
    %cst_137 = arith.constant dense<0.000000e+00> : vector<16x32xf32>
    %444 = tpu.matmul %436, %443, %cst_137 {dimension_numbers = #tpu.dot_dimension_numbers<[1], [0], [0], [1], [0, 0, 1, 1], [], []>} : vector<16x32xbf16>, vector<32x32xbf16>, vector<16x32xf32> -> vector<16x32xf32>
    %c0_138 = arith.constant 0 : index
    %c0_139 = arith.constant 0 : index
    %c0_140 = arith.constant 0 : index
    %445 = vector.load %arg7[%c0_138, %c0_139, %c0_140] : memref<2x1x32xf32, #tpu.memory_space<vmem>>, vector<1x1x32xf32>
    %446 = vector.shape_cast %445 : vector<1x1x32xf32> to vector<1x32xf32>
    %447 = vector.broadcast %446 : vector<1x32xf32> to vector<16x32xf32>
    %448 = arith.addf %444, %447 : vector<16x32xf32>
    %c0_141 = arith.constant 0 : index
    %c0_142 = arith.constant 0 : index
    %c0_143 = arith.constant 0 : index
    %449 = vector.load %arg8[%c0_141, %c0_142, %c0_143] : memref<2x16x32xf32, #tpu.memory_space<vmem>>, vector<1x16x32xf32>
    %450 = vector.shape_cast %449 : vector<1x16x32xf32> to vector<16x32xf32>
    %451 = vector.shape_cast %448 : vector<16x32xf32> to vector<1x16x32xf32>
    tpu.vector_store %arg8[%c0_141, %c0_142, %c0_143], %451 {strides = array<i32>} : memref<2x16x32xf32, #tpu.memory_space<vmem>>, vector<1x16x32xf32>,
    %c1_144 = arith.constant 1 : index
    %c0_145 = arith.constant 0 : index
    %c0_146 = arith.constant 0 : index
    %452 = vector.load %arg6[%c1_144, %c0_145, %c0_146] : memref<2x32x32xbf16, #tpu.memory_space<vmem>>, vector<1x32x32xbf16>
    %453 = vector.shape_cast %452 : vector<1x32x32xbf16> to vector<32x32xbf16>
    %cst_147 = arith.constant dense<0.000000e+00> : vector<16x32xf32>
    %454 = tpu.matmul %441, %453, %cst_147 {dimension_numbers = #tpu.dot_dimension_numbers<[1], [0], [0], [1], [0, 0, 1, 1], [], []>} : vector<16x32xbf16>, vector<32x32xbf16>, vector<16x32xf32> -> vector<16x32xf32>
    %c1_148 = arith.constant 1 : index
    %c0_149 = arith.constant 0 : index
    %c0_150 = arith.constant 0 : index
    %455 = vector.load %arg7[%c1_148, %c0_149, %c0_150] : memref<2x1x32xf32, #tpu.memory_space<vmem>>, vector<1x1x32xf32>
    %456 = vector.shape_cast %455 : vector<1x1x32xf32> to vector<1x32xf32>
    %457 = vector.broadcast %456 : vector<1x32xf32> to vector<16x32xf32>
    %458 = arith.addf %454, %457 : vector<16x32xf32>
    %c1_151 = arith.constant 1 : index
    %c0_152 = arith.constant 0 : index
    %c0_153 = arith.constant 0 : index
    %459 = vector.load %arg8[%c1_151, %c0_152, %c0_153] : memref<2x16x32xf32, #tpu.memory_space<vmem>>, vector<1x16x32xf32>
    %460 = vector.shape_cast %459 : vector<1x16x32xf32> to vector<16x32xf32>
    %461 = vector.shape_cast %458 : vector<16x32xf32> to vector<1x16x32xf32>
    tpu.vector_store %arg8[%c1_151, %c0_152, %c0_153], %461 {strides = array<i32>} : memref<2x16x32xf32, #tpu.memory_space<vmem>>, vector<1x16x32xf32>,
    return
  }
  func.func @transform_0(%arg0: i32) -> (i32, i32, i32) {
    %c0_i32 = arith.constant 0 : i32
    %c0_i32_0 = arith.constant 0 : i32
    %c0_i32_1 = arith.constant 0 : i32
    %c0_i32_2 = arith.constant 0 : i32
    return %c0_i32, %c0_i32_0, %c0_i32_1 : i32, i32, i32
  }
  func.func @transform_1(%arg0: i32) -> (i32, i32) {
    %c0_i32 = arith.constant 0 : i32
    %c0_i32_0 = arith.constant 0 : i32
    %c0_i32_1 = arith.constant 0 : i32
    return %c0_i32, %c0_i32_0 : i32, i32
  }
  func.func @transform_2(%arg0: i32) -> (i32, i32, i32) {
    %c0_i32 = arith.constant 0 : i32
    %c0_i32_0 = arith.constant 0 : i32
    %c0_i32_1 = arith.constant 0 : i32
    %c0_i32_2 = arith.constant 0 : i32
    return %c0_i32, %c0_i32_0, %c0_i32_1 : i32, i32, i32
  }
  func.func @transform_3(%arg0: i32) -> (i32, i32, i32) {
    %c0_i32 = arith.constant 0 : i32
    %c0_i32_0 = arith.constant 0 : i32
    %c0_i32_1 = arith.constant 0 : i32
    %c0_i32_2 = arith.constant 0 : i32
    return %c0_i32, %c0_i32_0, %c0_i32_1 : i32, i32, i32
  }
  func.func @transform_4(%arg0: i32) -> (i32, i32, i32) {
    %c0_i32 = arith.constant 0 : i32
    %c0_i32_0 = arith.constant 0 : i32
    %c0_i32_1 = arith.constant 0 : i32
    %c0_i32_2 = arith.constant 0 : i32
    return %c0_i32, %c0_i32_0, %c0_i32_1 : i32, i32, i32
  }
  func.func @transform_5(%arg0: i32) -> (i32, i32, i32) {
    %c0_i32 = arith.constant 0 : i32
    %c0_i32_0 = arith.constant 0 : i32
    %c0_i32_1 = arith.constant 0 : i32
    %c0_i32_2 = arith.constant 0 : i32
    return %c0_i32, %c0_i32_0, %c0_i32_1 : i32, i32, i32
  }
  func.func @transform_6(%arg0: i32) -> (i32, i32, i32) {
    %c0_i32 = arith.constant 0 : i32
    %c0_i32_0 = arith.constant 0 : i32
    %c0_i32_1 = arith.constant 0 : i32
    %c0_i32_2 = arith.constant 0 : i32
    return %c0_i32, %c0_i32_0, %c0_i32_1 : i32, i32, i32
  }
  func.func @transform_7(%arg0: i32) -> (i32, i32, i32) {
    %c0_i32 = arith.constant 0 : i32
    %c0_i32_0 = arith.constant 0 : i32
    %c0_i32_1 = arith.constant 0 : i32
    %c0_i32_2 = arith.constant 0 : i32
    return %c0_i32, %c0_i32_0, %c0_i32_1 : i32, i32, i32
  }
}

</mosaic_0001>

<bundles_post_ra>
// kernel: bilm_forward.7
= control target key start
LH: loop header
LB: loop body
LE: loop exit
PB: predicated region body
PF: predicated region fallthrough
CT: control target
= control target key end

     0   :  { %s504_s12 = smov 0   ;;  %s506_s13 = smov 0   ;;  %s546_s0 = inlined_call_operand.vmem [shape: f32[32,32], index: 0, kind: input, shape index: {}]   ;;  %s547_s1 = inlined_call_operand.vmem [shape: bf16[32,64], index: 1, kind: input, shape index: {}]   ;;  %s548_s2 = inlined_call_operand.vmem [shape: f32[1,64], index: 2, kind: input, shape index: {}]   ;;  %s549_s3 = inlined_call_operand.vmem [shape: f32[32,64], index: 3, kind: output, shape index: {}]  }
   0x1   :  { %s508_s14 = smov 0  }
   0x2 LB: > { %s22_s15 = sadd.s32 1, %s476_s13  ;;  %p408_p0 = scmp.ge.s32.totalorder %s480_s14, 1  ;;  %s480_s14 = sphi %s508_s14, %s13_s14   ;;  %s476_s13 = sphi %s506_s13, %s551_s13   ;;  %s472_s12 = sphi %s504_s12, %s550_s12  }
   0x3   : > { %p23_p1 = scmp.ge.s32.totalorder %s22_s15, 2  ;;  %p169_p2 = scmp.lt.s32.totalorder %s480_s14, 3 }
   0x5   : > { %s553_s15 = smov (%p23_p1, %s22_s15), 0  ;;  %p170_p3 = pnand %p408_p0, %p169_p2 }
   0x6   : > { %s409_s20 = sshll.u32 (!%p170_p3), %s472_s12, 1 }
   0x7   : > { %173 = sbr.rel (%p170_p3) target bundleno = 221 (0xdd), region = 32  ;;  %p204_p4 = scmp.lt.s32.totalorder (!%p170_p3), %s409_s20, 3 }
   0xc   : > { %v456_v0 = vld [vmem:[%s547_s1 + $0x8] sm:$0xff]   ;;  %v482_v1 = vmov 0.0   ;;  %v457_v2 = vld [vmem:[%s547_s1] sm:$0xff]   ;;  %vm483_vm0 = vmmov 0   ;;  %s555_s20 = smov (!%p204_p4, %s409_s20), 3  ;;  %vm252_vm1 = vcmask 261120  }
   0xd   : > { %422 = vmatprep.subr.bf16.mxu0 %v482_v1  ;;  %426 = vmatprep.mubr.msk.bf16.mxu0 %vm483_vm0, %v482_v1  ;;  %s410_s21 = sshll.u32 %s555_s20, 3  ;;  %v413_v6 = vld [vmem:[%s548_s2] ss:$0 sm:$0xff]  ;;  %vm297_vm2 = vcmask 523264  }
   0xe   : > { %423 = vmatpush3.bf16.msra.mxu0 %v456_v0  ;;  %s207_s24 = scalar_lea.vmem %s546_s0, %s410_s21  ;;  %s223_s29 = scalar_lea.vmem %s549_s3, %s410_s21 }
   0xf   : > { %424 = vmatprep.subr.bf16.mxu0 %v482_v1  ;;  %v226_v3 = vld [vmem:[%s207_s24] sm:$0xff]  ;;  %v227_v4 = vld [vmem:[%s207_s24 + $0x8] sm:$0xff] }
  0x10   : > { %v228_v5 = vpack.c.bf16 %v227_v4, %v226_v3 }
  0x12   : > { %425 = vmatpush3.bf16.msra.mxu0 %v457_v2 }
  0x15   : > { %427 = vmatmul.mubr.msk.bf16.vlgmr.msra.gmra.mxu0 %vm252_vm1, %v228_v5 }
  0xd5   : > { %v290_v7 = vpop.f32.mrf.mxu0 }
  0xd6   : > { %v291_v8 = vadd.f32 %v413_v6, %v290_v7 }
  0xd7   : > { %v428_v9 = vpop.f32.mrf.mxu0 }
  0xd8   : > { %298 = vst.msk [vmem:[%s223_s29] sm:$0xff] %vm297_vm2, %v291_v8 }
  0xd9   : > { %v293_v10 = vpop.f32.mrf.mxu0 }
  0xda   : > { %v294_v11 = vadd.f32 %v413_v6, %v293_v10 }
  0xdb   : > { %v429_v12 = vpop.f32.mrf.mxu0 }
  0xdc   : > { %299 = vst.msk [vmem:[%s223_s29 + $0x8] sm:$0xff] %vm297_vm2, %v294_v11 }
  0xdd PF: > { %s13_s14 = sadd.s32 1, %s480_s14   ;;  %s550_s12 = smov %s476_s13 }
  0xde   : > { %p10_p5 = scmp.ge.s32.totalorder %s13_s14, 4   ;;  %s551_s13 = smov %s553_s15 }
  0xe0   :  { %12 = sbr.rel (!%p10_p5) target bundleno = 2 (0x2), region = 68 }

// kernel: bilm_forward.4
= control target key start
LH: loop header
LB: loop body
LE: loop exit
PB: predicated region body
PF: predicated region fallthrough
CT: control target
= control target key end

     0   :  { %s1164_s13 = smov 0   ;;  %s1311_s0 = inlined_call_operand.vmem [shape: f32[16,160], index: 0, kind: input, shape index: {}]   ;;  %s1312_s1 = inlined_call_operand.vmem [shape: bf16[48,64], index: 1, kind: input, shape index: {}]   ;;  %s1313_s2 = inlined_call_operand.vmem [shape: f32[1,64], index: 2, kind: input, shape index: {}]   ;;  %s1314_s3 = inlined_call_operand.vmem [shape: f32[8,1,64], index: 3, kind: input, shape index: {}]   ;;  %s1315_s4 = inlined_call_operand.vmem [shape: bf16[64,128], index: 4, kind: input, shape index: {}]   ;;  %s1316_s5 = inlined_call_operand.vmem [shape: f32[1,128], index: 5, kind: input, shape index: {}]   ;;  %s1317_s6 = inlined_call_operand.vmem [shape: bf16[64,128], index: 6, kind: input, shape index: {}]   ;;  %s1318_s7 = inlined_call_operand.vmem [shape: f32[1,128], index: 7, kind: input, shape index: {}]   ;;  %s1319_s8 = inlined_call_operand.vmem [shape: bf16[64,32], index: 8, kind: input, shape index: {}]   ;;  %s1320_s9 = inlined_call_operand.vmem [shape: f32[1,32], index: 9, kind: input, shape index: {}]   ;;  %s1321_s10 = inlined_call_operand.vmem [shape: f32[16,32], index: 10, kind: output, shape index: {}]  }
   0x1 LB: > { %s933_s14 = sadd.s32 4294967295, %s1098_s13   ;;  %p937_p0 = scmp.ge.s32.totalorder %s1098_s13, 1  ;;  %s1098_s13 = sphi %s1164_s13, %s20_s13  }
   0x2   : > { %p312_p1 = scmp.lt.s32.totalorder %s1098_s13, 3 }
   0x4   : > { %p313_p2 = pnand %p937_p0, %p312_p1 }
   0x5   : > { %p349_p3 = scmp.lt.s32.totalorder (!%p313_p2), %s933_s14, 1  ;;  %s1100_s25 = smov (!%p313_p2), 64  }
   0x6   : > { %316 = sbr.rel (%p313_p2) target bundleno = 1430 (0x596), region = 60  ;;  %s1101_s26 = smov (!%p313_p2), 96  }
   0x7   : > { %s1102_s27 = smov (!%p313_p2), 80   ;;  %s1103_s28 = smov (!%p313_p2), 112  }
   0x8   : > { %s1104_s29 = smov (!%p313_p2), 48   ;;  %s1105_s30 = smov (!%p313_p2), 32  }
   0x9   : > { %s1106_s11 = smov (!%p313_p2), 16  }
   0xb   : > { %v1069_v0 = vld [vmem:[%s1312_s1 + $0x10] sm:$0xff]   ;;  %v1070_v1 = vld [vmem:[%s1312_s1 + $0x8] sm:$0xff]   ;;  %s1323_s14 = smov (!%p349_p3, %s933_s14), 1  ;;  %v1071_v3 = vld [vmem:[%s1312_s1] sm:$0xff]   ;;  %vm389_vm0 = vcmask 1043456   ;;  %vm426_vm1 = vcmask 392192  }
   0xc   : > { %1002 = vmatprep.subr.bf16.mxu0 %v1069_v0  ;;  %s979_s19 = sshll.u32 %s1323_s14, 4  ;;  %vm380_vm2 = vcmask 261120   ;;  %vm387_vm3 = vcmask 130048   ;;  %v1072_v24 = vld [vmem:[%s1315_s4 + $0x18] sm:$0xff]   ;;  %v1107_v25 = vmov 0.0   ;;  %v1073_v26 = vld [vmem:[%s1315_s4 + $0x10] sm:$0xff]  }
   0xd   : > { %1003 = vmatpush3.bf16.msra.mxu0 %v1069_v0  ;;  %s353_s22 = scalar_lea.vmem %s1311_s0, %s979_s19  ;;  %1016 = vmatprep.subr.bf16.mxu1 %v1107_v25  ;;  %v1074_v27 = vld [vmem:[%s1315_s4 + $0x8] sm:$0xff]   ;;  %v1075_v28 = vld [vmem:[%s1315_s4] sm:$0xff]   ;;  %vm1108_vm4 = vmmov 0   ;;  %vm564_vm5 = vcmask 523264  }
   0xe   : > { %1004 = vmatprep.subr.bf16.mxu0 %v1070_v1  ;;  %v359_v2 = vld [vmem:[%s353_s22] sm:$0xff]  ;;  %v360_v6 = vld [vmem:[%s353_s22 + $0x8] sm:$0xff]  ;;  %1017 = vmatpush3.bf16.msra.mxu1 %v1072_v24 }
   0xf   : > { %v361_v4 = vpack.c.bf16 %v359_v2, %v359_v2  ;;  %v362_v7 = vpack.c.bf16 %v360_v6, %v360_v6  ;;  %1018 = vmatprep.subr.bf16.mxu1 %v1107_v25  ;;  %1024 = vmatprep.mubr.msk.bf16.mxu1 %vm1108_vm4, %v1107_v25  ;;  %v951_v33 = vld [vmem:[%s1314_s3 + $0x3] ss:$0 sm:$0xff]  ;;  %v954_v35 = vld [vmem:[%s1314_s3 + $0x6] ss:$0 sm:$0xff]  ;;  %v952_v36 = vld [vmem:[%s1314_s3 + $0x4] ss:$0 sm:$0xff] }
  0x10   : > { %v950_v37 = vld [vmem:[%s1314_s3 + $0x2] ss:$0 sm:$0xff]  ;;  %v948_v38 = vld [vmem:[%s1314_s3] ss:$0 sm:$0xff]  ;;  %v949_v40 = vld [vmem:[%s1314_s3 + $0x1] ss:$0 sm:$0xff] }
  0x11   : > { %1005 = vmatpush3.bf16.msra.mxu0 %v1070_v1  ;;  %371 = vrot.lane.b32.xlu1 %v361_v4, %s1100_s25  ;;  %v364_v5 = vrot.slane %v361_v4, 4  ;;  %v382_v8 = vrot.slane %v362_v7, 4  ;;  %v955_v42 = vld [vmem:[%s1314_s3 + $0x7] ss:$0 sm:$0xff]  ;;  %v953_v46 = vld [vmem:[%s1314_s3 + $0x5] ss:$0 sm:$0xff] }
  0x12   : > { %367 = vrot.lane.b32.xlu0 %v361_v4, %s1101_s26  ;;  %1006 = vmatprep.subr.bf16.mxu0 %v1071_v3 }
  0x13   : > { %1019 = vmatpush3.bf16.msra.mxu1 %v1073_v26 }
  0x14   : > { %1020 = vmatprep.subr.bf16.mxu1 %v1107_v25 }
  0x15   : > { %1007 = vmatpush3.bf16.msra.mxu0 %v1071_v3  ;;  %369 = vrot.lane.b32.xlu1 %v364_v5, %s1102_s27  ;;  %v956_v3 = vld [vmem:[%s1313_s2] ss:$0 sm:$0xff]  ;;  %s940_s27 = sshll.u32 %s1323_s14, 3 }
  0x16   : > { %365 = vrot.lane.b32.xlu0 %v364_v5, %s1103_s28  ;;  %1028 = vmatprep.subr.bf16.mxu0 %v1107_v25  ;;  %s357_s12 = scalar_lea.vmem %s1321_s10, %s940_s27 }
  0x17   : > { %1021 = vmatpush3.bf16.msra.mxu1 %v1074_v27 }
  0x18   : > { %1022 = vmatprep.subr.bf16.mxu1 %v1107_v25 }
  0x19   : > { %376 = vrot.lane.b32.xlu1 %v361_v4, %s1105_s30 }
  0x1a   : > { %373 = vrot.lane.b32.xlu0 %v364_v5, %s1104_s29 }
  0x1b   : > { %1023 = vmatpush3.bf16.msra.mxu1 %v1075_v28 }
  0x1c   : > { %1040 = vmatprep.subr.bf16.mxu1 %v1107_v25 }
  0x1d   : > { %383 = vrot.lane.b32.xlu1 %v364_v5, %s1106_s11 }
  0x1e   : > { %378 = vrot.lane.b32.xlu0 %v362_v7, %s1105_s30 }
  0x22   : > { %385 = vrot.lane.b32.xlu0 %v382_v8, %s1106_s11  ;;  %v957_v8 = vld [vmem:[%s1316_s5] ss:$0 sm:$0xff] }
  0x83   : > { %v372_v9 = vpop.permute.xlu1 %371 }
  0x84   : > { %v368_v10 = vpop.permute.xlu0 %367 }
  0x87   : > { %v370_v11 = vpop.permute.xlu1 %369 }
  0x88   : > { %v366_v12 = vpop.permute.xlu0 %365  ;;  %v395_v13 = vsel %vm389_vm0, %v368_v10, %v370_v11  ;;  %v1077_v11 = vld [vmem:[%s1317_s6 + $0x10] sm:$0xff]  }
  0x89   : > { %v392_v14 = vsel %vm389_vm0, %v361_v4, %v366_v12 }
  0x8a   : > { %1008 = vmatprep.mubr.msk.bf16.mxu0 %vm426_vm1, %v392_v14 }
  0x8b   : > { %1009 = vmatmul.mubr.msk.bf16.vlgmr.msra.gmra.mxu0 %vm426_vm1, %v395_v13  ;;  %v377_v16 = vpop.permute.xlu1 %376 }
  0x8c   : > { %v374_v15 = vpop.permute.xlu0 %373 }
  0x8d   : > { %v398_v17 = vsel %vm389_vm0, %v372_v9, %v374_v15  ;;  %v1076_v9 = vld [vmem:[%s1317_s6 + $0x18] sm:$0xff]  }
  0x8e   : > { %1012 = vmatprep.mubr.msk.bf16.mxu0 %vm426_vm1, %v398_v17  ;;  %1029 = vmatpush3.bf16.msra.mxu0 %v1076_v9 }
  0x8f   : > { %v384_v19 = vpop.permute.xlu1 %383  ;;  %1030 = vmatprep.subr.bf16.mxu0 %v1107_v25 }
  0x90   : > { %v379_v18 = vpop.permute.xlu0 %378 }
  0x91   : > { %v381_v21 = vsel %vm380_vm2, %v377_v16, %v379_v18  ;;  %v1078_v16 = vld [vmem:[%s1317_s6 + $0x8] sm:$0xff]   ;;  %v1079_v18 = vld [vmem:[%s1317_s6] sm:$0xff]  }
  0x92   : > { %1031 = vmatpush3.bf16.msra.mxu0 %v1077_v11 }
  0x93   : > { %1032 = vmatprep.subr.bf16.mxu0 %v1107_v25 }
  0x94   : > { %v386_v20 = vpop.permute.xlu0 %385 }
  0x95   : > { %v388_v22 = vsel %vm387_vm3, %v384_v19, %v386_v20 }
  0x96   : > { %v401_v23 = vsel %vm389_vm0, %v381_v21, %v388_v22  ;;  %1033 = vmatpush3.bf16.msra.mxu0 %v1078_v16 }
  0x97   : > { %1013 = vmatmul.mubr.msk.bf16.gmra.mxu0 %vm426_vm1, %v401_v23  ;;  %1034 = vmatprep.subr.bf16.mxu0 %v1107_v25 }
  0x98   : > { %1036 = vmatprep.mubr.msk.bf16.mxu0 %vm1108_vm4, %v1107_v25 }
  0x9a   : > { %1035 = vmatpush3.bf16.msra.mxu0 %v1079_v18 }
 0x14b   : > { %v1010_v29 = vpop.f32.mrf.mxu0 }
 0x14c   : > { %v558_v47 = vadd.f32 %v1010_v29, %v950_v37 }
 0x14d   : > { %v469_v30 = vpop.f32.mrf.mxu0 }
 0x14e   : > { %v556_v48 = vadd.f32 %v948_v38, %v469_v30  ;;  %v567_v58 = vsel %vm564_vm5, %v558_v47, -inf }
 0x14f   : > { %v1011_v31 = vpop.f32.mrf.mxu0 }
 0x150   : > { %v559_v39 = vadd.f32 %v1011_v31, %v951_v33  ;;  %v565_v59 = vsel %vm564_vm5, %v556_v48, -inf  ;;  %v1080_v33 = vld [vmem:[%s1319_s8 + $0x18] sm:$0xff]  }
 0x151   : > { %v472_v32 = vpop.f32.mrf.mxu0 }
 0x152   : > { %v557_v49 = vadd.f32 %v949_v40, %v472_v32  ;;  %v568_v51 = vsel %vm564_vm5, %v559_v39, -inf  ;;  %v964_v32 = vld [vmem:[%s1318_s7] ss:$0 sm:$0xff]  ;;  %v1082_v40 = vld [vmem:[%s1319_s8 + $0x8] sm:$0xff]  }
 0x154   : > { %v566_v60 = vsel %vm564_vm5, %v557_v49, -inf }
 0x157   : > { %v1014_v34 = vpop.f32.mrf.mxu0 }
 0x158   : > { %v562_v43 = vadd.f32 %v1014_v34, %v954_v35  ;;  %v1081_v35 = vld [vmem:[%s1319_s8 + $0x10] sm:$0xff]  }
 0x159   : > { %v485_v41 = vpop.f32.mrf.mxu0 }
 0x15a   : > { %v560_v44 = vadd.f32 %v952_v36, %v485_v41  ;;  %v573_v53 = vsel %vm564_vm5, %v562_v43, -inf }
 0x15b   : > { %v1015_v45 = vpop.f32.mrf.mxu0  ;;  %v574_v62 = vmax.f32 %v567_v58, %v573_v53 }
 0x15c   : > { %v563_v50 = vadd.f32 %v1015_v45, %v955_v42  ;;  %v569_v54 = vsel %vm564_vm5, %v560_v44, -inf  ;;  %v1083_v42 = vld [vmem:[%s1319_s8] sm:$0xff]  }
 0x15d   : > { %v488_v52 = vpop.f32.mrf.mxu0  ;;  %v570_v63 = vmax.f32 %v565_v59, %v569_v54 }
 0x15e   : > { %v575_v55 = vsel %vm564_vm5, %v563_v50, -inf  ;;  %v561_v56 = vadd.f32 %v953_v46, %v488_v52 }
 0x15f   : > { %v576_v57 = vmax.f32 %v568_v51, %v575_v55 }
 0x160   : > { %v571_v61 = vsel %vm564_vm5, %v561_v56, -inf }
 0x161   : > { %v572_v0 = vmax.f32 %v566_v60, %v571_v61  ;;  %v578_v1 = vmax.f32 %v574_v62, %v576_v57 }
 0x163   : > { %v577_v2 = vmax.f32 %v570_v63, %v572_v0 }
 0x165   : > { %v579_v4 = vmax.f32 %v577_v2, %v578_v1 }
 0x167   : > { %v587_v5 = vadd.f32 %v956_v3, %v579_v4 }
 0x169   : > { %v588_v6 = vmax.f32 %v587_v5, 0.0 }
 0x16b   : > { %680 = vrot.lane.b32.xlu1 %v588_v6, %s1100_s25  ;;  %v598_v7 = vpack.c.bf16 %v588_v6, %v588_v6 }
 0x16d   : > { %1025 = vmatmul.mubr.msk.bf16.vlgmr.msra.gmra.mxu1 %vm564_vm5, %v598_v7 }
 0x16e   : > { %1048 = vmatprep.mubr.msk.bf16.mxu1 %vm1108_vm4, %v1107_v25  ;;  %1041 = vmatpush3.bf16.msra.mxu1 %v1080_v33 }
 0x16f   : > { %1042 = vmatprep.subr.bf16.mxu1 %v1107_v25 }
 0x172   : > { %1043 = vmatpush3.bf16.msra.mxu1 %v1081_v35 }
 0x173   : > { %1044 = vmatprep.subr.bf16.mxu1 %v1107_v25 }
 0x176   : > { %1045 = vmatpush3.bf16.msra.mxu1 %v1082_v40 }
 0x177   : > { %1046 = vmatprep.subr.bf16.mxu1 %v1107_v25  ;;  %v971_v25 = vld [vmem:[%s1320_s9] ss:$0 sm:$0xff] }
 0x17a   : > { %1047 = vmatpush3.bf16.msra.mxu1 %v1083_v42 }
 0x1dd   : > { %v681_v24 = vpop.permute.xlu1 %680 }
 0x22d   : > { %v666_v10 = vpop.f32.mrf.mxu1 }
 0x22e   : > { %v667_v12 = vadd.f32 %v957_v8, %v666_v10 }
 0x22f   : > { %v1026_v13 = vpop.f32.mrf.mxu1 }
 0x230   : > { %v672_v14 = vmax.f32 %v667_v12, 0.0  ;;  %v963_v19 = vmul.f32 -1.442695, %v667_v12 }
 0x231   : > { %v669_v15 = vpop.f32.mrf.mxu1 }
 0x232   : > { %686 = vrot.lane.b32.xlu0 %v672_v14, %s1100_s25  ;;  %1084 = vpow2.f32 %v963_v19 }
 0x233   : > { %v1027_v17 = vpop.f32.mrf.mxu1 }
 0x23f   : > { %v1085_v20 = vpop.eup %1084 }
 0x240   : > { %v676_v21 = vadd.f32 1.0, %v1085_v20 }
 0x242   : > { %1086 = vrcp.f32 %v676_v21 }
 0x24f   : > { %v1087_v22 = vpop.eup %1086 }
 0x250   : > { %v684_v23 = vsub.f32 1.0, %v1087_v22  ;;  %v683_v27 = vmul.f32 %v1087_v22, %v681_v24 }
 0x2a4   : > { %v687_v26 = vpop.permute.xlu0 %686 }
 0x2a5   : > { %v689_v28 = vmul.f32 %v687_v26, %v684_v23 }
 0x2a7   : > { %v690_v29 = vadd.f32 %v689_v28, %v683_v27 }
 0x2a9   : > { %v700_v30 = vpack.c.bf16 %v690_v29, %v690_v29 }
 0x2ab   : > { %708 = vrot.lane.b32.xlu1 %v700_v30, %s1100_s25 }
 0x31d   : > { %v709_v31 = vpop.permute.xlu1 %708 }
 0x31e   : > { %1037 = vmatmul.mubr.msk.bf16.vlgmr.msra.gmra.mxu0 %vm564_vm5, %v709_v31 }
 0x3de   : > { %v771_v34 = vpop.f32.mrf.mxu0 }
 0x3df   : > { %v772_v36 = vadd.f32 %v964_v32, %v771_v34 }
 0x3e0   : > { %v1038_v37 = vpop.f32.mrf.mxu0 }
 0x3e1   : > { %v777_v38 = vmax.f32 %v772_v36, 0.0  ;;  %v970_v43 = vmul.f32 -1.442695, %v772_v36 }
 0x3e2   : > { %v774_v39 = vpop.f32.mrf.mxu0 }
 0x3e3   : > { %787 = vrot.lane.b32.xlu0 %v777_v38, %s1100_s25  ;;  %1088 = vpow2.f32 %v970_v43 }
 0x3e4   : > { %v1039_v41 = vpop.f32.mrf.mxu0 }
 0x3f0   : > { %v1089_v44 = vpop.eup %1088 }
 0x3f1   : > { %v781_v45 = vadd.f32 1.0, %v1089_v44 }
 0x3f3   : > { %1090 = vrcp.f32 %v781_v45 }
 0x400   : > { %v1091_v46 = vpop.eup %1090 }
 0x401   : > { %v785_v47 = vsub.f32 1.0, %v1091_v46  ;;  %v784_v49 = vmul.f32 %v1091_v46, %v690_v29 }
 0x455   : > { %v788_v48 = vpop.permute.xlu0 %787 }
 0x456   : > { %v790_v50 = vmul.f32 %v788_v48, %v785_v47 }
 0x458   : > { %v791_v51 = vadd.f32 %v790_v50, %v784_v49 }
 0x45a   : > { %v792_v52 = vpack.c.bf16 %v791_v51, %v791_v51 }
 0x45c   : > { %809 = vrot.lane.b32.xlu1 %v792_v52, %s1100_s25 }
 0x4ce   : > { %v810_v53 = vpop.permute.xlu1 %809 }
 0x4cf   : > { %1049 = vmatmul.mubr.msk.bf16.vlgmr.msra.gmra.mxu1 %vm564_vm5, %v810_v53 }
 0x58f   : > { %v872_v54 = vpop.f32.mrf.mxu1 }
 0x590   : > { %v873_v55 = vadd.f32 %v971_v25, %v872_v54 }
 0x591   : > { %v1050_v56 = vpop.f32.mrf.mxu1 }
 0x592   : > { %879 = vst.msk [vmem:[%s357_s12] sm:$0xff] %vm380_vm2, %v873_v55 }
 0x593   : > { %v875_v57 = vpop.f32.mrf.mxu1 }
 0x595   : > { %v1051_v58 = vpop.f32.mrf.mxu1 }
 0x596 PF: > { %s20_s13 = sadd.s32 1, %s1098_s13  }
 0x597   : > { %p17_p4 = scmp.ge.s32.totalorder %s20_s13, 4  }
 0x599   :  { %19 = sbr.rel (!%p17_p4) target bundleno = 1 (0x1), region = 90 }

// kernel: bilm_forward.5
= control target key start
LH: loop header
LB: loop body
LE: loop exit
PB: predicated region body
PF: predicated region fallthrough
CT: control target
= control target key end

     0   :  { %v2965_v0 = vmov 0.0   ;;  %vm2966_vm0 = vmmov 0   ;;  %vm57_vm1 = vcmask 261120   ;;  %v2967_v19 = vmov 1983009808   ;;  %s2969_s12 = smov 32   ;;  %s3506_s2 = inlined_call_operand.vmem [shape: bf16[2,32,128], index: 2, kind: input, shape index: {}]   ;;  %s3507_s0 = inlined_call_operand.vmem [shape: f32[2,16,32], index: 0, kind: input, shape index: {}]   ;;  %s3508_s3 = inlined_call_operand.vmem [shape: f32[2,32,128], index: 3, kind: input, shape index: {}]   ;;  %s3509_s4 = inlined_call_operand.vmem [shape: f32[2,1,128], index: 4, kind: input, shape index: {}]   ;;  %s3510_s1 = inlined_call_operand.vmem [shape: f32[16,1], index: 1, kind: input, shape index: {}]   ;;  %s3511_s5 = inlined_call_operand.vmem [shape: bf16[2,32,32], index: 5, kind: input, shape index: {}]   ;;  %s3512_s6 = inlined_call_operand.vmem [shape: f32[2,1,32], index: 6, kind: input, shape index: {}]   ;;  %s3513_s7 = inlined_call_operand.vmem [shape: f32[2,16,32], index: 7, kind: output, shape index: {}]  }
   0x1   :  { %2601 = vmatprep.subr.bf16.mxu0 %v2965_v0  ;;  %2609 = vmatprep.subr.bf16.mxu1 %v2965_v0  ;;  %v2821_v1 = vld [vmem:[%s3506_s2 + $0x8] sm:$0xff]   ;;  %v2822_v2 = vld [vmem:[%s3506_s2 + $0x18] sm:$0xff]   ;;  %v2823_v3 = vld [vmem:[%s3506_s2] sm:$0xff]   ;;  %v175_v20 = vunpack.c.l.s4 %v2967_v19  ;;  %v177_v21 = vlaneseq  ;;  %vm508_vm2 = vcmask 254976  }
   0x2   :  { %2605 = vmatprep.mubr.msk.bf16.mxu0 %vm2966_vm0, %v2965_v0  ;;  %2613 = vmatprep.mubr.msk.bf16.mxu1 %vm2966_vm0, %v2965_v0  ;;  %v2824_v4 = vld [vmem:[%s3506_s2 + $0x10] sm:$0xff]   ;;  %v27_v5 = vld [vmem:[%s3507_s0] sm:$0xff]  ;;  %v28_v6 = vld [vmem:[%s3507_s0 + $0x8] sm:$0xff] }
   0x3   :  { %2602 = vmatpush3.bf16.msra.mxu0 %v2821_v1  ;;  %2610 = vmatpush3.bf16.msra.mxu1 %v2822_v2  ;;  %v2445_v7 = vld [vmem:[%s3507_s0 + $0x10] sm:$0xff]  ;;  %v29_v8 = vpack.c.bf16 %v28_v6, %v27_v5  ;;  %v2446_v9 = vld [vmem:[%s3507_s0 + $0x18] sm:$0xff]  ;;  %v3071_v14 = vld [vmem:[%s3508_s3 + $0x8] sm:$0xff]  ;;  %v176_v22 = vunpack.c.0.s8 %v175_v20  ;;  %v3133_v23 = vshrl.u32 %v177_v21, 7 }
   0x4   :  { %2603 = vmatprep.subr.bf16.mxu0 %v2965_v0  ;;  %2611 = vmatprep.subr.bf16.mxu1 %v2965_v0  ;;  %v33_v10 = vpack.c.bf16 %v2446_v9, %v2445_v7  ;;  %v3051_v11 = vld [vmem:[%s3508_s3 + $0x18] sm:$0xff]  ;;  %v3063_v13 = vld [vmem:[%s3508_s3 + $0x10] sm:$0xff]  ;;  %v3085_v16 = vld [vmem:[%s3508_s3] sm:$0xff] }
   0x5   :  { %v3057_v12 = vld [vmem:[%s3508_s3 + $0x38] sm:$0xff]  ;;  %v3077_v15 = vld [vmem:[%s3508_s3 + $0x30] sm:$0xff]  ;;  %v3092_v17 = vld [vmem:[%s3508_s3 + $0x28] sm:$0xff]  ;;  %v3139_v25 = vsub.s32 %v176_v22, %v3133_v23 }
   0x6   :  { %v3101_v18 = vld [vmem:[%s3508_s3 + $0x20] sm:$0xff] }
   0x7   :  { %2604 = vmatpush3.bf16.msra.mxu0 %v2823_v3  ;;  %2612 = vmatpush3.bf16.msra.mxu1 %v2824_v4  ;;  %v2447_v24 = vld [vmem:[%s3509_s4] ss:$0 sm:$0xff]  ;;  %v2456_v26 = vld [vmem:[%s3509_s4 + $0x1] ss:$0 sm:$0xff]  ;;  %s2968_s4 = smov 64  }
   0x8   :  { %2617 = vmatprep.subr.mxu0 %v2965_v0  ;;  %2628 = vmatprep.subr.mxu1 %v2965_v0 }
   0xa   :  { %2606 = vmatmul.mubr.msk.bf16.vlgmr.msra.gmra.mxu0 %vm57_vm1, %v29_v8  ;;  %2614 = vmatmul.mubr.msk.bf16.vlgmr.msra.gmra.mxu1 %vm57_vm1, %v33_v10 }
   0xb   :  { %2618 = vmatpush3.msra.mxu0 %v3051_v11  ;;  %2629 = vmatpush3.msra.mxu1 %v3057_v12 }
   0xc   :  { %2619 = vmatprep.subr.mxu0 %v2965_v0  ;;  %2630 = vmatprep.subr.mxu1 %v2965_v0 }
   0xd   :  { %2620 = vmatpush3.msra.mxu0 %v3063_v13  ;;  %2625 = vmatprep.mubr.msk.f32.mxu0 %vm2966_vm0, %v2965_v0 }
   0xe   :  { %2621 = vmatprep.subr.mxu0 %v2965_v0  ;;  %2631 = vmatpush3.msra.mxu1 %v3077_v15 }
   0xf   :  { %2622 = vmatpush3.msra.mxu0 %v3071_v14  ;;  %2632 = vmatprep.subr.mxu1 %v2965_v0 }
  0x10   :  { %2623 = vmatprep.subr.mxu0 %v2965_v0  ;;  %2633 = vmatpush3.msra.mxu1 %v3092_v17 }
  0x11   :  { %2624 = vmatpush3.msra.mxu0 %v3085_v16  ;;  %2634 = vmatprep.subr.mxu1 %v2965_v0 }
  0x12   :  { %2626 = vmatmul.mubr.f32.vlgmr.msra.gmra.mxu0 %v2965_v0  ;;  %2635 = vmatpush3.msra.mxu1 %v3101_v18 }
  0x13   :  { %2636 = vmatprep.mubr.msk.f32.mxu1 %vm2966_vm0, %v2965_v0  ;;  %2639 = vmatprep.subr.mxu0 %v2965_v0 }
  0x14   :  { %2637 = vmatmul.mubr.f32.vlgmr.msra.gmra.mxu1 %v2965_v0  ;;  %2640 = vmatpush3.msra.mxu0 %v3051_v11 }
  0x15   :  { %2650 = vmatprep.subr.mxu1 %v2965_v0  ;;  %2641 = vmatprep.subr.mxu0 %v2965_v0 }
  0x16   :  { %2651 = vmatpush3.msra.mxu1 %v3057_v12  ;;  %2642 = vmatpush3.msra.mxu0 %v3063_v13 }
  0x17   :  { %2652 = vmatprep.subr.mxu1 %v2965_v0  ;;  %2643 = vmatprep.subr.mxu0 %v2965_v0 }
  0x18   :  { %2647 = vmatprep.mubr.msk.f32.mxu0 %vm2966_vm0, %v2965_v0  ;;  %2644 = vmatpush3.msra.mxu0 %v3071_v14 }
  0x19   :  { %2653 = vmatpush3.msra.mxu1 %v3077_v15  ;;  %2645 = vmatprep.subr.mxu0 %v2965_v0 }
  0x1a   :  { %2654 = vmatprep.subr.mxu1 %v2965_v0  ;;  %2646 = vmatpush3.msra.mxu0 %v3085_v16 }
  0x1b   :  { %2655 = vmatpush3.msra.mxu1 %v3092_v17  ;;  %2658 = vmatprep.mubr.msk.f32.mxu1 %vm2966_vm0, %v2965_v0 }
  0x1c   :  { %2656 = vmatprep.subr.mxu1 %v2965_v0  ;;  %2661 = vmatprep.subr.mxu0 %v2965_v0 }
  0x1d   :  { %2657 = vmatpush3.msra.mxu1 %v3101_v18 }
  0x1e   :  { %2672 = vmatprep.subr.mxu1 %v2965_v0 }
  0xca   :  { %v95_v27 = vpop.f32.mrf.mxu0  ;;  %v164_v29 = vpop.f32.mrf.mxu1 }
  0xcb   :  { %v96_v28 = vadd.f32 %v2447_v24, %v95_v27  ;;  %v165_v30 = vadd.f32 %v2456_v26, %v164_v29 }
  0xcc   :  { %v2607_v31 = vpop.f32.mrf.mxu0  ;;  %v2615_v34 = vpop.f32.mrf.mxu1 }
  0xcd   :  { %v173_v32 = vcombine.high %v96_v28, %v96_v28  ;;  %v180_v33 = vrot.slane %v96_v28, %v3139_v25  ;;  %v233_v35 = vcombine.high %v165_v30, %v165_v30  ;;  %v240_v36 = vrot.slane %v165_v30, %v3139_v25 }
  0xce   :  { %v98_v37 = vpop.f32.mrf.mxu0  ;;  %v167_v42 = vpop.f32.mrf.mxu1 }
  0xcf   :  { %v187_v38 = vrot.slane %v173_v32, %v3139_v25  ;;  %v188_v39 = vcombine.high %v180_v33, %v180_v33  ;;  %v215_v40 = vpack.c.bf16 %v180_v33, %v180_v33  ;;  %v99_v41 = vadd.f32 %v2447_v24, %v98_v37 }
  0xd0   :  { %v247_v43 = vrot.slane %v233_v35, %v3139_v25  ;;  %v248_v44 = vcombine.high %v240_v36, %v240_v36  ;;  %v275_v45 = vpack.c.bf16 %v240_v36, %v240_v36  ;;  %v168_v46 = vadd.f32 %v2456_v26, %v167_v42  ;;  %v2608_v47 = vpop.f32.mrf.mxu0  ;;  %v2616_v52 = vpop.f32.mrf.mxu1 }
  0xd1   :  { %v189_v48 = vcombine.high %v187_v38, %v187_v38  ;;  %v216_v49 = vpack.c.bf16 %v188_v39, %v188_v39  ;;  %v217_v50 = vpack.c.bf16 %v187_v38, %v187_v38  ;;  %223 = vst [vmem:[#allocation2] sm:$0x1] %v215_v40  ;;  %v190_v51 = vcombine.high %v99_v41, %v99_v41 }
  0xd2   :  { %v249_v53 = vcombine.high %v247_v43, %v247_v43  ;;  %v276_v54 = vpack.c.bf16 %v248_v44, %v248_v44  ;;  %v277_v55 = vpack.c.bf16 %v247_v43, %v247_v43  ;;  %283 = vst [vmem:[#allocation3] sm:$0x1] %v275_v45  ;;  %v197_v56 = vrot.slane %v99_v41, %v3139_v25  ;;  %v371_v57 = vpop.f32.mrf.mxu0 }
  0xd3   :  { %v218_v58 = vpack.c.bf16 %v189_v48, %v189_v48  ;;  %224 = vst [vmem:[#allocation2 + $0x1] sm:$0x1] %v216_v49  ;;  %225 = vst [vmem:[#allocation2 + $0x2] sm:$0x1] %v217_v50  ;;  %v204_v59 = vrot.slane %v190_v51, %v3139_v25  ;;  %v250_v60 = vcombine.high %v168_v46, %v168_v46 }
  0xd4   :  { %v257_v61 = vrot.slane %v168_v46, %v3139_v25  ;;  %v278_v62 = vpack.c.bf16 %v249_v53, %v249_v53  ;;  %284 = vst [vmem:[#allocation3 + $0x1] sm:$0x1] %v276_v54  ;;  %285 = vst [vmem:[#allocation3 + $0x2] sm:$0x1] %v277_v55  ;;  %v205_v63 = vcombine.high %v197_v56, %v197_v56  ;;  %v2627_v2 = vpop.f32.mrf.mxu0  ;;  %v444_v3 = vpop.f32.mrf.mxu1 }
  0xd5   :  { %v219_v1 = vpack.c.bf16 %v197_v56, %v197_v56  ;;  %226 = vst [vmem:[#allocation2 + $0x3] sm:$0x1] %v218_v58  ;;  %v206_v4 = vcombine.high %v204_v59, %v204_v59  ;;  %v221_v5 = vpack.c.bf16 %v204_v59, %v204_v59  ;;  %v264_v6 = vrot.slane %v250_v60, %v3139_v25 }
  0xd6   :  { %v265_v7 = vcombine.high %v257_v61, %v257_v61  ;;  %286 = vst [vmem:[#allocation3 + $0x3] sm:$0x1] %v278_v62  ;;  %v220_v8 = vpack.c.bf16 %v205_v63, %v205_v63  ;;  %v279_v9 = vpack.c.bf16 %v257_v61, %v257_v61  ;;  %v2638_v10 = vpop.f32.mrf.mxu1 }
  0xd7   :  { %227 = vst [vmem:[#allocation2 + $0x4] sm:$0x1] %v219_v1  ;;  %v222_v19 = vpack.c.bf16 %v206_v4, %v206_v4  ;;  %229 = vst [vmem:[#allocation2 + $0x6] sm:$0x1] %v221_v5  ;;  %v266_v20 = vcombine.high %v264_v6, %v264_v6  ;;  %v281_v22 = vpack.c.bf16 %v264_v6, %v264_v6 }
  0xd8   :  { %v280_v21 = vpack.c.bf16 %v265_v7, %v265_v7  ;;  %228 = vst [vmem:[#allocation2 + $0x5] sm:$0x1] %v220_v8  ;;  %287 = vst [vmem:[#allocation3 + $0x4] sm:$0x1] %v279_v9  ;;  %v300_v24 = vld [vmem:[#allocation2] sm:$0x1] }
  0xd9   :  { %230 = vst [vmem:[#allocation2 + $0x7] sm:$0x1] %v222_v19  ;;  %v282_v26 = vpack.c.bf16 %v266_v20, %v266_v20  ;;  %289 = vst [vmem:[#allocation3 + $0x6] sm:$0x1] %v281_v22  ;;  %v301_v27 = vunpack.c.l.bf16 %v300_v24  ;;  %v376_v28 = vld [vmem:[#allocation3] sm:$0x1] }
  0xda   :  { %288 = vst [vmem:[#allocation3 + $0x5] sm:$0x1] %v280_v21  ;;  %v377_v29 = vunpack.c.l.bf16 %v376_v28  ;;  %v523_v62 = vld [vmem:[#allocation2 + $0x1] sm:$0x1] }
  0xdb   :  { %290 = vst [vmem:[#allocation3 + $0x7] sm:$0x1] %v282_v26  ;;  %v375_v30 = vadd.f32 %v371_v57, %v301_v27  ;;  %v524_v63 = vunpack.c.l.bf16 %v523_v62  ;;  %v599_v2 = vld [vmem:[#allocation3 + $0x1] sm:$0x1] }
  0xdc   :  { %v448_v31 = vadd.f32 %v444_v3, %v377_v29  ;;  %v600_v5 = vunpack.c.l.bf16 %v599_v2 }
  0xdd   :  { %2829 = vtanh.f32 %v375_v30  ;;  %v2464_v34 = vmul.f32 -1.442695, %v375_v30 }
  0xde   :  { %2831 = vtanh.f32 %v448_v31  ;;  %v2465_v35 = vmul.f32 -1.442695, %v448_v31 }
  0xdf   :  { %2833 = vpow2.f32 %v2464_v34 }
  0xe0   :  { %2835 = vpow2.f32 %v2465_v35 }
  0xea   :  { %v2830_v32 = vpop.eup %2829 }
  0xeb   :  { %465 = vrot.lane.b32.xlu0 %v2830_v32, %s2968_s4  ;;  %v2832_v33 = vpop.eup %2831 }
  0xec   :  { %v2834_v36 = vpop.eup %2833 }
  0xed   :  { %v452_v37 = vadd.f32 1.0, %v2834_v36  ;;  %v2836_v38 = vpop.eup %2835 }
  0xee   :  { %v459_v39 = vadd.f32 1.0, %v2836_v38 }
  0xef   :  { %482 = vrot.lane.b32.xlu0 %v2832_v33, %s2968_s4  ;;  %2837 = vrcp.f32 %v452_v37 }
  0xf0   :  { %2839 = vrcp.f32 %v459_v39 }
  0xfc   :  { %v2838_v40 = vpop.eup %2837 }
  0xfd   :  { %v2840_v43 = vpop.eup %2839  ;;  %v463_v46 = vmul.f32 0.0, %v2838_v40 }
  0xfe   :  { %v480_v49 = vmul.f32 0.0, %v2840_v43 }
 0x15d   :  { %v466_v41 = vpop.permute.xlu0 %465 }
 0x15e   :  { %v468_v42 = vmul.f32 %v2838_v40, %v466_v41 }
 0x160   :  { %470 = vrot.lane.b32.xlu1 %v468_v42, %s2969_s12 }
 0x161   :  { %v483_v44 = vpop.permute.xlu0 %482 }
 0x162   :  { %v485_v45 = vmul.f32 %v2840_v43, %v483_v44 }
 0x164   :  { %487 = vrot.lane.b32.xlu1 %v485_v45, %s2969_s12 }
 0x1d2   :  { %v471_v47 = vpop.permute.xlu1 %470 }
 0x1d3   :  { %v3156_v48 = vadd.f32 %v471_v47, %v463_v46 }
 0x1d5   :  { %2841 = vtanh.f32 %v3156_v48 }
 0x1d6   :  { %v488_v50 = vpop.permute.xlu1 %487 }
 0x1d7   :  { %v3159_v51 = vadd.f32 %v488_v50, %v480_v49  ;;  %v749_v49 = vld [vmem:[#allocation2 + $0x2] sm:$0x1] }
 0x1d8   :  { %v750_v50 = vunpack.c.l.bf16 %v749_v49 }
 0x1d9   :  { %2843 = vtanh.f32 %v3159_v51 }
 0x1e2   :  { %v2842_v52 = vpop.eup %2841 }
 0x1e3   :  { %476 = vrot.lane.b32.xlu0 %v2842_v52, %s2968_s4  ;;  %v825_v52 = vld [vmem:[#allocation3 + $0x2] sm:$0x1] }
 0x1e6   :  { %v2844_v53 = vpop.eup %2843 }
 0x1e7   :  { %493 = vrot.lane.b32.xlu1 %v2844_v53, %s2968_s4 }
 0x255   :  { %v477_v54 = vpop.permute.xlu0 %476 }
 0x256   :  { %v479_v55 = vmul.f32 %v2838_v40, %v477_v54 }
 0x258   :  { %v504_v56 = vrot.slane %v479_v55, %v3139_v25  ;;  %v826_v55 = vunpack.c.l.bf16 %v825_v52 }
 0x259   :  { %v494_v57 = vpop.permute.xlu1 %493 }
 0x25a   :  { %v496_v58 = vmul.f32 %v2840_v43, %v494_v57  ;;  %505 = vrot.lane.b32.xlu0 %v504_v56, %s2969_s12 }
 0x25c   :  { %v517_v59 = vrot.slane %v496_v58, %v3139_v25 }
 0x25e   :  { %518 = vrot.lane.b32.xlu1 %v517_v59, %s2969_s12 }
 0x2cc   :  { %v506_v60 = vpop.permute.xlu0 %505 }
 0x2cd   :  { %509 = vst.msk [vmem:[#allocation4] sm:$0x3] %vm508_vm2, %v506_v60  ;;  %2648 = vmatmul.mubr.msk.f32.vlgmr.msra.gmra.mxu0 %vm57_vm1, %v506_v60 }
 0x2ce   :  { %2662 = vmatpush3.msra.mxu0 %v3051_v11  ;;  %2669 = vmatprep.mubr.msk.f32.mxu0 %vm2966_vm0, %v2965_v0 }
 0x2cf   :  { %2663 = vmatprep.subr.mxu0 %v2965_v0 }
 0x2d0   :  { %v519_v61 = vpop.permute.xlu1 %518  ;;  %2664 = vmatpush3.msra.mxu0 %v3063_v13 }
 0x2d1   :  { %521 = vst.msk [vmem:[#allocation5] sm:$0x3] %vm508_vm2, %v519_v61  ;;  %2659 = vmatmul.mubr.msk.f32.vlgmr.msra.gmra.mxu1 %vm57_vm1, %v519_v61  ;;  %2665 = vmatprep.subr.mxu0 %v2965_v0 }
 0x2d2   :  { %2666 = vmatpush3.msra.mxu0 %v3071_v14  ;;  %2673 = vmatpush3.msra.mxu1 %v3057_v12 }
 0x2d3   :  { %2667 = vmatprep.subr.mxu0 %v2965_v0  ;;  %2674 = vmatprep.subr.mxu1 %v2965_v0 }
 0x2d4   :  { %2668 = vmatpush3.msra.mxu0 %v3085_v16  ;;  %2675 = vmatpush3.msra.mxu1 %v3077_v15 }
 0x2d5   :  { %2676 = vmatprep.subr.mxu1 %v2965_v0  ;;  %2680 = vmatprep.mubr.msk.f32.mxu1 %vm2966_vm0, %v2965_v0 }
 0x2d6   :  { %2677 = vmatpush3.msra.mxu1 %v3092_v17  ;;  %2683 = vmatprep.subr.mxu0 %v2965_v0 }
 0x2d7   :  { %2678 = vmatprep.subr.mxu1 %v2965_v0 }
 0x2d8   :  { %2679 = vmatpush3.msra.mxu1 %v3101_v18 }
 0x2d9   :  { %2694 = vmatprep.subr.mxu1 %v2965_v0 }
 0x38d   :  { %v593_v1 = vpop.f32.mrf.mxu0 }
 0x38e   :  { %v597_v3 = vadd.f32 %v593_v1, %v524_v63 }
 0x38f   :  { %v2649_v4 = vpop.f32.mrf.mxu0 }
 0x390   :  { %2845 = vtanh.f32 %v597_v3  ;;  %v2468_v19 = vmul.f32 -1.442695, %v597_v3 }
 0x391   :  { %v669_v6 = vpop.f32.mrf.mxu1 }
 0x392   :  { %v673_v7 = vadd.f32 %v669_v6, %v600_v5 }
 0x393   :  { %v2660_v8 = vpop.f32.mrf.mxu1 }
 0x394   :  { %2847 = vtanh.f32 %v673_v7  ;;  %v2469_v20 = vmul.f32 -1.442695, %v673_v7 }
 0x395   :  { %2849 = vpow2.f32 %v2468_v19 }
 0x396   :  { %2851 = vpow2.f32 %v2469_v20 }
 0x39d   :  { %v2846_v9 = vpop.eup %2845 }
 0x39e   :  { %690 = vrot.lane.b32.xlu0 %v2846_v9, %s2968_s4 }
 0x3a1   :  { %v2848_v10 = vpop.eup %2847 }
 0x3a2   :  { %707 = vrot.lane.b32.xlu1 %v2848_v10, %s2968_s4  ;;  %v2850_v21 = vpop.eup %2849 }
 0x3a3   :  { %v677_v22 = vadd.f32 1.0, %v2850_v21  ;;  %v2852_v24 = vpop.eup %2851 }
 0x3a4   :  { %v684_v26 = vadd.f32 1.0, %v2852_v24 }
 0x3a5   :  { %2853 = vrcp.f32 %v677_v22 }
 0x3a6   :  { %2855 = vrcp.f32 %v684_v26 }
 0x3b2   :  { %v2854_v27 = vpop.eup %2853 }
 0x3b3   :  { %v2856_v30 = vpop.eup %2855  ;;  %v688_v33 = vmul.f32 %v2854_v27, %v3156_v48 }
 0x3b4   :  { %v705_v36 = vmul.f32 %v2856_v30, %v3159_v51 }
 0x410   :  { %v691_v28 = vpop.permute.xlu0 %690 }
 0x411   :  { %v693_v29 = vmul.f32 %v2854_v27, %v691_v28 }
 0x413   :  { %695 = vrot.lane.b32.xlu0 %v693_v29, %s2969_s12 }
 0x414   :  { %v708_v31 = vpop.permute.xlu1 %707 }
 0x415   :  { %v710_v32 = vmul.f32 %v2856_v30, %v708_v31 }
 0x417   :  { %712 = vrot.lane.b32.xlu1 %v710_v32, %s2969_s12 }
 0x485   :  { %v696_v34 = vpop.permute.xlu0 %695 }
 0x486   :  { %v3197_v35 = vadd.f32 %v696_v34, %v688_v33 }
 0x488   :  { %2857 = vtanh.f32 %v3197_v35 }
 0x489   :  { %v713_v37 = vpop.permute.xlu1 %712 }
 0x48a   :  { %v3201_v38 = vadd.f32 %v713_v37, %v705_v36  ;;  %v975_v36 = vld [vmem:[#allocation2 + $0x3] sm:$0x1] }
 0x48b   :  { %v976_v37 = vunpack.c.l.bf16 %v975_v36 }
 0x48c   :  { %2859 = vtanh.f32 %v3201_v38 }
 0x495   :  { %v2858_v39 = vpop.eup %2857 }
 0x496   :  { %701 = vrot.lane.b32.xlu0 %v2858_v39, %s2968_s4  ;;  %v1051_v39 = vld [vmem:[#allocation3 + $0x3] sm:$0x1] }
 0x499   :  { %v2860_v40 = vpop.eup %2859 }
 0x49a   :  { %718 = vrot.lane.b32.xlu1 %v2860_v40, %s2968_s4 }
 0x508   :  { %v702_v41 = vpop.permute.xlu0 %701 }
 0x509   :  { %v704_v42 = vmul.f32 %v2854_v27, %v702_v41 }
 0x50b   :  { %v729_v43 = vrot.slane %v704_v42, %v3139_v25  ;;  %v1052_v42 = vunpack.c.l.bf16 %v1051_v39 }
 0x50c   :  { %v719_v44 = vpop.permute.xlu1 %718 }
 0x50d   :  { %v721_v45 = vmul.f32 %v2856_v30, %v719_v44  ;;  %730 = vrot.lane.b32.xlu0 %v729_v43, %s2969_s12 }
 0x50f   :  { %v742_v46 = vrot.slane %v721_v45, %v3139_v25 }
 0x511   :  { %743 = vrot.lane.b32.xlu1 %v742_v46, %s2969_s12 }
 0x57f   :  { %v731_v47 = vpop.permute.xlu0 %730 }
 0x580   :  { %734 = vst.msk [vmem:[#allocation4 + $0x2] sm:$0x3] %vm508_vm2, %v731_v47  ;;  %2670 = vmatmul.mubr.msk.f32.vlgmr.msra.gmra.mxu0 %vm57_vm1, %v731_v47 }
 0x581   :  { %2684 = vmatpush3.msra.mxu0 %v3051_v11  ;;  %2691 = vmatprep.mubr.msk.f32.mxu0 %vm2966_vm0, %v2965_v0 }
 0x582   :  { %2685 = vmatprep.subr.mxu0 %v2965_v0 }
 0x583   :  { %v744_v48 = vpop.permute.xlu1 %743  ;;  %2686 = vmatpush3.msra.mxu0 %v3063_v13 }
 0x584   :  { %747 = vst.msk [vmem:[#allocation5 + $0x2] sm:$0x3] %vm508_vm2, %v744_v48  ;;  %2681 = vmatmul.mubr.msk.f32.vlgmr.msra.gmra.mxu1 %vm57_vm1, %v744_v48  ;;  %2687 = vmatprep.subr.mxu0 %v2965_v0 }
 0x585   :  { %2688 = vmatpush3.msra.mxu0 %v3071_v14  ;;  %2695 = vmatpush3.msra.mxu1 %v3057_v12 }
 0x586   :  { %2689 = vmatprep.subr.mxu0 %v2965_v0  ;;  %2696 = vmatprep.subr.mxu1 %v2965_v0 }
 0x587   :  { %2690 = vmatpush3.msra.mxu0 %v3085_v16  ;;  %2697 = vmatpush3.msra.mxu1 %v3077_v15 }
 0x588   :  { %2698 = vmatprep.subr.mxu1 %v2965_v0  ;;  %2702 = vmatprep.mubr.msk.f32.mxu1 %vm2966_vm0, %v2965_v0 }
 0x589   :  { %2699 = vmatpush3.msra.mxu1 %v3092_v17  ;;  %2705 = vmatprep.subr.mxu0 %v2965_v0 }
 0x58a   :  { %2700 = vmatprep.subr.mxu1 %v2965_v0 }
 0x58b   :  { %2701 = vmatpush3.msra.mxu1 %v3101_v18 }
 0x58c   :  { %2716 = vmatprep.subr.mxu1 %v2965_v0 }
 0x640   :  { %v819_v51 = vpop.f32.mrf.mxu0 }
 0x641   :  { %v823_v53 = vadd.f32 %v819_v51, %v750_v50 }
 0x642   :  { %v2671_v54 = vpop.f32.mrf.mxu0 }
 0x643   :  { %2861 = vtanh.f32 %v823_v53  ;;  %v2472_v61 = vmul.f32 -1.442695, %v823_v53 }
 0x644   :  { %v895_v56 = vpop.f32.mrf.mxu1 }
 0x645   :  { %v899_v57 = vadd.f32 %v895_v56, %v826_v55 }
 0x646   :  { %v2682_v58 = vpop.f32.mrf.mxu1 }
 0x647   :  { %2863 = vtanh.f32 %v899_v57  ;;  %v2473_v62 = vmul.f32 -1.442695, %v899_v57 }
 0x648   :  { %2865 = vpow2.f32 %v2472_v61 }
 0x649   :  { %2867 = vpow2.f32 %v2473_v62 }
 0x650   :  { %v2862_v59 = vpop.eup %2861 }
 0x651   :  { %916 = vrot.lane.b32.xlu0 %v2862_v59, %s2968_s4 }
 0x654   :  { %v2864_v60 = vpop.eup %2863 }
 0x655   :  { %933 = vrot.lane.b32.xlu1 %v2864_v60, %s2968_s4  ;;  %v2866_v63 = vpop.eup %2865 }
 0x656   :  { %v903_v1 = vadd.f32 1.0, %v2866_v63  ;;  %v2868_v2 = vpop.eup %2867 }
 0x657   :  { %v910_v3 = vadd.f32 1.0, %v2868_v2 }
 0x658   :  { %2869 = vrcp.f32 %v903_v1 }
 0x659   :  { %2871 = vrcp.f32 %v910_v3 }
 0x665   :  { %v2870_v4 = vpop.eup %2869 }
 0x666   :  { %v2872_v7 = vpop.eup %2871  ;;  %v914_v10 = vmul.f32 %v2870_v4, %v3197_v35 }
 0x667   :  { %v931_v21 = vmul.f32 %v2872_v7, %v3201_v38 }
 0x6c3   :  { %v917_v5 = vpop.permute.xlu0 %916 }
 0x6c4   :  { %v919_v6 = vmul.f32 %v2870_v4, %v917_v5 }
 0x6c6   :  { %921 = vrot.lane.b32.xlu0 %v919_v6, %s2969_s12 }
 0x6c7   :  { %v934_v8 = vpop.permute.xlu1 %933 }
 0x6c8   :  { %v936_v9 = vmul.f32 %v2872_v7, %v934_v8 }
 0x6ca   :  { %938 = vrot.lane.b32.xlu1 %v936_v9, %s2969_s12 }
 0x738   :  { %v922_v19 = vpop.permute.xlu0 %921 }
 0x739   :  { %v3239_v20 = vadd.f32 %v922_v19, %v914_v10 }
 0x73b   :  { %2873 = vtanh.f32 %v3239_v20 }
 0x73c   :  { %v939_v22 = vpop.permute.xlu1 %938 }
 0x73d   :  { %v3243_v24 = vadd.f32 %v939_v22, %v931_v21  ;;  %v1201_v21 = vld [vmem:[#allocation2 + $0x4] sm:$0x1] }
 0x73e   :  { %v1202_v22 = vunpack.c.l.bf16 %v1201_v21 }
 0x73f   :  { %2875 = vtanh.f32 %v3243_v24 }
 0x748   :  { %v2874_v26 = vpop.eup %2873 }
 0x749   :  { %927 = vrot.lane.b32.xlu0 %v2874_v26, %s2968_s4  ;;  %v1277_v26 = vld [vmem:[#allocation3 + $0x4] sm:$0x1] }
 0x74c   :  { %v2876_v27 = vpop.eup %2875 }
 0x74d   :  { %944 = vrot.lane.b32.xlu1 %v2876_v27, %s2968_s4 }
 0x7bb   :  { %v928_v28 = vpop.permute.xlu0 %927 }
 0x7bc   :  { %v930_v29 = vmul.f32 %v2870_v4, %v928_v28 }
 0x7be   :  { %v955_v30 = vrot.slane %v930_v29, %v3139_v25  ;;  %v1278_v29 = vunpack.c.l.bf16 %v1277_v26 }
 0x7bf   :  { %v945_v31 = vpop.permute.xlu1 %944 }
 0x7c0   :  { %v947_v32 = vmul.f32 %v2872_v7, %v945_v31  ;;  %956 = vrot.lane.b32.xlu0 %v955_v30, %s2969_s12 }
 0x7c2   :  { %v968_v33 = vrot.slane %v947_v32, %v3139_v25 }
 0x7c4   :  { %969 = vrot.lane.b32.xlu1 %v968_v33, %s2969_s12 }
 0x832   :  { %v957_v34 = vpop.permute.xlu0 %956 }
 0x833   :  { %960 = vst.msk [vmem:[#allocation4 + $0x4] sm:$0x3] %vm508_vm2, %v957_v34  ;;  %2692 = vmatmul.mubr.msk.f32.vlgmr.msra.gmra.mxu0 %vm57_vm1, %v957_v34 }
 0x834   :  { %2706 = vmatpush3.msra.mxu0 %v3051_v11  ;;  %2713 = vmatprep.mubr.msk.f32.mxu0 %vm2966_vm0, %v2965_v0 }
 0x835   :  { %2707 = vmatprep.subr.mxu0 %v2965_v0 }
 0x836   :  { %v970_v35 = vpop.permute.xlu1 %969  ;;  %2708 = vmatpush3.msra.mxu0 %v3063_v13 }
 0x837   :  { %973 = vst.msk [vmem:[#allocation5 + $0x4] sm:$0x3] %vm508_vm2, %v970_v35  ;;  %2703 = vmatmul.mubr.msk.f32.vlgmr.msra.gmra.mxu1 %vm57_vm1, %v970_v35  ;;  %2709 = vmatprep.subr.mxu0 %v2965_v0 }
 0x838   :  { %2710 = vmatpush3.msra.mxu0 %v3071_v14  ;;  %2717 = vmatpush3.msra.mxu1 %v3057_v12 }
 0x839   :  { %2711 = vmatprep.subr.mxu0 %v2965_v0  ;;  %2718 = vmatprep.subr.mxu1 %v2965_v0 }
 0x83a   :  { %2712 = vmatpush3.msra.mxu0 %v3085_v16  ;;  %2719 = vmatpush3.msra.mxu1 %v3077_v15 }
 0x83b   :  { %2720 = vmatprep.subr.mxu1 %v2965_v0  ;;  %2724 = vmatprep.mubr.msk.f32.mxu1 %vm2966_vm0, %v2965_v0 }
 0x83c   :  { %2721 = vmatpush3.msra.mxu1 %v3092_v17  ;;  %2727 = vmatprep.subr.mxu0 %v2965_v0 }
 0x83d   :  { %2722 = vmatprep.subr.mxu1 %v2965_v0 }
 0x83e   :  { %2723 = vmatpush3.msra.mxu1 %v3101_v18 }
 0x83f   :  { %2738 = vmatprep.subr.mxu1 %v2965_v0 }
 0x8f3   :  { %v1045_v38 = vpop.f32.mrf.mxu0 }
 0x8f4   :  { %v1049_v40 = vadd.f32 %v1045_v38, %v976_v37 }
 0x8f5   :  { %v2693_v41 = vpop.f32.mrf.mxu0 }
 0x8f6   :  { %2877 = vtanh.f32 %v1049_v40  ;;  %v2476_v48 = vmul.f32 -1.442695, %v1049_v40 }
 0x8f7   :  { %v1121_v43 = vpop.f32.mrf.mxu1 }
 0x8f8   :  { %v1125_v44 = vadd.f32 %v1121_v43, %v1052_v42 }
 0x8f9   :  { %v2704_v45 = vpop.f32.mrf.mxu1 }
 0x8fa   :  { %2879 = vtanh.f32 %v1125_v44  ;;  %v2477_v49 = vmul.f32 -1.442695, %v1125_v44 }
 0x8fb   :  { %2881 = vpow2.f32 %v2476_v48 }
 0x8fc   :  { %2883 = vpow2.f32 %v2477_v49 }
 0x903   :  { %v2878_v46 = vpop.eup %2877 }
 0x904   :  { %1142 = vrot.lane.b32.xlu0 %v2878_v46, %s2968_s4 }
 0x907   :  { %v2880_v47 = vpop.eup %2879 }
 0x908   :  { %1159 = vrot.lane.b32.xlu1 %v2880_v47, %s2968_s4  ;;  %v2882_v50 = vpop.eup %2881 }
 0x909   :  { %v1129_v51 = vadd.f32 1.0, %v2882_v50  ;;  %v2884_v52 = vpop.eup %2883 }
 0x90a   :  { %v1136_v53 = vadd.f32 1.0, %v2884_v52 }
 0x90b   :  { %2885 = vrcp.f32 %v1129_v51 }
 0x90c   :  { %2887 = vrcp.f32 %v1136_v53 }
 0x918   :  { %v2886_v54 = vpop.eup %2885 }
 0x919   :  { %v2888_v57 = vpop.eup %2887  ;;  %v1140_v60 = vmul.f32 %v2886_v54, %v3239_v20 }
 0x91a   :  { %v1157_v63 = vmul.f32 %v2888_v57, %v3243_v24 }
 0x976   :  { %v1143_v55 = vpop.permute.xlu0 %1142 }
 0x977   :  { %v1145_v56 = vmul.f32 %v2886_v54, %v1143_v55 }
 0x979   :  { %1147 = vrot.lane.b32.xlu0 %v1145_v56, %s2969_s12 }
 0x97a   :  { %v1160_v58 = vpop.permute.xlu1 %1159 }
 0x97b   :  { %v1162_v59 = vmul.f32 %v2888_v57, %v1160_v58 }
 0x97d   :  { %1164 = vrot.lane.b32.xlu1 %v1162_v59, %s2969_s12 }
 0x9eb   :  { %v1148_v61 = vpop.permute.xlu0 %1147 }
 0x9ec   :  { %v3281_v62 = vadd.f32 %v1148_v61, %v1140_v60 }
 0x9ee   :  { %2889 = vtanh.f32 %v3281_v62 }
 0x9ef   :  { %v1165_v1 = vpop.permute.xlu1 %1164 }
 0x9f0   :  { %v3285_v2 = vadd.f32 %v1165_v1, %v1157_v63 }
 0x9f2   :  { %2891 = vtanh.f32 %v3285_v2 }
 0x9fb   :  { %v2890_v3 = vpop.eup %2889 }
 0x9fc   :  { %1153 = vrot.lane.b32.xlu0 %v2890_v3, %s2968_s4 }
 0x9ff   :  { %v2892_v4 = vpop.eup %2891 }
 0xa00   :  { %1170 = vrot.lane.b32.xlu1 %v2892_v4, %s2968_s4 }
 0xa6e   :  { %v1154_v5 = vpop.permute.xlu0 %1153 }
 0xa6f   :  { %v1156_v6 = vmul.f32 %v2886_v54, %v1154_v5 }
 0xa71   :  { %v1181_v7 = vrot.slane %v1156_v6, %v3139_v25 }
 0xa72   :  { %v1171_v8 = vpop.permute.xlu1 %1170 }
 0xa73   :  { %v1173_v9 = vmul.f32 %v2888_v57, %v1171_v8  ;;  %1182 = vrot.lane.b32.xlu0 %v1181_v7, %s2969_s12 }
 0xa75   :  { %v1194_v10 = vrot.slane %v1173_v9, %v3139_v25 }
 0xa77   :  { %1195 = vrot.lane.b32.xlu1 %v1194_v10, %s2969_s12 }
 0xae5   :  { %v1183_v19 = vpop.permute.xlu0 %1182 }
 0xae6   :  { %1186 = vst.msk [vmem:[#allocation4 + $0x6] sm:$0x3] %vm508_vm2, %v1183_v19  ;;  %2714 = vmatmul.mubr.msk.f32.vlgmr.msra.gmra.mxu0 %vm57_vm1, %v1183_v19 }
 0xae7   :  { %2728 = vmatpush3.msra.mxu0 %v3051_v11  ;;  %2735 = vmatprep.mubr.msk.f32.mxu0 %vm2966_vm0, %v2965_v0 }
 0xae8   :  { %2729 = vmatprep.subr.mxu0 %v2965_v0 }
 0xae9   :  { %v1196_v20 = vpop.permute.xlu1 %1195  ;;  %2730 = vmatpush3.msra.mxu0 %v3063_v13 }
 0xaea   :  { %1199 = vst.msk [vmem:[#allocation5 + $0x6] sm:$0x3] %vm508_vm2, %v1196_v20  ;;  %2725 = vmatmul.mubr.msk.f32.vlgmr.msra.gmra.mxu1 %vm57_vm1, %v1196_v20  ;;  %2731 = vmatprep.subr.mxu0 %v2965_v0 }
 0xaeb   :  { %2732 = vmatpush3.msra.mxu0 %v3071_v14  ;;  %2739 = vmatpush3.msra.mxu1 %v3057_v12 }
 0xaec   :  { %2733 = vmatprep.subr.mxu0 %v2965_v0  ;;  %2740 = vmatprep.subr.mxu1 %v2965_v0 }
 0xaed   :  { %2734 = vmatpush3.msra.mxu0 %v3085_v16  ;;  %2741 = vmatpush3.msra.mxu1 %v3077_v15 }
 0xaee   :  { %2742 = vmatprep.subr.mxu1 %v2965_v0  ;;  %2746 = vmatprep.mubr.msk.f32.mxu1 %vm2966_vm0, %v2965_v0 }
 0xaef   :  { %2743 = vmatpush3.msra.mxu1 %v3092_v17  ;;  %2749 = vmatprep.subr.mxu0 %v2965_v0 }
 0xaf0   :  { %2744 = vmatprep.subr.mxu1 %v2965_v0 }
 0xaf1   :  { %2745 = vmatpush3.msra.mxu1 %v3101_v18 }
 0xaf2   :  { %2760 = vmatprep.subr.mxu1 %v2965_v0 }
 0xba6   :  { %v1271_v24 = vpop.f32.mrf.mxu0 }
 0xba7   :  { %v1275_v27 = vadd.f32 %v1271_v24, %v1202_v22 }
 0xba8   :  { %v2715_v28 = vpop.f32.mrf.mxu0 }
 0xba9   :  { %2893 = vtanh.f32 %v1275_v27  ;;  %v2480_v35 = vmul.f32 -1.442695, %v1275_v27 }
 0xbaa   :  { %v1347_v30 = vpop.f32.mrf.mxu1 }
 0xbab   :  { %v1351_v31 = vadd.f32 %v1347_v30, %v1278_v29 }
 0xbac   :  { %v2726_v32 = vpop.f32.mrf.mxu1 }
 0xbad   :  { %2895 = vtanh.f32 %v1351_v31  ;;  %v2481_v36 = vmul.f32 -1.442695, %v1351_v31 }
 0xbae   :  { %2897 = vpow2.f32 %v2480_v35 }
 0xbaf   :  { %2899 = vpow2.f32 %v2481_v36 }
 0xbb6   :  { %v2894_v33 = vpop.eup %2893 }
 0xbb7   :  { %1368 = vrot.lane.b32.xlu0 %v2894_v33, %s2968_s4 }
 0xbba   :  { %v2896_v34 = vpop.eup %2895 }
 0xbbb   :  { %1385 = vrot.lane.b32.xlu1 %v2896_v34, %s2968_s4  ;;  %v2898_v37 = vpop.eup %2897 }
 0xbbc   :  { %v1355_v38 = vadd.f32 1.0, %v2898_v37  ;;  %v2900_v39 = vpop.eup %2899 }
 0xbbd   :  { %v1362_v40 = vadd.f32 1.0, %v2900_v39 }
 0xbbe   :  { %2901 = vrcp.f32 %v1355_v38 }
 0xbbf   :  { %2903 = vrcp.f32 %v1362_v40 }
 0xbcb   :  { %v2902_v41 = vpop.eup %2901 }
 0xbcc   :  { %v2904_v44 = vpop.eup %2903  ;;  %v1366_v47 = vmul.f32 %v2902_v41, %v3281_v62 }
 0xbcd   :  { %v1383_v50 = vmul.f32 %v2904_v44, %v3285_v2 }
 0xc29   :  { %v1369_v42 = vpop.permute.xlu0 %1368 }
 0xc2a   :  { %v1371_v43 = vmul.f32 %v2902_v41, %v1369_v42 }
 0xc2c   :  { %1373 = vrot.lane.b32.xlu0 %v1371_v43, %s2969_s12  ;;  %v2958_v43 = vld [vmem:[%s3508_s3 + $0x10] sm:$0xff] }
 0xc2d   :  { %v1386_v45 = vpop.permute.xlu1 %1385 }
 0xc2e   :  { %v1388_v46 = vmul.f32 %v2904_v44, %v1386_v45  ;;  %v2960_v45 = vld [vmem:[%s3508_s3 + $0x38] sm:$0xff] }
 0xc30   :  { %1390 = vrot.lane.b32.xlu1 %v1388_v46, %s2969_s12  ;;  %v2961_v46 = vld [vmem:[%s3508_s3] sm:$0xff] }
 0xc9e   :  { %v1374_v48 = vpop.permute.xlu0 %1373 }
 0xc9f   :  { %v3323_v49 = vadd.f32 %v1374_v48, %v1366_v47  ;;  %v2962_v47 = vld [vmem:[%s3508_s3 + $0x30] sm:$0xff]  ;;  %v2963_v48 = vld [vmem:[%s3508_s3 + $0x28] sm:$0xff] }
 0xca1   :  { %2905 = vtanh.f32 %v3323_v49 }
 0xca2   :  { %v1391_v51 = vpop.permute.xlu1 %1390 }
 0xca3   :  { %v3327_v52 = vadd.f32 %v1391_v51, %v1383_v50  ;;  %v1653_v50 = vld [vmem:[#allocation2 + $0x6] sm:$0x1] }
 0xca4   :  { %v1654_v51 = vunpack.c.l.bf16 %v1653_v50 }
 0xca5   :  { %2907 = vtanh.f32 %v3327_v52 }
 0xcae   :  { %v2906_v53 = vpop.eup %2905 }
 0xcaf   :  { %1379 = vrot.lane.b32.xlu0 %v2906_v53, %s2968_s4  ;;  %v1729_v53 = vld [vmem:[#allocation3 + $0x6] sm:$0x1] }
 0xcb2   :  { %v2908_v54 = vpop.eup %2907 }
 0xcb3   :  { %1396 = vrot.lane.b32.xlu1 %v2908_v54, %s2968_s4 }
 0xd21   :  { %v1380_v55 = vpop.permute.xlu0 %1379 }
 0xd22   :  { %v1382_v56 = vmul.f32 %v2902_v41, %v1380_v55  ;;  %v2957_v41 = vld [vmem:[%s3508_s3 + $0x18] sm:$0xff] }
 0xd24   :  { %v1407_v57 = vrot.slane %v1382_v56, %v3139_v25  ;;  %v1730_v56 = vunpack.c.l.bf16 %v1729_v53 }
 0xd25   :  { %v1397_v58 = vpop.permute.xlu1 %1396 }
 0xd26   :  { %v1399_v59 = vmul.f32 %v2904_v44, %v1397_v58  ;;  %1408 = vrot.lane.b32.xlu0 %v1407_v57, %s2969_s12  ;;  %v2959_v44 = vld [vmem:[%s3508_s3 + $0x8] sm:$0xff] }
 0xd28   :  { %v1420_v60 = vrot.slane %v1399_v59, %v3139_v25 }
 0xd2a   :  { %1421 = vrot.lane.b32.xlu1 %v1420_v60, %s2969_s12 }
 0xd98   :  { %v1409_v61 = vpop.permute.xlu0 %1408 }
 0xd99   :  { %1412 = vst.msk [vmem:[#allocation4 + $0x8] sm:$0x3] %vm508_vm2, %v1409_v61  ;;  %2736 = vmatmul.mubr.msk.f32.vlgmr.msra.gmra.mxu0 %vm57_vm1, %v1409_v61 }
 0xd9a   :  { %2750 = vmatpush3.msra.mxu0 %v3051_v11  ;;  %2757 = vmatprep.mubr.msk.f32.mxu0 %vm2966_vm0, %v2965_v0  ;;  %v1427_v11 = vld [vmem:[#allocation2 + $0x5] sm:$0x1] }
 0xd9b   :  { %2751 = vmatprep.subr.mxu0 %v2965_v0 }
 0xd9c   :  { %v1422_v62 = vpop.permute.xlu1 %1421  ;;  %2752 = vmatpush3.msra.mxu0 %v3063_v13 }
 0xd9d   :  { %1425 = vst.msk [vmem:[#allocation5 + $0x8] sm:$0x3] %vm508_vm2, %v1422_v62  ;;  %2747 = vmatmul.mubr.msk.f32.vlgmr.msra.gmra.mxu1 %vm57_vm1, %v1422_v62  ;;  %2753 = vmatprep.subr.mxu0 %v2965_v0 }
 0xd9e   :  { %2754 = vmatpush3.msra.mxu0 %v3071_v14  ;;  %2761 = vmatpush3.msra.mxu1 %v3057_v12  ;;  %v1428_v12 = vunpack.c.l.bf16 %v1427_v11  ;;  %v1503_v14 = vld [vmem:[#allocation3 + $0x5] sm:$0x1] }
 0xd9f   :  { %2755 = vmatprep.subr.mxu0 %v2965_v0  ;;  %2762 = vmatprep.subr.mxu1 %v2965_v0  ;;  %v1504_v63 = vunpack.c.l.bf16 %v1503_v14 }
 0xda0   :  { %2756 = vmatpush3.msra.mxu0 %v3085_v16  ;;  %2763 = vmatpush3.msra.mxu1 %v3077_v15 }
 0xda1   :  { %2764 = vmatprep.subr.mxu1 %v2965_v0  ;;  %2768 = vmatprep.mubr.msk.f32.mxu1 %vm2966_vm0, %v2965_v0 }
 0xda2   :  { %2765 = vmatpush3.msra.mxu1 %v3092_v17  ;;  %2771 = vmatprep.subr.mxu0 %v2965_v0 }
 0xda3   :  { %2766 = vmatprep.subr.mxu1 %v2965_v0 }
 0xda4   :  { %2767 = vmatpush3.msra.mxu1 %v3101_v18 }
 0xda5   :  { %2782 = vmatprep.subr.mxu1 %v2965_v0 }
 0xe59   :  { %v1497_v13 = vpop.f32.mrf.mxu0 }
 0xe5a   :  { %v1501_v15 = vadd.f32 %v1497_v13, %v1428_v12 }
 0xe5b   :  { %v2737_v16 = vpop.f32.mrf.mxu0 }
 0xe5c   :  { %2909 = vtanh.f32 %v1501_v15  ;;  %v2484_v18 = vmul.f32 -1.442695, %v1501_v15 }
 0xe5d   :  { %v1573_v1 = vpop.f32.mrf.mxu1 }
 0xe5e   :  { %v1577_v2 = vadd.f32 %v1573_v1, %v1504_v63 }
 0xe5f   :  { %v2748_v3 = vpop.f32.mrf.mxu1 }
 0xe60   :  { %2911 = vtanh.f32 %v1577_v2  ;;  %v2485_v5 = vmul.f32 -1.442695, %v1577_v2 }
 0xe61   :  { %2913 = vpow2.f32 %v2484_v18 }
 0xe62   :  { %2915 = vpow2.f32 %v2485_v5 }
 0xe69   :  { %v2910_v17 = vpop.eup %2909 }
 0xe6a   :  { %1594 = vrot.lane.b32.xlu0 %v2910_v17, %s2968_s4 }
 0xe6d   :  { %v2912_v4 = vpop.eup %2911 }
 0xe6e   :  { %1611 = vrot.lane.b32.xlu1 %v2912_v4, %s2968_s4  ;;  %v2914_v6 = vpop.eup %2913 }
 0xe6f   :  { %v1581_v7 = vadd.f32 1.0, %v2914_v6  ;;  %v2916_v8 = vpop.eup %2915 }
 0xe70   :  { %v1588_v9 = vadd.f32 1.0, %v2916_v8 }
 0xe71   :  { %2917 = vrcp.f32 %v1581_v7 }
 0xe72   :  { %2919 = vrcp.f32 %v1588_v9 }
 0xe7e   :  { %v2918_v10 = vpop.eup %2917 }
 0xe7f   :  { %v2920_v21 = vpop.eup %2919  ;;  %v1592_v26 = vmul.f32 %v2918_v10, %v3323_v49  ;;  %v2964_v49 = vld [vmem:[%s3508_s3 + $0x20] sm:$0xff] }
 0xe80   :  { %v1609_v29 = vmul.f32 %v2920_v21, %v3327_v52 }
 0xedc   :  { %v1595_v19 = vpop.permute.xlu0 %1594 }
 0xedd   :  { %v1597_v20 = vmul.f32 %v2918_v10, %v1595_v19 }
 0xedf   :  { %1599 = vrot.lane.b32.xlu0 %v1597_v20, %s2969_s12 }
 0xee0   :  { %v1612_v22 = vpop.permute.xlu1 %1611 }
 0xee1   :  { %v1614_v24 = vmul.f32 %v2920_v21, %v1612_v22 }
 0xee3   :  { %1616 = vrot.lane.b32.xlu1 %v1614_v24, %s2969_s12 }
 0xf51   :  { %v1600_v27 = vpop.permute.xlu0 %1599 }
 0xf52   :  { %v3365_v28 = vadd.f32 %v1600_v27, %v1592_v26 }
 0xf54   :  { %2921 = vtanh.f32 %v3365_v28 }
 0xf55   :  { %v1617_v30 = vpop.permute.xlu1 %1616 }
 0xf56   :  { %v3369_v31 = vadd.f32 %v1617_v30, %v1609_v29  ;;  %v1879_v29 = vld [vmem:[#allocation2 + $0x7] sm:$0x1] }
 0xf57   :  { %v1880_v30 = vunpack.c.l.bf16 %v1879_v29 }
 0xf58   :  { %2923 = vtanh.f32 %v3369_v31 }
 0xf61   :  { %v2922_v32 = vpop.eup %2921 }
 0xf62   :  { %1605 = vrot.lane.b32.xlu0 %v2922_v32, %s2968_s4  ;;  %v1955_v32 = vld [vmem:[#allocation3 + $0x7] sm:$0x1] }
 0xf65   :  { %v2924_v33 = vpop.eup %2923 }
 0xf66   :  { %1622 = vrot.lane.b32.xlu1 %v2924_v33, %s2968_s4 }
 0xfd4   :  { %v1606_v34 = vpop.permute.xlu0 %1605 }
 0xfd5   :  { %v1608_v35 = vmul.f32 %v2918_v10, %v1606_v34 }
 0xfd7   :  { %v1633_v36 = vrot.slane %v1608_v35, %v3139_v25  ;;  %v1956_v35 = vunpack.c.l.bf16 %v1955_v32  ;;  %v2239_v32 = vld [vmem:[#allocation5] sm:$0x3] }
 0xfd8   :  { %v1623_v37 = vpop.permute.xlu1 %1622 }
 0xfd9   :  { %v1625_v38 = vmul.f32 %v2920_v21, %v1623_v37  ;;  %1634 = vrot.lane.b32.xlu0 %v1633_v36, %s2969_s12 }
 0xfdb   :  { %v1646_v39 = vrot.slane %v1625_v38, %v3139_v25 }
 0xfdd   :  { %1647 = vrot.lane.b32.xlu1 %v1646_v39, %s2969_s12 }
0x104b   :  { %v1635_v40 = vpop.permute.xlu0 %1634 }
0x104c   :  { %1638 = vst.msk [vmem:[#allocation4 + $0xa] sm:$0x3] %vm508_vm2, %v1635_v40  ;;  %2758 = vmatmul.mubr.msk.f32.vlgmr.msra.gmra.mxu0 %vm57_vm1, %v1635_v40 }
0x104d   :  { %2772 = vmatpush3.msra.mxu0 %v2957_v41  ;;  %2779 = vmatprep.mubr.msk.f32.mxu0 %vm2966_vm0, %v2965_v0 }
0x104e   :  { %2773 = vmatprep.subr.mxu0 %v2965_v0 }
0x104f   :  { %v1648_v42 = vpop.permute.xlu1 %1647  ;;  %2774 = vmatpush3.msra.mxu0 %v2958_v43 }
0x1050   :  { %1651 = vst.msk [vmem:[#allocation5 + $0xa] sm:$0x3] %vm508_vm2, %v1648_v42  ;;  %2769 = vmatmul.mubr.msk.f32.vlgmr.msra.gmra.mxu1 %vm57_vm1, %v1648_v42  ;;  %2775 = vmatprep.subr.mxu0 %v2965_v0 }
0x1051   :  { %2776 = vmatpush3.msra.mxu0 %v2959_v44  ;;  %2783 = vmatpush3.msra.mxu1 %v2960_v45 }
0x1052   :  { %2777 = vmatprep.subr.mxu0 %v2965_v0  ;;  %2784 = vmatprep.subr.mxu1 %v2965_v0 }
0x1053   :  { %2778 = vmatpush3.msra.mxu0 %v2961_v46  ;;  %2785 = vmatpush3.msra.mxu1 %v2962_v47 }
0x1054   :  { %2786 = vmatprep.subr.mxu1 %v2965_v0  ;;  %2790 = vmatprep.mubr.msk.f32.mxu1 %vm2966_vm0, %v2965_v0 }
0x1055   :  { %2787 = vmatpush3.msra.mxu1 %v2963_v48  ;;  %2793 = vmatprep.subr.bf16.mxu0 %v2965_v0 }
0x1056   :  { %2788 = vmatprep.subr.mxu1 %v2965_v0 }
0x1057   :  { %2789 = vmatpush3.msra.mxu1 %v2964_v49 }
0x1058   :  { %2801 = vmatprep.subr.bf16.mxu1 %v2965_v0 }
0x110c   :  { %v1723_v52 = vpop.f32.mrf.mxu0 }
0x110d   :  { %v1727_v54 = vadd.f32 %v1723_v52, %v1654_v51 }
0x110e   :  { %v2759_v55 = vpop.f32.mrf.mxu0 }
0x110f   :  { %2925 = vtanh.f32 %v1727_v54  ;;  %v2488_v62 = vmul.f32 -1.442695, %v1727_v54 }
0x1110   :  { %v1799_v57 = vpop.f32.mrf.mxu1 }
0x1111   :  { %v1803_v58 = vadd.f32 %v1799_v57, %v1730_v56 }
0x1112   :  { %v2770_v59 = vpop.f32.mrf.mxu1 }
0x1113   :  { %2927 = vtanh.f32 %v1803_v58  ;;  %v2489_v11 = vmul.f32 -1.442695, %v1803_v58  ;;  %v2970_v59 = vmov 0  }
0x1114   :  { %2929 = vpow2.f32 %v2488_v62  ;;  %2819 = vset.pattern.permute.xlu0 %v2970_v59  ;;  %2820 = vset.pattern.permute.xlu1 %v2970_v59 }
0x1115   :  { %2931 = vpow2.f32 %v2489_v11 }
0x111c   :  { %v2926_v60 = vpop.eup %2925 }
0x111d   :  { %1820 = vrot.lane.b32.xlu0 %v2926_v60, %s2968_s4 }
0x1120   :  { %v2928_v61 = vpop.eup %2927 }
0x1121   :  { %1837 = vrot.lane.b32.xlu1 %v2928_v61, %s2968_s4  ;;  %v2930_v12 = vpop.eup %2929 }
0x1122   :  { %v1807_v13 = vadd.f32 1.0, %v2930_v12  ;;  %v2932_v14 = vpop.eup %2931 }
0x1123   :  { %v1814_v15 = vadd.f32 1.0, %v2932_v14 }
0x1124   :  { %2933 = vrcp.f32 %v1807_v13 }
0x1125   :  { %2935 = vrcp.f32 %v1814_v15  ;;  %v2104_v15 = vld [vmem:[%s3510_s1] sm:$0xff] }
0x1131   :  { %v2934_v16 = vpop.eup %2933 }
0x1132   :  { %v2936_v2 = vpop.eup %2935  ;;  %v1818_v4 = vmul.f32 %v2934_v16, %v3365_v28 }
0x1133   :  { %v1835_v6 = vmul.f32 %v2936_v2, %v3369_v31 }
0x118f   :  { %v1821_v63 = vpop.permute.xlu0 %1820 }
0x1190   :  { %v1823_v1 = vmul.f32 %v2934_v16, %v1821_v63  ;;  %v2105_v63 = vld [vmem:[%s3510_s1 + $0x8] sm:$0xff] }
0x1192   :  { %1825 = vrot.lane.b32.xlu0 %v1823_v1, %s2969_s12  ;;  %v2825_v1 = vld [vmem:[%s3511_s5 + $0x8] sm:$0xff]  }
0x1193   :  { %v1838_v3 = vpop.permute.xlu1 %1837 }
0x1194   :  { %v1840_v17 = vmul.f32 %v2936_v2, %v1838_v3  ;;  %v2827_v3 = vld [vmem:[%s3511_s5] sm:$0xff]  }
0x1196   :  { %1842 = vrot.lane.b32.xlu1 %v1840_v17, %s2969_s12  ;;  %v2828_v17 = vld [vmem:[%s3511_s5 + $0x10] sm:$0xff]  }
0x1204   :  { %v1826_v18 = vpop.permute.xlu0 %1825 }
0x1205   :  { %v1828_v5 = vadd.f32 %v1826_v18, %v1818_v4  ;;  %v2971_v18 = vmov 269488144  }
0x1207   :  { %2937 = vtanh.f32 %v1828_v5 }
0x1208   :  { %v1843_v7 = vpop.permute.xlu1 %1842 }
0x1209   :  { %v1845_v8 = vadd.f32 %v1843_v7, %v1835_v6  ;;  %v2972_v6 = vmov 842150450  }
0x120a   :  { %v2130_v7 = vunpack.c.l.s4 %v2972_v6 }
0x120b   :  { %2939 = vtanh.f32 %v1845_v8 }
0x1214   :  { %v2938_v9 = vpop.eup %2937 }
0x1215   :  { %1831 = vrot.lane.b32.xlu0 %v2938_v9, %s2968_s4 }
0x1218   :  { %v2940_v10 = vpop.eup %2939 }
0x1219   :  { %1848 = vrot.lane.b32.xlu1 %v2940_v10, %s2968_s4 }
0x1287   :  { %v1832_v19 = vpop.permute.xlu0 %1831 }
0x1288   :  { %v1834_v20 = vmul.f32 %v2934_v16, %v1832_v19 }
0x128a   :  { %v1859_v21 = vrot.slane %v1834_v20, %v3139_v25 }
0x128b   :  { %v1849_v22 = vpop.permute.xlu1 %1848 }
0x128c   :  { %v1851_v24 = vmul.f32 %v2936_v2, %v1849_v22  ;;  %1860 = vrot.lane.b32.xlu0 %v1859_v21, %s2969_s12  ;;  %v2826_v2 = vld [vmem:[%s3511_s5 + $0x18] sm:$0xff]   ;;  %v2131_v21 = vunpack.c.0.s8 %v2130_v7 }
0x128e   :  { %v1872_v26 = vrot.slane %v1851_v24, %v3139_v25 }
0x1290   :  { %1873 = vrot.lane.b32.xlu1 %v1872_v26, %s2969_s12 }
0x12fe   :  { %v1861_v27 = vpop.permute.xlu0 %1860 }
0x12ff   :  { %1864 = vst.msk [vmem:[#allocation4 + $0xc] sm:$0x3] %vm508_vm2, %v1861_v27  ;;  %2780 = vmatmul.mubr.msk.f32.vlgmr.msra.gmra.mxu0 %vm57_vm1, %v1861_v27  ;;  %v2134_v27 = vsub.s32 %v2131_v21, %v3133_v23 }
0x1300   :  { %2797 = vmatprep.mubr.msk.bf16.mxu0 %vm2966_vm0, %v2965_v0  ;;  %2794 = vmatpush3.bf16.msra.mxu0 %v2825_v1 }
0x1301   :  { %2795 = vmatprep.subr.bf16.mxu0 %v2965_v0 }
0x1302   :  { %v1874_v28 = vpop.permute.xlu1 %1873 }
0x1303   :  { %1877 = vst.msk [vmem:[#allocation5 + $0xc] sm:$0x3] %vm508_vm2, %v1874_v28  ;;  %2791 = vmatmul.mubr.msk.f32.vlgmr.msra.gmra.mxu1 %vm57_vm1, %v1874_v28 }
0x1304   :  { %2805 = vmatprep.mubr.msk.bf16.mxu1 %vm2966_vm0, %v2965_v0  ;;  %2802 = vmatpush3.bf16.msra.mxu1 %v2826_v2 }
0x1305   :  { %2803 = vmatprep.subr.bf16.mxu1 %v2965_v0  ;;  %2796 = vmatpush3.bf16.msra.mxu0 %v2827_v3  ;;  %v2974_v0 = vmov 1987475062  }
0x1306   :  { %v2144_v10 = vunpack.c.l.s4 %v2974_v0  ;;  %v2112_v59 = vld [vmem:[#allocation4 + $0xc] sm:$0x3] }
0x1308   :  { %2804 = vmatpush3.bf16.msra.mxu1 %v2828_v17  ;;  %v2145_v24 = vunpack.c.0.s8 %v2144_v10 }
0x130a   :  { %v2148_v29 = vsub.s32 %v2145_v24, %v3133_v23  ;;  %v2245_v1 = vld [vmem:[#allocation5 + $0xc] sm:$0x3] }
0x13bf   :  { %v1949_v31 = vpop.f32.mrf.mxu0 }
0x13c0   :  { %v1953_v33 = vadd.f32 %v1949_v31, %v1880_v30  ;;  %v2106_v31 = vld [vmem:[#allocation4] sm:$0x3] }
0x13c1   :  { %v2781_v34 = vpop.f32.mrf.mxu0 }
0x13c2   :  { %2941 = vtanh.f32 %v1953_v33  ;;  %v2492_v41 = vmul.f32 -1.442695, %v1953_v33 }
0x13c3   :  { %v2025_v36 = vpop.f32.mrf.mxu1 }
0x13c4   :  { %v2029_v37 = vadd.f32 %v2025_v36, %v1956_v35 }
0x13c5   :  { %v2792_v38 = vpop.f32.mrf.mxu1 }
0x13c6   :  { %2943 = vtanh.f32 %v2029_v37  ;;  %v2493_v42 = vmul.f32 -1.442695, %v2029_v37  ;;  %v2107_v37 = vld [vmem:[#allocation4 + $0x2] sm:$0x3]  ;;  %v2108_v38 = vld [vmem:[#allocation4 + $0x4] sm:$0x3] }
0x13c7   :  { %2945 = vpow2.f32 %v2492_v41  ;;  %v2241_v41 = vld [vmem:[#allocation5 + $0x4] sm:$0x3] }
0x13c8   :  { %2947 = vpow2.f32 %v2493_v42  ;;  %v2242_v42 = vld [vmem:[#allocation5 + $0x6] sm:$0x3] }
0x13cf   :  { %v2942_v39 = vpop.eup %2941 }
0x13d0   :  { %2046 = vrot.lane.b32.xlu0 %v2942_v39, %s2968_s4  ;;  %v2109_v39 = vld [vmem:[#allocation4 + $0x6] sm:$0x3] }
0x13d3   :  { %v2944_v40 = vpop.eup %2943 }
0x13d4   :  { %2063 = vrot.lane.b32.xlu1 %v2944_v40, %s2968_s4  ;;  %v2946_v43 = vpop.eup %2945  ;;  %v2240_v40 = vld [vmem:[#allocation5 + $0x2] sm:$0x3] }
0x13d5   :  { %v2033_v44 = vadd.f32 1.0, %v2946_v43  ;;  %v2948_v45 = vpop.eup %2947 }
0x13d6   :  { %v2040_v46 = vadd.f32 1.0, %v2948_v45 }
0x13d7   :  { %2949 = vrcp.f32 %v2033_v44 }
0x13d8   :  { %2951 = vrcp.f32 %v2040_v46 }
0x13e4   :  { %v2950_v47 = vpop.eup %2949 }
0x13e5   :  { %v2952_v50 = vpop.eup %2951  ;;  %v2044_v53 = vmul.f32 %v2950_v47, %v1828_v5  ;;  %v2123_v5 = vunpack.c.l.s4 %v2971_v18 }
0x13e6   :  { %v2061_v56 = vmul.f32 %v2952_v50, %v1845_v8  ;;  %v2973_v8 = vmov 1414812756  }
0x13e7   :  { %v2137_v9 = vunpack.c.l.s4 %v2973_v8  ;;  %v2124_v20 = vunpack.c.0.s8 %v2123_v5 }
0x13e9   :  { %v2138_v22 = vunpack.c.0.s8 %v2137_v9  ;;  %v2127_v26 = vsub.s32 %v2124_v20, %v3133_v23 }
0x13eb   :  { %v2141_v28 = vsub.s32 %v2138_v22, %v3133_v23 }
0x1442   :  { %v2047_v48 = vpop.permute.xlu0 %2046 }
0x1443   :  { %v2049_v49 = vmul.f32 %v2950_v47, %v2047_v48 }
0x1445   :  { %2051 = vrot.lane.b32.xlu0 %v2049_v49, %s2969_s12 }
0x1446   :  { %v2064_v51 = vpop.permute.xlu1 %2063 }
0x1447   :  { %v2066_v52 = vmul.f32 %v2952_v50, %v2064_v51 }
0x1449   :  { %2068 = vrot.lane.b32.xlu1 %v2066_v52, %s2969_s12 }
0x14b7   :  { %v2052_v54 = vpop.permute.xlu0 %2051 }
0x14b8   :  { %v2054_v55 = vadd.f32 %v2052_v54, %v2044_v53 }
0x14ba   :  { %2953 = vtanh.f32 %v2054_v55  ;;  %v2110_v55 = vld [vmem:[#allocation4 + $0x8] sm:$0x3] }
0x14bb   :  { %v2069_v57 = vpop.permute.xlu1 %2068 }
0x14bc   :  { %v2071_v58 = vadd.f32 %v2069_v57, %v2061_v56  ;;  %v2111_v56 = vld [vmem:[#allocation4 + $0xa] sm:$0x3] }
0x14be   :  { %2955 = vtanh.f32 %v2071_v58 }
0x14c7   :  { %v2954_v60 = vpop.eup %2953 }
0x14c8   :  { %2057 = vrot.lane.b32.xlu0 %v2954_v60, %s2968_s4 }
0x14cb   :  { %v2956_v61 = vpop.eup %2955 }
0x14cc   :  { %2074 = vrot.lane.b32.xlu1 %v2956_v61, %s2968_s4 }
0x153a   :  { %v2058_v62 = vpop.permute.xlu0 %2057 }
0x153b   :  { %v2060_v11 = vmul.f32 %v2950_v47, %v2058_v62 }
0x153d   :  { %v2085_v12 = vrot.slane %v2060_v11, %v3139_v25 }
0x153e   :  { %v2075_v13 = vpop.permute.xlu1 %2074 }
0x153f   :  { %v2077_v14 = vmul.f32 %v2952_v50, %v2075_v13  ;;  %2086 = vrot.lane.b32.xlu0 %v2085_v12, %s2969_s12  ;;  %v2243_v13 = vld [vmem:[#allocation5 + $0x8] sm:$0x3] }
0x1541   :  { %v2098_v16 = vrot.slane %v2077_v14, %v3139_v25  ;;  %v2244_v14 = vld [vmem:[#allocation5 + $0xa] sm:$0x3] }
0x1543   :  { %2099 = vrot.lane.b32.xlu1 %v2098_v16, %s2969_s12  ;;  %2116 = vperm.xlu0 %2819, %v2104_v15  }
0x1547   :  { %2120 = vperm.xlu1 %2820, %v2105_v63  }
0x15b1   :  { %v2087_v4 = vpop.permute.xlu0 %2086 }
0x15b2   :  { %2090 = vst.msk [vmem:[#allocation4 + $0xe] sm:$0x3] %vm508_vm2, %v2087_v4 }
0x15b5   :  { %v2100_v19 = vpop.permute.xlu1 %2099 }
0x15b6   :  { %2103 = vst.msk [vmem:[#allocation5 + $0xe] sm:$0x3] %vm508_vm2, %v2100_v19 }
0x15b9   :  { %v2113_v60 = vld [vmem:[#allocation4 + $0xe] sm:$0x3] }
0x15bd   :  { %v2246_v2 = vld [vmem:[#allocation5 + $0xe] sm:$0x3] }
0x15be   :  { %v2117_v30 = vpop.permute.xlu0 %2116 }
0x15bf   :  { %v2128_v33 = vrot.slane %v2117_v30, %v2127_v26  ;;  %v2135_v34 = vrot.slane %v2117_v30, %v2134_v27  ;;  %v2142_v35 = vrot.slane %v2117_v30, %v2141_v28  ;;  %v2149_v36 = vrot.slane %v2117_v30, %v2148_v29 }
0x15c1   :  { %v2186_v43 = vmul.f32 %v2128_v33, %v2106_v31  ;;  %v2187_v44 = vmul.f32 %v2135_v34, %v2107_v37  ;;  %v2188_v45 = vmul.f32 %v2142_v35, %v2108_v38  ;;  %v2189_v46 = vmul.f32 %v2149_v36, %v2109_v39  ;;  %v2494_v31 = vld [vmem:[%s3512_s6] ss:$0 sm:$0xff] }
0x15c2   :  { %v2247_v47 = vmul.f32 %v2239_v32, %v2128_v33  ;;  %v2248_v48 = vmul.f32 %v2240_v40, %v2135_v34  ;;  %v2249_v23 = vmul.f32 %v2241_v41, %v2142_v35  ;;  %v2250_v49 = vmul.f32 %v2242_v42, %v2149_v36  ;;  %v2121_v50 = vpop.permute.xlu1 %2120  ;;  %v2503_v33 = vld [vmem:[%s3512_s6 + $0x1] ss:$0 sm:$0xff] }
0x15c3   :  { %v2202_v51 = vcombine.low %v2186_v43, %v2187_v44  ;;  %v2156_v52 = vrot.slane %v2121_v50, %v2127_v26  ;;  %v2163_v53 = vrot.slane %v2121_v50, %v2134_v27  ;;  %v2203_v54 = vcombine.low %v2188_v45, %v2189_v46 }
0x15c4   :  { %v2170_v57 = vrot.slane %v2121_v50, %v2141_v28  ;;  %v2177_v58 = vrot.slane %v2121_v50, %v2148_v29  ;;  %v2263_v11 = vcombine.low %v2247_v47, %v2248_v48  ;;  %v2264_v12 = vcombine.low %v2249_v23, %v2250_v49 }
0x15c5   :  { %v2190_v61 = vmul.f32 %v2156_v52, %v2110_v55  ;;  %v2191_v62 = vmul.f32 %v2163_v53, %v2111_v56  ;;  %v2210_v63 = vrot.slane %v2202_v51, %v3139_v25  ;;  %v2251_v17 = vmul.f32 %v2243_v13, %v2156_v52 }
0x15c6   :  { %v2192_v15 = vmul.f32 %v2170_v57, %v2112_v59  ;;  %v2193_v16 = vmul.f32 %v2177_v58, %v2113_v60  ;;  %v2252_v4 = vmul.f32 %v2244_v14, %v2163_v53  ;;  %v2217_v18 = vrot.slane %v2203_v54, %v3139_v25 }
0x15c7   :  { %v2219_v3 = vcombine.low %v2190_v61, %v2191_v62  ;;  %v2253_v6 = vmul.f32 %v2245_v1, %v2170_v57  ;;  %v2254_v7 = vmul.f32 %v2246_v2, %v2177_v58  ;;  %v2271_v0 = vrot.slane %v2263_v11, %v3139_v25 }
0x15c8   :  { %v2220_v5 = vcombine.low %v2192_v15, %v2193_v16  ;;  %v2280_v9 = vcombine.low %v2251_v17, %v2252_v4  ;;  %v2278_v10 = vrot.slane %v2264_v12, %v3139_v25  ;;  %v2218_v22 = vcombine.low %v2210_v63, %v2217_v18 }
0x15c9   :  { %v2227_v8 = vrot.slane %v2219_v3, %v3139_v25  ;;  %v2281_v20 = vcombine.low %v2253_v6, %v2254_v7 }
0x15ca   :  { %v2234_v19 = vrot.slane %v2220_v5, %v3139_v25  ;;  %v2288_v21 = vrot.slane %v2280_v9, %v3139_v25  ;;  %v2279_v27 = vcombine.low %v2271_v0, %v2278_v10 }
0x15cb   :  { %v2295_v26 = vrot.slane %v2281_v20, %v3139_v25 }
0x15cc   :  { %v2235_v24 = vcombine.low %v2227_v8, %v2234_v19 }
0x15cd   :  { %v2296_v28 = vcombine.low %v2288_v21, %v2295_v26 }
0x15ce   :  { %v2238_v29 = vpack.c.bf16 %v2235_v24, %v2218_v22 }
0x15cf   :  { %v2299_v30 = vpack.c.bf16 %v2296_v28, %v2279_v27 }
0x15d0   :  { %2798 = vmatmul.mubr.msk.bf16.vlgmr.msra.gmra.mxu0 %vm57_vm1, %v2238_v29 }
0x15d1   :  { %2806 = vmatmul.mubr.msk.bf16.vlgmr.msra.gmra.mxu1 %vm57_vm1, %v2299_v30 }
0x1690   :  { %v2360_v32 = vpop.f32.mrf.mxu0 }
0x1691   :  { %v2361_v34 = vadd.f32 %v2494_v31, %v2360_v32  ;;  %v2431_v35 = vpop.f32.mrf.mxu1 }
0x1692   :  { %v2799_v25 = vpop.f32.mrf.mxu0  ;;  %v2432_v36 = vadd.f32 %v2503_v33, %v2431_v35 }
0x1693   :  { %2367 = vst.msk [vmem:[%s3513_s7] sm:$0xff] %vm57_vm1, %v2361_v34  ;;  %v2807_v37 = vpop.f32.mrf.mxu1 }
0x1694   :  { %v2363_v38 = vpop.f32.mrf.mxu0  ;;  %2507 = vst.msk [vmem:[%s3513_s7 + $0x10] sm:$0xff] %vm57_vm1, %v2432_v36 }
0x1695   :  { %v2364_v39 = vadd.f32 %v2494_v31, %v2363_v38  ;;  %v2434_v40 = vpop.f32.mrf.mxu1 }
0x1696   :  { %v2800_v41 = vpop.f32.mrf.mxu0  ;;  %v2435_v42 = vadd.f32 %v2503_v33, %v2434_v40 }
0x1697   :  { %2368 = vst.msk [vmem:[%s3513_s7 + $0x8] sm:$0xff] %vm57_vm1, %v2364_v39  ;;  %v2808_v43 = vpop.f32.mrf.mxu1 }
0x1698   :  { %2508 = vst.msk [vmem:[%s3513_s7 + $0x18] sm:$0xff] %vm57_vm1, %v2435_v42 }

</bundles_post_ra>
